<compile_context>
chip_gen: v6e
topology: v6e:2x2x1
jax: 0.10.0
libtpu: 0.0.40
codegen_flags: <defaults>
</compile_context>

<pallas_src>
import functools

import jax
import jax.numpy as jnp
from jax.experimental import pallas as pl
from jax.experimental.pallas import tpu as pltpu


def _decoder_layer_kernel(
    tgt_ref, mem_ref, mask_ref,
    w_in_s_ref, b_in_s_ref, w_out_s_ref, b_out_s_ref,
    w_in_c_ref, b_in_c_ref, w_out_c_ref, b_out_c_ref,
    ln_g_ref, ln_b_ref,
    w1_ref, b1_ref, w2_ref, b2_ref,
    out_ref, attn_ref,
    *, d_model, nhead, eps=1e-5):
  D = d_model
  H = nhead
  dh = D // H
  scale = 1.0 / (dh ** 0.5)

  Bb, T, _ = tgt_ref.shape
  S = mem_ref.shape[1]

  # Flatten batch block into the sublane axis for all row-wise ops / matmuls.
  x = tgt_ref[...].reshape(Bb * T, D).astype(jnp.float32)      # (Bb*T, D)
  mem = mem_ref[...].reshape(Bb * S, D).astype(jnp.float32)    # (Bb*S, D)
  mask = mask_ref[...].astype(jnp.float32)                     # (T, T) additive

  ln_g = ln_g_ref[...]                                         # (3, D)
  ln_b = ln_b_ref[...]                                         # (3, D)

  def layer_norm(v, idx):
    g = ln_g[idx:idx + 1, :]
    b = ln_b[idx:idx + 1, :]
    mu = jnp.mean(v, axis=-1, keepdims=True)
    var = jnp.mean((v - mu) ** 2, axis=-1, keepdims=True)
    return (v - mu) * jax.lax.rsqrt(var + eps) * g + b

  def attention_core(q, k, v, n_q, n_kv, add_mask, need_attn):
    # q: (Bb*n_q, D), k/v: (Bb*n_kv, D), all f32 (post-bias).
    q3 = q.reshape(Bb, n_q, D)
    k3 = k.reshape(Bb, n_kv, D)
    v3 = v.reshape(Bb, n_kv, D)
    heads = []
    attn_sum = None
    for h in range(H):                       # static unrolled head loop
      lo = h * dh
      qh = (q3[:, :, lo:lo + dh] * scale).astype(jnp.bfloat16)
      kh = k3[:, :, lo:lo + dh].astype(jnp.bfloat16)
      vh = v3[:, :, lo:lo + dh].astype(jnp.bfloat16)
      s = jnp.einsum('bqd,bkd->bqk', qh, kh,
                     preferred_element_type=jnp.float32)       # (Bb, n_q, n_kv)
      if add_mask is not None:
        s = s + add_mask[None, :, :]
      s = s - jnp.max(s, axis=-1, keepdims=True)
      p = jnp.exp(s)
      denom = jnp.sum(p, axis=-1, keepdims=True)
      p = p * pl.reciprocal(denom, approx=True)
      oh = jnp.einsum('bqk,bkd->bqd', p.astype(jnp.bfloat16), vh,
                      preferred_element_type=jnp.float32)      # (Bb, n_q, dh)
      heads.append(oh)
      if need_attn:
        attn_sum = p if attn_sum is None else attn_sum + p
    o = jnp.concatenate(heads, axis=-1).reshape(Bb * n_q, D)   # register concat
    if need_attn:
      attn_sum = attn_sum * (1.0 / H)
    return o, attn_sum

  # ---- self attention: fused QKV projection, residual, norm1 (dropout1 = identity) ----
  x_bf = x.astype(jnp.bfloat16)
  qkv = jnp.dot(x_bf, w_in_s_ref[...],
                preferred_element_type=jnp.float32) + b_in_s_ref[...]
  o_sa, _ = attention_core(qkv[:, :D], qkv[:, D:2 * D], qkv[:, 2 * D:],
                           T, T, mask, need_attn=False)
  sa = jnp.dot(o_sa.astype(jnp.bfloat16), w_out_s_ref[...],
               preferred_element_type=jnp.float32) + b_out_s_ref[...]
  x = layer_norm(x + sa, 0)

  # ---- cross attention: Q from x, fused KV from memory, residual, norm2 ----
  x_bf = x.astype(jnp.bfloat16)
  mem_bf = mem.astype(jnp.bfloat16)
  q_c = jnp.dot(x_bf, w_in_c_ref[:, :D],
                preferred_element_type=jnp.float32) + b_in_c_ref[:, :D]
  kv_c = jnp.dot(mem_bf, w_in_c_ref[:, D:],
                 preferred_element_type=jnp.float32) + b_in_c_ref[:, D:]
  o_ca, attn = attention_core(q_c, kv_c[:, :D], kv_c[:, D:],
                              T, S, None, need_attn=True)
  ca = jnp.dot(o_ca.astype(jnp.bfloat16), w_out_c_ref[...],
               preferred_element_type=jnp.float32) + b_out_c_ref[...]
  x = layer_norm(x + ca, 1)

  # ---- feed-forward + residual + norm3 (dropout, dropout3 = identity) ----
  h1 = jnp.maximum(
      jnp.dot(x.astype(jnp.bfloat16), w1_ref[...],
              preferred_element_type=jnp.float32) + b1_ref[...], 0.0)
  ff = jnp.dot(h1.astype(jnp.bfloat16), w2_ref[...],
               preferred_element_type=jnp.float32) + b2_ref[...]
  x = layer_norm(x + ff, 2)

  out_ref[...] = x.reshape(Bb, T, D).astype(out_ref.dtype)
  attn_ref[...] = attn.astype(attn_ref.dtype)


def transformer_decoder_layer(tgt, memory, params, tgt_mask=None, block_b=None):
  """tgt: (T, B, D), memory: (S, B, D) (PyTorch seq-major).

  Returns (out (T, B, D), attn (B, T, S))."""
  T, B, D = tgt.shape
  S = memory.shape[0]
  Fdim = params["w1"].shape[1]
  nhead = params["nhead"]
  assert D % nhead == 0

  if block_b is None:
    # fill ~128 sublanes per step (Bb*T rows), constrained to a divisor of B
    cap = max(1, min(B, max(1, 128 // T)))
    block_b = 1
    for c in range(cap, 0, -1):
      if B % c == 0:
        block_b = c
        break
  assert B % block_b == 0
  nb = B // block_b

  # TODO(synk): keeping batch-major activations upstream of this layer would remove
  #             these two boundary transposes (each is an extra HBM pass).
  tgt_b = jnp.transpose(tgt, (1, 0, 2)).astype(jnp.float32)     # (B, T, D)
  mem_b = jnp.transpose(memory, (1, 0, 2)).astype(jnp.float32)  # (B, S, D)
  if tgt_mask is None:
    tgt_mask = jnp.zeros((T, T), jnp.float32)
  tgt_mask = tgt_mask.astype(jnp.float32)

  bf = lambda w: w.astype(jnp.bfloat16)   # MXU operands in bf16, f32 accumulation

  def rep(shape):  # replicated (non-batched) operand: whole array every grid step
    n = len(shape)
    return pl.BlockSpec(shape, lambda b, _n=n: (0,) * _n)

  kernel = functools.partial(_decoder_layer_kernel, d_model=D, nhead=nhead)

  grid_spec = pltpu.PrefetchScalarGridSpec(
      num_scalar_prefetch=0,
      grid=(nb,),
      in_specs=[
          pl.BlockSpec((block_b, T, D), lambda b: (b, 0, 0)),   # tgt
          pl.BlockSpec((block_b, S, D), lambda b: (b, 0, 0)),   # memory
          rep((T, T)),                                          # tgt_mask
          rep((D, 3 * D)), rep((1, 3 * D)), rep((D, D)), rep((1, D)),   # self-attn
          rep((D, 3 * D)), rep((1, 3 * D)), rep((D, D)), rep((1, D)),   # cross-attn
          rep((3, D)), rep((3, D)),                                     # LN gamma/beta
          rep((D, Fdim)), rep((1, Fdim)), rep((Fdim, D)), rep((1, D)),  # FFN
      ],
      out_specs=[
          pl.BlockSpec((block_b, T, D), lambda b: (b, 0, 0)),
          pl.BlockSpec((block_b, T, S), lambda b: (b, 0, 0)),
      ],
  )

  out_b, attn = pl.pallas_call(
      kernel,
      out_shape=(jax.ShapeDtypeStruct((B, T, D), jnp.float32),
                 jax.ShapeDtypeStruct((B, T, S), jnp.float32)),
      grid_spec=grid_spec,
      compiler_params=pltpu.CompilerParams(
          dimension_semantics=("parallel",)),
  )(tgt_b, mem_b, tgt_mask,
    bf(params["w_in_s"]), params["b_in_s"], bf(params["w_out_s"]), params["b_out_s"],
    bf(params["w_in_c"]), params["b_in_c"], bf(params["w_out_c"]), params["b_out_c"],
    params["ln_g"], params["ln_b"],
    bf(params["w1"]), params["b1"], bf(params["w2"]), params["b2"])

  return jnp.transpose(out_b, (1, 0, 2)), attn


# ----------------------- pure-JAX reference (for validation) -----------------------
def _reference(tgt, memory, params, tgt_mask):
  T, B, D = tgt.shape
  H = params["nhead"]
  dh = D // H
  x = jnp.transpose(tgt, (1, 0, 2)).astype(jnp.float32)     # (B, T, D)
  mem = jnp.transpose(memory, (1, 0, 2)).astype(jnp.float32)

  def mha(q_in, kv_in, w_in, b_in, w_out, b_out, add_mask):
    q = q_in @ w_in[:, :D] + b_in[:, :D]
    k = kv_in @ w_in[:, D:2 * D] + b_in[:, D:2 * D]
    v = kv_in @ w_in[:, 2 * D:] + b_in[:, 2 * D:]
    Bq, Tq, _ = q.shape
    Skv = k.shape[1]
    qh = q.reshape(Bq, Tq, H, dh).transpose(0, 2, 1, 3) * (dh ** -0.5)
    kh = k.reshape(Bq, Skv, H, dh).transpose(0, 2, 1, 3)
    vh = v.reshape(Bq, Skv, H, dh).transpose(0, 2, 1, 3)
    s = jnp.einsum("bhqd,bhkd->bhqk", qh, kh, precision="highest")
    if add_mask is not None:
      s = s + add_mask[None, None]
    p = jax.nn.softmax(s, axis=-1)
    o = jnp.einsum("bhqk,bhkd->bhqd", p, vh, precision="highest")
    o = o.transpose(0, 2, 1, 3).reshape(Bq, Tq, D)
    return o @ w_out + b_out, jnp.mean(p, axis=1)

  def ln(v, i):
    mu = v.mean(-1, keepdims=True)
    var = ((v - mu) ** 2).mean(-1, keepdims=True)
    return (v - mu) * jax.lax.rsqrt(var + 1e-5) * params["ln_g"][i] + params["ln_b"][i]

  sa, _ = mha(x, x, params["w_in_s"], params["b_in_s"],
              params["w_out_s"], params["b_out_s"], tgt_mask)
  x = ln(x + sa, 0)
  ca, attn = mha(x, mem, params["w_in_c"], params["b_in_c"],
                 params["w_out_c"], params["b_out_c"], None)
  x = ln(x + ca, 1)
  ff = jnp.maximum(x @ params["w1"] + params["b1"], 0.0) @ params["w2"] + params["b2"]
  x = ln(x + ff, 2)
  return jnp.transpose(x, (1, 0, 2)), attn


if __name__ == "__main__":
  # Small shapes implied by the module: seq-major tgt/memory, d_model split over heads.
  # d_model chosen = 128 so the lane dimension is dense.
  T, S, B, D, NHEAD, FF = 8, 16, 4, 128, 4, 256

  key = jax.random.PRNGKey(0)
  ks = jax.random.split(key, 20)
  sc = 0.05
  params = {
      "nhead": NHEAD,
      "w_in_s": sc * jax.random.normal(ks[0], (D, 3 * D), jnp.float32),
      "b_in_s": sc * jax.random.normal(ks[1], (1, 3 * D), jnp.float32),
      "w_out_s": sc * jax.random.normal(ks[2], (D, D), jnp.float32),
      "b_out_s": sc * jax.random.normal(ks[3], (1, D), jnp.float32),
      "w_in_c": sc * jax.random.normal(ks[4], (D, 3 * D), jnp.float32),
      "b_in_c": sc * jax.random.normal(ks[5], (1, 3 * D), jnp.float32),
      "w_out_c": sc * jax.random.normal(ks[6], (D, D), jnp.float32),
      "b_out_c": sc * jax.random.normal(ks[7], (1, D), jnp.float32),
      "ln_g": jnp.ones((3, D), jnp.float32),
      "ln_b": jnp.zeros((3, D), jnp.float32),
      "w1": sc * jax.random.normal(ks[8], (D, FF), jnp.float32),
      "b1": sc * jax.random.normal(ks[9], (1, FF), jnp.float32),
      "w2": sc * jax.random.normal(ks[10], (FF, D), jnp.float32),
      "b2": sc * jax.random.normal(ks[11], (1, D), jnp.float32),
  }

  tgt = jax.random.normal(ks[12], (T, B, D), jnp.float32)
  memory = jax.random.normal(ks[13], (S, B, D), jnp.float32)

  # Causal additive mask for the self-attention (standard decoder tgt_mask).
  causal = jnp.where(jnp.arange(T)[None, :] > jnp.arange(T)[:, None], -1e9, 0.0)
  causal = causal.astype(jnp.float32)

  out, attn = transformer_decoder_layer(tgt, memory, params, tgt_mask=causal, block_b=2)
  out = jax.block_until_ready(out)
  attn = jax.block_until_ready(attn)

  ref_out, ref_attn = _reference(tgt, memory, params, causal)
  assert out.shape == (T, B, D) and attn.shape == (B, T, S)
  # bf16 MXU operands (f32 accumulation) -> slightly looser tolerance than pure f32.
  assert jnp.allclose(out, ref_out, atol=3e-2, rtol=3e-2)
  assert jnp.allclose(attn, ref_attn, atol=2e-2, rtol=2e-2)

  print("KERNEL_OK")
</pallas_src>

<mosaic_0001>
module attributes {stable_mosaic.version = 11 : i64} {
  func.func @_decoder_layer_kernel(%arg0: i32, %arg1: memref<2x8x128xf32, #tpu.memory_space<vmem>>, %arg2: memref<2x16x128xf32, #tpu.memory_space<vmem>>, %arg3: memref<8x8xf32, #tpu.memory_space<vmem>>, %arg4: memref<128x384xbf16, #tpu.memory_space<vmem>>, %arg5: memref<1x384xf32, #tpu.memory_space<vmem>>, %arg6: memref<128x128xbf16, #tpu.memory_space<vmem>>, %arg7: memref<1x128xf32, #tpu.memory_space<vmem>>, %arg8: memref<128x384xbf16, #tpu.memory_space<vmem>>, %arg9: memref<1x384xf32, #tpu.memory_space<vmem>>, %arg10: memref<128x128xbf16, #tpu.memory_space<vmem>>, %arg11: memref<1x128xf32, #tpu.memory_space<vmem>>, %arg12: memref<3x128xf32, #tpu.memory_space<vmem>>, %arg13: memref<3x128xf32, #tpu.memory_space<vmem>>, %arg14: memref<128x256xbf16, #tpu.memory_space<vmem>>, %arg15: memref<1x256xf32, #tpu.memory_space<vmem>>, %arg16: memref<256x128xbf16, #tpu.memory_space<vmem>>, %arg17: memref<1x128xf32, #tpu.memory_space<vmem>>, %arg18: memref<2x8x128xf32, #tpu.memory_space<vmem>>, %arg19: memref<2x8x16xf32, #tpu.memory_space<vmem>>) attributes {dimension_semantics = [#tpu.dimension_semantics<parallel>], iteration_bounds = array<i64: 2>, scalar_prefetch = 0 : i64, scratch_operands = 0 : i64, tpu.core_type = #tpu.core_type<tc>, window_params = [{transform_indices = @transform_0, window_bounds = array<i64: 2, 8, 128>}, {transform_indices = @transform_1, window_bounds = array<i64: 2, 16, 128>}, {pipeline_mode = #tpu.pipeline_mode<synchronous>, transform_indices = @transform_2, window_bounds = array<i64: 8, 8>}, {pipeline_mode = #tpu.pipeline_mode<synchronous>, transform_indices = @transform_3, window_bounds = array<i64: 128, 384>}, {pipeline_mode = #tpu.pipeline_mode<synchronous>, transform_indices = @transform_4, window_bounds = array<i64: 1, 384>}, {pipeline_mode = #tpu.pipeline_mode<synchronous>, transform_indices = @transform_5, window_bounds = array<i64: 128, 128>}, {pipeline_mode = #tpu.pipeline_mode<synchronous>, transform_indices = @transform_6, window_bounds = array<i64: 1, 128>}, {pipeline_mode = #tpu.pipeline_mode<synchronous>, transform_indices = @transform_7, window_bounds = array<i64: 128, 384>}, {pipeline_mode = #tpu.pipeline_mode<synchronous>, transform_indices = @transform_8, window_bounds = array<i64: 1, 384>}, {pipeline_mode = #tpu.pipeline_mode<synchronous>, transform_indices = @transform_9, window_bounds = array<i64: 128, 128>}, {pipeline_mode = #tpu.pipeline_mode<synchronous>, transform_indices = @transform_10, window_bounds = array<i64: 1, 128>}, {pipeline_mode = #tpu.pipeline_mode<synchronous>, transform_indices = @transform_11, window_bounds = array<i64: 3, 128>}, {pipeline_mode = #tpu.pipeline_mode<synchronous>, transform_indices = @transform_12, window_bounds = array<i64: 3, 128>}, {pipeline_mode = #tpu.pipeline_mode<synchronous>, transform_indices = @transform_13, window_bounds = array<i64: 128, 256>}, {pipeline_mode = #tpu.pipeline_mode<synchronous>, transform_indices = @transform_14, window_bounds = array<i64: 1, 256>}, {pipeline_mode = #tpu.pipeline_mode<synchronous>, transform_indices = @transform_15, window_bounds = array<i64: 256, 128>}, {pipeline_mode = #tpu.pipeline_mode<synchronous>, transform_indices = @transform_16, window_bounds = array<i64: 1, 128>}, {transform_indices = @transform_17, window_bounds = array<i64: 2, 8, 128>}, {transform_indices = @transform_18, window_bounds = array<i64: 2, 8, 16>}]} {
    %c0 = arith.constant 0 : index
    %c0_0 = arith.constant 0 : index
    %c0_1 = arith.constant 0 : index
    %0 = vector.load %arg1[%c0, %c0_0, %c0_1] : memref<2x8x128xf32, #tpu.memory_space<vmem>>, vector<2x8x128xf32>
    %1 = vector.shape_cast %0 : vector<2x8x128xf32> to vector<16x128xf32>
    %c0_2 = arith.constant 0 : index
    %c0_3 = arith.constant 0 : index
    %c0_4 = arith.constant 0 : index
    %2 = vector.load %arg2[%c0_2, %c0_3, %c0_4] : memref<2x16x128xf32, #tpu.memory_space<vmem>>, vector<2x16x128xf32>
    %3 = vector.shape_cast %2 : vector<2x16x128xf32> to vector<32x128xf32>
    %c0_5 = arith.constant 0 : index
    %c0_6 = arith.constant 0 : index
    %4 = vector.load %arg3[%c0_5, %c0_6] : memref<8x8xf32, #tpu.memory_space<vmem>>, vector<8x8xf32>
    %c0_7 = arith.constant 0 : index
    %c0_8 = arith.constant 0 : index
    %5 = vector.load %arg12[%c0_7, %c0_8] : memref<3x128xf32, #tpu.memory_space<vmem>>, vector<3x128xf32>
    %c0_9 = arith.constant 0 : index
    %c0_10 = arith.constant 0 : index
    %6 = vector.load %arg13[%c0_9, %c0_10] : memref<3x128xf32, #tpu.memory_space<vmem>>, vector<3x128xf32>
    %7 = arith.truncf %1 : vector<16x128xf32> to vector<16x128xbf16>
    %c0_11 = arith.constant 0 : index
    %c0_12 = arith.constant 0 : index
    %8 = vector.load %arg4[%c0_11, %c0_12] : memref<128x384xbf16, #tpu.memory_space<vmem>>, vector<128x384xbf16>
    %cst = arith.constant dense<0.000000e+00> : vector<16x384xf32>
    %9 = tpu.matmul %7, %8, %cst {dimension_numbers = #tpu.dot_dimension_numbers<[1], [0], [0], [1], [0, 0, 1, 1], [], []>} : vector<16x128xbf16>, vector<128x384xbf16>, vector<16x384xf32> -> vector<16x384xf32>
    %c0_13 = arith.constant 0 : index
    %c0_14 = arith.constant 0 : index
    %10 = vector.load %arg5[%c0_13, %c0_14] : memref<1x384xf32, #tpu.memory_space<vmem>>, vector<1x384xf32>
    %11 = vector.broadcast %10 : vector<1x384xf32> to vector<16x384xf32>
    %12 = arith.addf %9, %11 : vector<16x384xf32>
    %13 = vector.extract_strided_slice %12 {offsets = [0, 0], sizes = [16, 128], strides = [1, 1]} : vector<16x384xf32> to vector<16x128xf32>
    %14 = vector.extract_strided_slice %12 {offsets = [0, 128], sizes = [16, 128], strides = [1, 1]} : vector<16x384xf32> to vector<16x128xf32>
    %15 = vector.extract_strided_slice %12 {offsets = [0, 256], sizes = [16, 128], strides = [1, 1]} : vector<16x384xf32> to vector<16x128xf32>
    %16 = vector.shape_cast %13 : vector<16x128xf32> to vector<2x8x128xf32>
    %17 = vector.shape_cast %14 : vector<16x128xf32> to vector<2x8x128xf32>
    %18 = vector.shape_cast %15 : vector<16x128xf32> to vector<2x8x128xf32>
    %19 = vector.extract_strided_slice %16 {offsets = [0, 0, 0], sizes = [2, 8, 32], strides = [1, 1, 1]} : vector<2x8x128xf32> to vector<2x8x32xf32>
    %cst_15 = arith.constant 0.176776692 : f32
    %20 = vector.broadcast %cst_15 : f32 to vector<2x8x32xf32>
    %21 = arith.mulf %19, %20 : vector<2x8x32xf32>
    %22 = arith.truncf %21 : vector<2x8x32xf32> to vector<2x8x32xbf16>
    %23 = vector.extract_strided_slice %17 {offsets = [0, 0, 0], sizes = [2, 8, 32], strides = [1, 1, 1]} : vector<2x8x128xf32> to vector<2x8x32xf32>
    %24 = arith.truncf %23 : vector<2x8x32xf32> to vector<2x8x32xbf16>
    %25 = vector.extract_strided_slice %18 {offsets = [0, 0, 0], sizes = [2, 8, 32], strides = [1, 1, 1]} : vector<2x8x128xf32> to vector<2x8x32xf32>
    %26 = arith.truncf %25 : vector<2x8x32xf32> to vector<2x8x32xbf16>
    "tpu.trace_start"() <{level = 10 : i32, message = "bqd,bkd->bqk"}> : () -> ()
    %cst_16 = arith.constant dense<0.000000e+00> : vector<2x8x8xf32>
    %27 = tpu.matmul %22, %24, %cst_16 {dimension_numbers = #tpu.dot_dimension_numbers<[2], [2], [1], [1], [0, 0, 0, 1, 1, 1], [0], [0]>} : vector<2x8x32xbf16>, vector<2x8x32xbf16>, vector<2x8x8xf32> -> vector<2x8x8xf32>
    "tpu.trace_stop"() : () -> ()
    %28 = vector.shape_cast %4 : vector<8x8xf32> to vector<1x8x8xf32>
    %29 = vector.broadcast %28 : vector<1x8x8xf32> to vector<2x8x8xf32>
    %30 = arith.addf %27, %29 : vector<2x8x8xf32>
    %cst_17 = arith.constant dense<0xFF800000> : vector<2x8xf32>
    %31 = vector.multi_reduction <maximumf>, %30, %cst_17 [2] : vector<2x8x8xf32> to vector<2x8xf32>
    %32 = vector.shape_cast %31 : vector<2x8xf32> to vector<2x8x1xf32>
    %33 = vector.broadcast %32 : vector<2x8x1xf32> to vector<2x8x8xf32>
    %34 = arith.subf %30, %33 : vector<2x8x8xf32>
    %35 = math.exp %34 : vector<2x8x8xf32>
    %cst_18 = arith.constant dense<0.000000e+00> : vector<2x8xf32>
    %36 = vector.multi_reduction <add>, %35, %cst_18 [2] : vector<2x8x8xf32> to vector<2x8xf32>
    %37 = vector.shape_cast %36 : vector<2x8xf32> to vector<2x8x1xf32>
    %38 = tpu.reciprocal %37 {approx = true} : vector<2x8x1xf32> -> vector<2x8x1xf32>
    %39 = vector.broadcast %38 : vector<2x8x1xf32> to vector<2x8x8xf32>
    %40 = arith.mulf %35, %39 : vector<2x8x8xf32>
    %41 = arith.truncf %40 : vector<2x8x8xf32> to vector<2x8x8xbf16>
    "tpu.trace_start"() <{level = 10 : i32, message = "bqk,bkd->bqd"}> : () -> ()
    %cst_19 = arith.constant dense<0.000000e+00> : vector<2x8x32xf32>
    %42 = tpu.matmul %41, %26, %cst_19 {dimension_numbers = #tpu.dot_dimension_numbers<[2], [1], [1], [2], [0, 0, 0, 1, 1, 2], [0], [0]>} : vector<2x8x8xbf16>, vector<2x8x32xbf16>, vector<2x8x32xf32> -> vector<2x8x32xf32>
    "tpu.trace_stop"() : () -> ()
    %43 = vector.extract_strided_slice %16 {offsets = [0, 0, 32], sizes = [2, 8, 32], strides = [1, 1, 1]} : vector<2x8x128xf32> to vector<2x8x32xf32>
    %cst_20 = arith.constant 0.176776692 : f32
    %44 = vector.broadcast %cst_20 : f32 to vector<2x8x32xf32>
    %45 = arith.mulf %43, %44 : vector<2x8x32xf32>
    %46 = arith.truncf %45 : vector<2x8x32xf32> to vector<2x8x32xbf16>
    %47 = vector.extract_strided_slice %17 {offsets = [0, 0, 32], sizes = [2, 8, 32], strides = [1, 1, 1]} : vector<2x8x128xf32> to vector<2x8x32xf32>
    %48 = arith.truncf %47 : vector<2x8x32xf32> to vector<2x8x32xbf16>
    %49 = vector.extract_strided_slice %18 {offsets = [0, 0, 32], sizes = [2, 8, 32], strides = [1, 1, 1]} : vector<2x8x128xf32> to vector<2x8x32xf32>
    %50 = arith.truncf %49 : vector<2x8x32xf32> to vector<2x8x32xbf16>
    "tpu.trace_start"() <{level = 10 : i32, message = "bqd,bkd->bqk"}> : () -> ()
    %cst_21 = arith.constant dense<0.000000e+00> : vector<2x8x8xf32>
    %51 = tpu.matmul %46, %48, %cst_21 {dimension_numbers = #tpu.dot_dimension_numbers<[2], [2], [1], [1], [0, 0, 0, 1, 1, 1], [0], [0]>} : vector<2x8x32xbf16>, vector<2x8x32xbf16>, vector<2x8x8xf32> -> vector<2x8x8xf32>
    "tpu.trace_stop"() : () -> ()
    %52 = vector.shape_cast %4 : vector<8x8xf32> to vector<1x8x8xf32>
    %53 = vector.broadcast %52 : vector<1x8x8xf32> to vector<2x8x8xf32>
    %54 = arith.addf %51, %53 : vector<2x8x8xf32>
    %cst_22 = arith.constant dense<0xFF800000> : vector<2x8xf32>
    %55 = vector.multi_reduction <maximumf>, %54, %cst_22 [2] : vector<2x8x8xf32> to vector<2x8xf32>
    %56 = vector.shape_cast %55 : vector<2x8xf32> to vector<2x8x1xf32>
    %57 = vector.broadcast %56 : vector<2x8x1xf32> to vector<2x8x8xf32>
    %58 = arith.subf %54, %57 : vector<2x8x8xf32>
    %59 = math.exp %58 : vector<2x8x8xf32>
    %cst_23 = arith.constant dense<0.000000e+00> : vector<2x8xf32>
    %60 = vector.multi_reduction <add>, %59, %cst_23 [2] : vector<2x8x8xf32> to vector<2x8xf32>
    %61 = vector.shape_cast %60 : vector<2x8xf32> to vector<2x8x1xf32>
    %62 = tpu.reciprocal %61 {approx = true} : vector<2x8x1xf32> -> vector<2x8x1xf32>
    %63 = vector.broadcast %62 : vector<2x8x1xf32> to vector<2x8x8xf32>
    %64 = arith.mulf %59, %63 : vector<2x8x8xf32>
    %65 = arith.truncf %64 : vector<2x8x8xf32> to vector<2x8x8xbf16>
    "tpu.trace_start"() <{level = 10 : i32, message = "bqk,bkd->bqd"}> : () -> ()
    %cst_24 = arith.constant dense<0.000000e+00> : vector<2x8x32xf32>
    %66 = tpu.matmul %65, %50, %cst_24 {dimension_numbers = #tpu.dot_dimension_numbers<[2], [1], [1], [2], [0, 0, 0, 1, 1, 2], [0], [0]>} : vector<2x8x8xbf16>, vector<2x8x32xbf16>, vector<2x8x32xf32> -> vector<2x8x32xf32>
    "tpu.trace_stop"() : () -> ()
    %67 = vector.extract_strided_slice %16 {offsets = [0, 0, 64], sizes = [2, 8, 32], strides = [1, 1, 1]} : vector<2x8x128xf32> to vector<2x8x32xf32>
    %cst_25 = arith.constant 0.176776692 : f32
    %68 = vector.broadcast %cst_25 : f32 to vector<2x8x32xf32>
    %69 = arith.mulf %67, %68 : vector<2x8x32xf32>
    %70 = arith.truncf %69 : vector<2x8x32xf32> to vector<2x8x32xbf16>
    %71 = vector.extract_strided_slice %17 {offsets = [0, 0, 64], sizes = [2, 8, 32], strides = [1, 1, 1]} : vector<2x8x128xf32> to vector<2x8x32xf32>
    %72 = arith.truncf %71 : vector<2x8x32xf32> to vector<2x8x32xbf16>
    %73 = vector.extract_strided_slice %18 {offsets = [0, 0, 64], sizes = [2, 8, 32], strides = [1, 1, 1]} : vector<2x8x128xf32> to vector<2x8x32xf32>
    %74 = arith.truncf %73 : vector<2x8x32xf32> to vector<2x8x32xbf16>
    "tpu.trace_start"() <{level = 10 : i32, message = "bqd,bkd->bqk"}> : () -> ()
    %cst_26 = arith.constant dense<0.000000e+00> : vector<2x8x8xf32>
    %75 = tpu.matmul %70, %72, %cst_26 {dimension_numbers = #tpu.dot_dimension_numbers<[2], [2], [1], [1], [0, 0, 0, 1, 1, 1], [0], [0]>} : vector<2x8x32xbf16>, vector<2x8x32xbf16>, vector<2x8x8xf32> -> vector<2x8x8xf32>
    "tpu.trace_stop"() : () -> ()
    %76 = vector.shape_cast %4 : vector<8x8xf32> to vector<1x8x8xf32>
    %77 = vector.broadcast %76 : vector<1x8x8xf32> to vector<2x8x8xf32>
    %78 = arith.addf %75, %77 : vector<2x8x8xf32>
    %cst_27 = arith.constant dense<0xFF800000> : vector<2x8xf32>
    %79 = vector.multi_reduction <maximumf>, %78, %cst_27 [2] : vector<2x8x8xf32> to vector<2x8xf32>
    %80 = vector.shape_cast %79 : vector<2x8xf32> to vector<2x8x1xf32>
    %81 = vector.broadcast %80 : vector<2x8x1xf32> to vector<2x8x8xf32>
    %82 = arith.subf %78, %81 : vector<2x8x8xf32>
    %83 = math.exp %82 : vector<2x8x8xf32>
    %cst_28 = arith.constant dense<0.000000e+00> : vector<2x8xf32>
    %84 = vector.multi_reduction <add>, %83, %cst_28 [2] : vector<2x8x8xf32> to vector<2x8xf32>
    %85 = vector.shape_cast %84 : vector<2x8xf32> to vector<2x8x1xf32>
    %86 = tpu.reciprocal %85 {approx = true} : vector<2x8x1xf32> -> vector<2x8x1xf32>
    %87 = vector.broadcast %86 : vector<2x8x1xf32> to vector<2x8x8xf32>
    %88 = arith.mulf %83, %87 : vector<2x8x8xf32>
    %89 = arith.truncf %88 : vector<2x8x8xf32> to vector<2x8x8xbf16>
    "tpu.trace_start"() <{level = 10 : i32, message = "bqk,bkd->bqd"}> : () -> ()
    %cst_29 = arith.constant dense<0.000000e+00> : vector<2x8x32xf32>
    %90 = tpu.matmul %89, %74, %cst_29 {dimension_numbers = #tpu.dot_dimension_numbers<[2], [1], [1], [2], [0, 0, 0, 1, 1, 2], [0], [0]>} : vector<2x8x8xbf16>, vector<2x8x32xbf16>, vector<2x8x32xf32> -> vector<2x8x32xf32>
    "tpu.trace_stop"() : () -> ()
    %91 = vector.extract_strided_slice %16 {offsets = [0, 0, 96], sizes = [2, 8, 32], strides = [1, 1, 1]} : vector<2x8x128xf32> to vector<2x8x32xf32>
    %cst_30 = arith.constant 0.176776692 : f32
    %92 = vector.broadcast %cst_30 : f32 to vector<2x8x32xf32>
    %93 = arith.mulf %91, %92 : vector<2x8x32xf32>
    %94 = arith.truncf %93 : vector<2x8x32xf32> to vector<2x8x32xbf16>
    %95 = vector.extract_strided_slice %17 {offsets = [0, 0, 96], sizes = [2, 8, 32], strides = [1, 1, 1]} : vector<2x8x128xf32> to vector<2x8x32xf32>
    %96 = arith.truncf %95 : vector<2x8x32xf32> to vector<2x8x32xbf16>
    %97 = vector.extract_strided_slice %18 {offsets = [0, 0, 96], sizes = [2, 8, 32], strides = [1, 1, 1]} : vector<2x8x128xf32> to vector<2x8x32xf32>
    %98 = arith.truncf %97 : vector<2x8x32xf32> to vector<2x8x32xbf16>
    "tpu.trace_start"() <{level = 10 : i32, message = "bqd,bkd->bqk"}> : () -> ()
    %cst_31 = arith.constant dense<0.000000e+00> : vector<2x8x8xf32>
    %99 = tpu.matmul %94, %96, %cst_31 {dimension_numbers = #tpu.dot_dimension_numbers<[2], [2], [1], [1], [0, 0, 0, 1, 1, 1], [0], [0]>} : vector<2x8x32xbf16>, vector<2x8x32xbf16>, vector<2x8x8xf32> -> vector<2x8x8xf32>
    "tpu.trace_stop"() : () -> ()
    %100 = vector.shape_cast %4 : vector<8x8xf32> to vector<1x8x8xf32>
    %101 = vector.broadcast %100 : vector<1x8x8xf32> to vector<2x8x8xf32>
    %102 = arith.addf %99, %101 : vector<2x8x8xf32>
    %cst_32 = arith.constant dense<0xFF800000> : vector<2x8xf32>
    %103 = vector.multi_reduction <maximumf>, %102, %cst_32 [2] : vector<2x8x8xf32> to vector<2x8xf32>
    %104 = vector.shape_cast %103 : vector<2x8xf32> to vector<2x8x1xf32>
    %105 = vector.broadcast %104 : vector<2x8x1xf32> to vector<2x8x8xf32>
    %106 = arith.subf %102, %105 : vector<2x8x8xf32>
    %107 = math.exp %106 : vector<2x8x8xf32>
    %cst_33 = arith.constant dense<0.000000e+00> : vector<2x8xf32>
    %108 = vector.multi_reduction <add>, %107, %cst_33 [2] : vector<2x8x8xf32> to vector<2x8xf32>
    %109 = vector.shape_cast %108 : vector<2x8xf32> to vector<2x8x1xf32>
    %110 = tpu.reciprocal %109 {approx = true} : vector<2x8x1xf32> -> vector<2x8x1xf32>
    %111 = vector.broadcast %110 : vector<2x8x1xf32> to vector<2x8x8xf32>
    %112 = arith.mulf %107, %111 : vector<2x8x8xf32>
    %113 = arith.truncf %112 : vector<2x8x8xf32> to vector<2x8x8xbf16>
    "tpu.trace_start"() <{level = 10 : i32, message = "bqk,bkd->bqd"}> : () -> ()
    %cst_34 = arith.constant dense<0.000000e+00> : vector<2x8x32xf32>
    %114 = tpu.matmul %113, %98, %cst_34 {dimension_numbers = #tpu.dot_dimension_numbers<[2], [1], [1], [2], [0, 0, 0, 1, 1, 2], [0], [0]>} : vector<2x8x8xbf16>, vector<2x8x32xbf16>, vector<2x8x32xf32> -> vector<2x8x32xf32>
    "tpu.trace_stop"() : () -> ()
    %115 = tpu.concatenate %42, %66, %90, %114 in 2 : vector<2x8x32xf32>, vector<2x8x32xf32>, vector<2x8x32xf32>, vector<2x8x32xf32> -> vector<2x8x128xf32>
    %116 = vector.shape_cast %115 : vector<2x8x128xf32> to vector<16x128xf32>
    %117 = arith.truncf %116 : vector<16x128xf32> to vector<16x128xbf16>
    %c0_35 = arith.constant 0 : index
    %c0_36 = arith.constant 0 : index
    %118 = vector.load %arg6[%c0_35, %c0_36] : memref<128x128xbf16, #tpu.memory_space<vmem>>, vector<128x128xbf16>
    %cst_37 = arith.constant dense<0.000000e+00> : vector<16x128xf32>
    %119 = tpu.matmul %117, %118, %cst_37 {dimension_numbers = #tpu.dot_dimension_numbers<[1], [0], [0], [1], [0, 0, 1, 1], [], []>} : vector<16x128xbf16>, vector<128x128xbf16>, vector<16x128xf32> -> vector<16x128xf32>
    %c0_38 = arith.constant 0 : index
    %c0_39 = arith.constant 0 : index
    %120 = vector.load %arg7[%c0_38, %c0_39] : memref<1x128xf32, #tpu.memory_space<vmem>>, vector<1x128xf32>
    %121 = vector.broadcast %120 : vector<1x128xf32> to vector<16x128xf32>
    %122 = arith.addf %119, %121 : vector<16x128xf32>
    %123 = arith.addf %1, %122 : vector<16x128xf32>
    %124 = vector.extract_strided_slice %5 {offsets = [0, 0], sizes = [1, 128], strides = [1, 1]} : vector<3x128xf32> to vector<1x128xf32>
    %125 = vector.extract_strided_slice %6 {offsets = [0, 0], sizes = [1, 128], strides = [1, 1]} : vector<3x128xf32> to vector<1x128xf32>
    %cst_40 = arith.constant dense<0.000000e+00> : vector<16xf32>
    %126 = vector.multi_reduction <add>, %123, %cst_40 [1] : vector<16x128xf32> to vector<16xf32>
    %127 = vector.shape_cast %126 : vector<16xf32> to vector<16x1xf32>
    %cst_41 = arith.constant 1.280000e+02 : f32
    %128 = vector.broadcast %cst_41 : f32 to vector<16x1xf32>
    %129 = arith.divf %127, %128 : vector<16x1xf32>
    %130 = vector.broadcast %129 : vector<16x1xf32> to vector<16x128xf32>
    %131 = arith.subf %123, %130 : vector<16x128xf32>
    %132 = arith.mulf %131, %131 : vector<16x128xf32>
    %cst_42 = arith.constant dense<0.000000e+00> : vector<16xf32>
    %133 = vector.multi_reduction <add>, %132, %cst_42 [1] : vector<16x128xf32> to vector<16xf32>
    %134 = vector.shape_cast %133 : vector<16xf32> to vector<16x1xf32>
    %cst_43 = arith.constant 1.280000e+02 : f32
    %135 = vector.broadcast %cst_43 : f32 to vector<16x1xf32>
    %136 = arith.divf %134, %135 : vector<16x1xf32>
    %137 = vector.broadcast %129 : vector<16x1xf32> to vector<16x128xf32>
    %138 = arith.subf %123, %137 : vector<16x128xf32>
    %cst_44 = arith.constant 9.99999974E-6 : f32
    %139 = vector.broadcast %cst_44 : f32 to vector<16x1xf32>
    %140 = arith.addf %136, %139 : vector<16x1xf32>
    %141 = math.rsqrt %140 : vector<16x1xf32>
    %142 = vector.broadcast %141 : vector<16x1xf32> to vector<16x128xf32>
    %143 = arith.mulf %138, %142 : vector<16x128xf32>
    %144 = vector.broadcast %124 : vector<1x128xf32> to vector<16x128xf32>
    %145 = arith.mulf %143, %144 : vector<16x128xf32>
    %146 = vector.broadcast %125 : vector<1x128xf32> to vector<16x128xf32>
    %147 = arith.addf %145, %146 : vector<16x128xf32>
    %148 = arith.truncf %147 : vector<16x128xf32> to vector<16x128xbf16>
    %149 = arith.truncf %3 : vector<32x128xf32> to vector<32x128xbf16>
    %c0_45 = arith.constant 0 : index
    %c0_46 = arith.constant 0 : index
    %150 = vector.load %arg8[%c0_45, %c0_46] : memref<128x384xbf16, #tpu.memory_space<vmem>>, vector<128x128xbf16>
    %cst_47 = arith.constant dense<0.000000e+00> : vector<16x128xf32>
    %151 = tpu.matmul %148, %150, %cst_47 {dimension_numbers = #tpu.dot_dimension_numbers<[1], [0], [0], [1], [0, 0, 1, 1], [], []>} : vector<16x128xbf16>, vector<128x128xbf16>, vector<16x128xf32> -> vector<16x128xf32>
    %c0_48 = arith.constant 0 : index
    %c0_49 = arith.constant 0 : index
    %152 = vector.load %arg9[%c0_48, %c0_49] : memref<1x384xf32, #tpu.memory_space<vmem>>, vector<1x128xf32>
    %153 = vector.broadcast %152 : vector<1x128xf32> to vector<16x128xf32>
    %154 = arith.addf %151, %153 : vector<16x128xf32>
    %c0_50 = arith.constant 0 : index
    %c128 = arith.constant 128 : index
    %155 = vector.load %arg8[%c0_50, %c128] : memref<128x384xbf16, #tpu.memory_space<vmem>>, vector<128x256xbf16>
    %cst_51 = arith.constant dense<0.000000e+00> : vector<32x256xf32>
    %156 = tpu.matmul %149, %155, %cst_51 {dimension_numbers = #tpu.dot_dimension_numbers<[1], [0], [0], [1], [0, 0, 1, 1], [], []>} : vector<32x128xbf16>, vector<128x256xbf16>, vector<32x256xf32> -> vector<32x256xf32>
    %c0_52 = arith.constant 0 : index
    %c128_53 = arith.constant 128 : index
    %157 = vector.load %arg9[%c0_52, %c128_53] : memref<1x384xf32, #tpu.memory_space<vmem>>, vector<1x256xf32>
    %158 = vector.broadcast %157 : vector<1x256xf32> to vector<32x256xf32>
    %159 = arith.addf %156, %158 : vector<32x256xf32>
    %160 = vector.extract_strided_slice %159 {offsets = [0, 0], sizes = [32, 128], strides = [1, 1]} : vector<32x256xf32> to vector<32x128xf32>
    %161 = vector.extract_strided_slice %159 {offsets = [0, 128], sizes = [32, 128], strides = [1, 1]} : vector<32x256xf32> to vector<32x128xf32>
    %162 = vector.shape_cast %154 : vector<16x128xf32> to vector<2x8x128xf32>
    %163 = vector.shape_cast %160 : vector<32x128xf32> to vector<2x16x128xf32>
    %164 = vector.shape_cast %161 : vector<32x128xf32> to vector<2x16x128xf32>
    %165 = vector.extract_strided_slice %162 {offsets = [0, 0, 0], sizes = [2, 8, 32], strides = [1, 1, 1]} : vector<2x8x128xf32> to vector<2x8x32xf32>
    %cst_54 = arith.constant 0.176776692 : f32
    %166 = vector.broadcast %cst_54 : f32 to vector<2x8x32xf32>
    %167 = arith.mulf %165, %166 : vector<2x8x32xf32>
    %168 = arith.truncf %167 : vector<2x8x32xf32> to vector<2x8x32xbf16>
    %169 = vector.extract_strided_slice %163 {offsets = [0, 0, 0], sizes = [2, 16, 32], strides = [1, 1, 1]} : vector<2x16x128xf32> to vector<2x16x32xf32>
    %170 = arith.truncf %169 : vector<2x16x32xf32> to vector<2x16x32xbf16>
    %171 = vector.extract_strided_slice %164 {offsets = [0, 0, 0], sizes = [2, 16, 32], strides = [1, 1, 1]} : vector<2x16x128xf32> to vector<2x16x32xf32>
    %172 = arith.truncf %171 : vector<2x16x32xf32> to vector<2x16x32xbf16>
    "tpu.trace_start"() <{level = 10 : i32, message = "bqd,bkd->bqk"}> : () -> ()
    %cst_55 = arith.constant dense<0.000000e+00> : vector<2x8x16xf32>
    %173 = tpu.matmul %168, %170, %cst_55 {dimension_numbers = #tpu.dot_dimension_numbers<[2], [2], [1], [1], [0, 0, 0, 1, 1, 1], [0], [0]>} : vector<2x8x32xbf16>, vector<2x16x32xbf16>, vector<2x8x16xf32> -> vector<2x8x16xf32>
    "tpu.trace_stop"() : () -> ()
    %cst_56 = arith.constant dense<0xFF800000> : vector<2x8xf32>
    %174 = vector.multi_reduction <maximumf>, %173, %cst_56 [2] : vector<2x8x16xf32> to vector<2x8xf32>
    %175 = vector.shape_cast %174 : vector<2x8xf32> to vector<2x8x1xf32>
    %176 = vector.broadcast %175 : vector<2x8x1xf32> to vector<2x8x16xf32>
    %177 = arith.subf %173, %176 : vector<2x8x16xf32>
    %178 = math.exp %177 : vector<2x8x16xf32>
    %cst_57 = arith.constant dense<0.000000e+00> : vector<2x8xf32>
    %179 = vector.multi_reduction <add>, %178, %cst_57 [2] : vector<2x8x16xf32> to vector<2x8xf32>
    %180 = vector.shape_cast %179 : vector<2x8xf32> to vector<2x8x1xf32>
    %181 = tpu.reciprocal %180 {approx = true} : vector<2x8x1xf32> -> vector<2x8x1xf32>
    %182 = vector.broadcast %181 : vector<2x8x1xf32> to vector<2x8x16xf32>
    %183 = arith.mulf %178, %182 : vector<2x8x16xf32>
    %184 = arith.truncf %183 : vector<2x8x16xf32> to vector<2x8x16xbf16>
    "tpu.trace_start"() <{level = 10 : i32, message = "bqk,bkd->bqd"}> : () -> ()
    %cst_58 = arith.constant dense<0.000000e+00> : vector<2x8x32xf32>
    %185 = tpu.matmul %184, %172, %cst_58 {dimension_numbers = #tpu.dot_dimension_numbers<[2], [1], [1], [2], [0, 0, 0, 1, 1, 2], [0], [0]>} : vector<2x8x16xbf16>, vector<2x16x32xbf16>, vector<2x8x32xf32> -> vector<2x8x32xf32>
    "tpu.trace_stop"() : () -> ()
    %186 = vector.extract_strided_slice %162 {offsets = [0, 0, 32], sizes = [2, 8, 32], strides = [1, 1, 1]} : vector<2x8x128xf32> to vector<2x8x32xf32>
    %cst_59 = arith.constant 0.176776692 : f32
    %187 = vector.broadcast %cst_59 : f32 to vector<2x8x32xf32>
    %188 = arith.mulf %186, %187 : vector<2x8x32xf32>
    %189 = arith.truncf %188 : vector<2x8x32xf32> to vector<2x8x32xbf16>
    %190 = vector.extract_strided_slice %163 {offsets = [0, 0, 32], sizes = [2, 16, 32], strides = [1, 1, 1]} : vector<2x16x128xf32> to vector<2x16x32xf32>
    %191 = arith.truncf %190 : vector<2x16x32xf32> to vector<2x16x32xbf16>
    %192 = vector.extract_strided_slice %164 {offsets = [0, 0, 32], sizes = [2, 16, 32], strides = [1, 1, 1]} : vector<2x16x128xf32> to vector<2x16x32xf32>
    %193 = arith.truncf %192 : vector<2x16x32xf32> to vector<2x16x32xbf16>
    "tpu.trace_start"() <{level = 10 : i32, message = "bqd,bkd->bqk"}> : () -> ()
    %cst_60 = arith.constant dense<0.000000e+00> : vector<2x8x16xf32>
    %194 = tpu.matmul %189, %191, %cst_60 {dimension_numbers = #tpu.dot_dimension_numbers<[2], [2], [1], [1], [0, 0, 0, 1, 1, 1], [0], [0]>} : vector<2x8x32xbf16>, vector<2x16x32xbf16>, vector<2x8x16xf32> -> vector<2x8x16xf32>
    "tpu.trace_stop"() : () -> ()
    %cst_61 = arith.constant dense<0xFF800000> : vector<2x8xf32>
    %195 = vector.multi_reduction <maximumf>, %194, %cst_61 [2] : vector<2x8x16xf32> to vector<2x8xf32>
    %196 = vector.shape_cast %195 : vector<2x8xf32> to vector<2x8x1xf32>
    %197 = vector.broadcast %196 : vector<2x8x1xf32> to vector<2x8x16xf32>
    %198 = arith.subf %194, %197 : vector<2x8x16xf32>
    %199 = math.exp %198 : vector<2x8x16xf32>
    %cst_62 = arith.constant dense<0.000000e+00> : vector<2x8xf32>
    %200 = vector.multi_reduction <add>, %199, %cst_62 [2] : vector<2x8x16xf32> to vector<2x8xf32>
    %201 = vector.shape_cast %200 : vector<2x8xf32> to vector<2x8x1xf32>
    %202 = tpu.reciprocal %201 {approx = true} : vector<2x8x1xf32> -> vector<2x8x1xf32>
    %203 = vector.broadcast %202 : vector<2x8x1xf32> to vector<2x8x16xf32>
    %204 = arith.mulf %199, %203 : vector<2x8x16xf32>
    %205 = arith.truncf %204 : vector<2x8x16xf32> to vector<2x8x16xbf16>
    "tpu.trace_start"() <{level = 10 : i32, message = "bqk,bkd->bqd"}> : () -> ()
    %cst_63 = arith.constant dense<0.000000e+00> : vector<2x8x32xf32>
    %206 = tpu.matmul %205, %193, %cst_63 {dimension_numbers = #tpu.dot_dimension_numbers<[2], [1], [1], [2], [0, 0, 0, 1, 1, 2], [0], [0]>} : vector<2x8x16xbf16>, vector<2x16x32xbf16>, vector<2x8x32xf32> -> vector<2x8x32xf32>
    "tpu.trace_stop"() : () -> ()
    %207 = arith.addf %183, %204 : vector<2x8x16xf32>
    %208 = vector.extract_strided_slice %162 {offsets = [0, 0, 64], sizes = [2, 8, 32], strides = [1, 1, 1]} : vector<2x8x128xf32> to vector<2x8x32xf32>
    %cst_64 = arith.constant 0.176776692 : f32
    %209 = vector.broadcast %cst_64 : f32 to vector<2x8x32xf32>
    %210 = arith.mulf %208, %209 : vector<2x8x32xf32>
    %211 = arith.truncf %210 : vector<2x8x32xf32> to vector<2x8x32xbf16>
    %212 = vector.extract_strided_slice %163 {offsets = [0, 0, 64], sizes = [2, 16, 32], strides = [1, 1, 1]} : vector<2x16x128xf32> to vector<2x16x32xf32>
    %213 = arith.truncf %212 : vector<2x16x32xf32> to vector<2x16x32xbf16>
    %214 = vector.extract_strided_slice %164 {offsets = [0, 0, 64], sizes = [2, 16, 32], strides = [1, 1, 1]} : vector<2x16x128xf32> to vector<2x16x32xf32>
    %215 = arith.truncf %214 : vector<2x16x32xf32> to vector<2x16x32xbf16>
    "tpu.trace_start"() <{level = 10 : i32, message = "bqd,bkd->bqk"}> : () -> ()
    %cst_65 = arith.constant dense<0.000000e+00> : vector<2x8x16xf32>
    %216 = tpu.matmul %211, %213, %cst_65 {dimension_numbers = #tpu.dot_dimension_numbers<[2], [2], [1], [1], [0, 0, 0, 1, 1, 1], [0], [0]>} : vector<2x8x32xbf16>, vector<2x16x32xbf16>, vector<2x8x16xf32> -> vector<2x8x16xf32>
    "tpu.trace_stop"() : () -> ()
    %cst_66 = arith.constant dense<0xFF800000> : vector<2x8xf32>
    %217 = vector.multi_reduction <maximumf>, %216, %cst_66 [2] : vector<2x8x16xf32> to vector<2x8xf32>
    %218 = vector.shape_cast %217 : vector<2x8xf32> to vector<2x8x1xf32>
    %219 = vector.broadcast %218 : vector<2x8x1xf32> to vector<2x8x16xf32>
    %220 = arith.subf %216, %219 : vector<2x8x16xf32>
    %221 = math.exp %220 : vector<2x8x16xf32>
    %cst_67 = arith.constant dense<0.000000e+00> : vector<2x8xf32>
    %222 = vector.multi_reduction <add>, %221, %cst_67 [2] : vector<2x8x16xf32> to vector<2x8xf32>
    %223 = vector.shape_cast %222 : vector<2x8xf32> to vector<2x8x1xf32>
    %224 = tpu.reciprocal %223 {approx = true} : vector<2x8x1xf32> -> vector<2x8x1xf32>
    %225 = vector.broadcast %224 : vector<2x8x1xf32> to vector<2x8x16xf32>
    %226 = arith.mulf %221, %225 : vector<2x8x16xf32>
    %227 = arith.truncf %226 : vector<2x8x16xf32> to vector<2x8x16xbf16>
    "tpu.trace_start"() <{level = 10 : i32, message = "bqk,bkd->bqd"}> : () -> ()
    %cst_68 = arith.constant dense<0.000000e+00> : vector<2x8x32xf32>
    %228 = tpu.matmul %227, %215, %cst_68 {dimension_numbers = #tpu.dot_dimension_numbers<[2], [1], [1], [2], [0, 0, 0, 1, 1, 2], [0], [0]>} : vector<2x8x16xbf16>, vector<2x16x32xbf16>, vector<2x8x32xf32> -> vector<2x8x32xf32>
    "tpu.trace_stop"() : () -> ()
    %229 = arith.addf %207, %226 : vector<2x8x16xf32>
    %230 = vector.extract_strided_slice %162 {offsets = [0, 0, 96], sizes = [2, 8, 32], strides = [1, 1, 1]} : vector<2x8x128xf32> to vector<2x8x32xf32>
    %cst_69 = arith.constant 0.176776692 : f32
    %231 = vector.broadcast %cst_69 : f32 to vector<2x8x32xf32>
    %232 = arith.mulf %230, %231 : vector<2x8x32xf32>
    %233 = arith.truncf %232 : vector<2x8x32xf32> to vector<2x8x32xbf16>
    %234 = vector.extract_strided_slice %163 {offsets = [0, 0, 96], sizes = [2, 16, 32], strides = [1, 1, 1]} : vector<2x16x128xf32> to vector<2x16x32xf32>
    %235 = arith.truncf %234 : vector<2x16x32xf32> to vector<2x16x32xbf16>
    %236 = vector.extract_strided_slice %164 {offsets = [0, 0, 96], sizes = [2, 16, 32], strides = [1, 1, 1]} : vector<2x16x128xf32> to vector<2x16x32xf32>
    %237 = arith.truncf %236 : vector<2x16x32xf32> to vector<2x16x32xbf16>
    "tpu.trace_start"() <{level = 10 : i32, message = "bqd,bkd->bqk"}> : () -> ()
    %cst_70 = arith.constant dense<0.000000e+00> : vector<2x8x16xf32>
    %238 = tpu.matmul %233, %235, %cst_70 {dimension_numbers = #tpu.dot_dimension_numbers<[2], [2], [1], [1], [0, 0, 0, 1, 1, 1], [0], [0]>} : vector<2x8x32xbf16>, vector<2x16x32xbf16>, vector<2x8x16xf32> -> vector<2x8x16xf32>
    "tpu.trace_stop"() : () -> ()
    %cst_71 = arith.constant dense<0xFF800000> : vector<2x8xf32>
    %239 = vector.multi_reduction <maximumf>, %238, %cst_71 [2] : vector<2x8x16xf32> to vector<2x8xf32>
    %240 = vector.shape_cast %239 : vector<2x8xf32> to vector<2x8x1xf32>
    %241 = vector.broadcast %240 : vector<2x8x1xf32> to vector<2x8x16xf32>
    %242 = arith.subf %238, %241 : vector<2x8x16xf32>
    %243 = math.exp %242 : vector<2x8x16xf32>
    %cst_72 = arith.constant dense<0.000000e+00> : vector<2x8xf32>
    %244 = vector.multi_reduction <add>, %243, %cst_72 [2] : vector<2x8x16xf32> to vector<2x8xf32>
    %245 = vector.shape_cast %244 : vector<2x8xf32> to vector<2x8x1xf32>
    %246 = tpu.reciprocal %245 {approx = true} : vector<2x8x1xf32> -> vector<2x8x1xf32>
    %247 = vector.broadcast %246 : vector<2x8x1xf32> to vector<2x8x16xf32>
    %248 = arith.mulf %243, %247 : vector<2x8x16xf32>
    %249 = arith.truncf %248 : vector<2x8x16xf32> to vector<2x8x16xbf16>
    "tpu.trace_start"() <{level = 10 : i32, message = "bqk,bkd->bqd"}> : () -> ()
    %cst_73 = arith.constant dense<0.000000e+00> : vector<2x8x32xf32>
    %250 = tpu.matmul %249, %237, %cst_73 {dimension_numbers = #tpu.dot_dimension_numbers<[2], [1], [1], [2], [0, 0, 0, 1, 1, 2], [0], [0]>} : vector<2x8x16xbf16>, vector<2x16x32xbf16>, vector<2x8x32xf32> -> vector<2x8x32xf32>
    "tpu.trace_stop"() : () -> ()
    %251 = arith.addf %229, %248 : vector<2x8x16xf32>
    %252 = tpu.concatenate %185, %206, %228, %250 in 2 : vector<2x8x32xf32>, vector<2x8x32xf32>, vector<2x8x32xf32>, vector<2x8x32xf32> -> vector<2x8x128xf32>
    %253 = vector.shape_cast %252 : vector<2x8x128xf32> to vector<16x128xf32>
    %cst_74 = arith.constant 2.500000e-01 : f32
    %254 = vector.broadcast %cst_74 : f32 to vector<2x8x16xf32>
    %255 = arith.mulf %251, %254 : vector<2x8x16xf32>
    %256 = arith.truncf %253 : vector<16x128xf32> to vector<16x128xbf16>
    %c0_75 = arith.constant 0 : index
    %c0_76 = arith.constant 0 : index
    %257 = vector.load %arg10[%c0_75, %c0_76] : memref<128x128xbf16, #tpu.memory_space<vmem>>, vector<128x128xbf16>
    %cst_77 = arith.constant dense<0.000000e+00> : vector<16x128xf32>
    %258 = tpu.matmul %256, %257, %cst_77 {dimension_numbers = #tpu.dot_dimension_numbers<[1], [0], [0], [1], [0, 0, 1, 1], [], []>} : vector<16x128xbf16>, vector<128x128xbf16>, vector<16x128xf32> -> vector<16x128xf32>
    %c0_78 = arith.constant 0 : index
    %c0_79 = arith.constant 0 : index
    %259 = vector.load %arg11[%c0_78, %c0_79] : memref<1x128xf32, #tpu.memory_space<vmem>>, vector<1x128xf32>
    %260 = vector.broadcast %259 : vector<1x128xf32> to vector<16x128xf32>
    %261 = arith.addf %258, %260 : vector<16x128xf32>
    %262 = arith.addf %147, %261 : vector<16x128xf32>
    %263 = vector.extract_strided_slice %5 {offsets = [1, 0], sizes = [1, 128], strides = [1, 1]} : vector<3x128xf32> to vector<1x128xf32>
    %264 = vector.extract_strided_slice %6 {offsets = [1, 0], sizes = [1, 128], strides = [1, 1]} : vector<3x128xf32> to vector<1x128xf32>
    %cst_80 = arith.constant dense<0.000000e+00> : vector<16xf32>
    %265 = vector.multi_reduction <add>, %262, %cst_80 [1] : vector<16x128xf32> to vector<16xf32>
    %266 = vector.shape_cast %265 : vector<16xf32> to vector<16x1xf32>
    %cst_81 = arith.constant 1.280000e+02 : f32
    %267 = vector.broadcast %cst_81 : f32 to vector<16x1xf32>
    %268 = arith.divf %266, %267 : vector<16x1xf32>
    %269 = vector.broadcast %268 : vector<16x1xf32> to vector<16x128xf32>
    %270 = arith.subf %262, %269 : vector<16x128xf32>
    %271 = arith.mulf %270, %270 : vector<16x128xf32>
    %cst_82 = arith.constant dense<0.000000e+00> : vector<16xf32>
    %272 = vector.multi_reduction <add>, %271, %cst_82 [1] : vector<16x128xf32> to vector<16xf32>
    %273 = vector.shape_cast %272 : vector<16xf32> to vector<16x1xf32>
    %cst_83 = arith.constant 1.280000e+02 : f32
    %274 = vector.broadcast %cst_83 : f32 to vector<16x1xf32>
    %275 = arith.divf %273, %274 : vector<16x1xf32>
    %276 = vector.broadcast %268 : vector<16x1xf32> to vector<16x128xf32>
    %277 = arith.subf %262, %276 : vector<16x128xf32>
    %cst_84 = arith.constant 9.99999974E-6 : f32
    %278 = vector.broadcast %cst_84 : f32 to vector<16x1xf32>
    %279 = arith.addf %275, %278 : vector<16x1xf32>
    %280 = math.rsqrt %279 : vector<16x1xf32>
    %281 = vector.broadcast %280 : vector<16x1xf32> to vector<16x128xf32>
    %282 = arith.mulf %277, %281 : vector<16x128xf32>
    %283 = vector.broadcast %263 : vector<1x128xf32> to vector<16x128xf32>
    %284 = arith.mulf %282, %283 : vector<16x128xf32>
    %285 = vector.broadcast %264 : vector<1x128xf32> to vector<16x128xf32>
    %286 = arith.addf %284, %285 : vector<16x128xf32>
    %287 = arith.truncf %286 : vector<16x128xf32> to vector<16x128xbf16>
    %c0_85 = arith.constant 0 : index
    %c0_86 = arith.constant 0 : index
    %288 = vector.load %arg14[%c0_85, %c0_86] : memref<128x256xbf16, #tpu.memory_space<vmem>>, vector<128x256xbf16>
    %cst_87 = arith.constant dense<0.000000e+00> : vector<16x256xf32>
    %289 = tpu.matmul %287, %288, %cst_87 {dimension_numbers = #tpu.dot_dimension_numbers<[1], [0], [0], [1], [0, 0, 1, 1], [], []>} : vector<16x128xbf16>, vector<128x256xbf16>, vector<16x256xf32> -> vector<16x256xf32>
    %c0_88 = arith.constant 0 : index
    %c0_89 = arith.constant 0 : index
    %290 = vector.load %arg15[%c0_88, %c0_89] : memref<1x256xf32, #tpu.memory_space<vmem>>, vector<1x256xf32>
    %291 = vector.broadcast %290 : vector<1x256xf32> to vector<16x256xf32>
    %292 = arith.addf %289, %291 : vector<16x256xf32>
    %cst_90 = arith.constant 0.000000e+00 : f32
    %293 = vector.broadcast %cst_90 : f32 to vector<16x256xf32>
    %294 = arith.maximumf %292, %293 : vector<16x256xf32>
    %295 = arith.truncf %294 : vector<16x256xf32> to vector<16x256xbf16>
    %c0_91 = arith.constant 0 : index
    %c0_92 = arith.constant 0 : index
    %296 = vector.load %arg16[%c0_91, %c0_92] : memref<256x128xbf16, #tpu.memory_space<vmem>>, vector<256x128xbf16>
    %cst_93 = arith.constant dense<0.000000e+00> : vector<16x128xf32>
    %297 = tpu.matmul %295, %296, %cst_93 {dimension_numbers = #tpu.dot_dimension_numbers<[1], [0], [0], [1], [0, 0, 1, 1], [], []>} : vector<16x256xbf16>, vector<256x128xbf16>, vector<16x128xf32> -> vector<16x128xf32>
    %c0_94 = arith.constant 0 : index
    %c0_95 = arith.constant 0 : index
    %298 = vector.load %arg17[%c0_94, %c0_95] : memref<1x128xf32, #tpu.memory_space<vmem>>, vector<1x128xf32>
    %299 = vector.broadcast %298 : vector<1x128xf32> to vector<16x128xf32>
    %300 = arith.addf %297, %299 : vector<16x128xf32>
    %301 = arith.addf %286, %300 : vector<16x128xf32>
    %302 = vector.extract_strided_slice %5 {offsets = [2, 0], sizes = [1, 128], strides = [1, 1]} : vector<3x128xf32> to vector<1x128xf32>
    %303 = vector.extract_strided_slice %6 {offsets = [2, 0], sizes = [1, 128], strides = [1, 1]} : vector<3x128xf32> to vector<1x128xf32>
    %cst_96 = arith.constant dense<0.000000e+00> : vector<16xf32>
    %304 = vector.multi_reduction <add>, %301, %cst_96 [1] : vector<16x128xf32> to vector<16xf32>
    %305 = vector.shape_cast %304 : vector<16xf32> to vector<16x1xf32>
    %cst_97 = arith.constant 1.280000e+02 : f32
    %306 = vector.broadcast %cst_97 : f32 to vector<16x1xf32>
    %307 = arith.divf %305, %306 : vector<16x1xf32>
    %308 = vector.broadcast %307 : vector<16x1xf32> to vector<16x128xf32>
    %309 = arith.subf %301, %308 : vector<16x128xf32>
    %310 = arith.mulf %309, %309 : vector<16x128xf32>
    %cst_98 = arith.constant dense<0.000000e+00> : vector<16xf32>
    %311 = vector.multi_reduction <add>, %310, %cst_98 [1] : vector<16x128xf32> to vector<16xf32>
    %312 = vector.shape_cast %311 : vector<16xf32> to vector<16x1xf32>
    %cst_99 = arith.constant 1.280000e+02 : f32
    %313 = vector.broadcast %cst_99 : f32 to vector<16x1xf32>
    %314 = arith.divf %312, %313 : vector<16x1xf32>
    %315 = vector.broadcast %307 : vector<16x1xf32> to vector<16x128xf32>
    %316 = arith.subf %301, %315 : vector<16x128xf32>
    %cst_100 = arith.constant 9.99999974E-6 : f32
    %317 = vector.broadcast %cst_100 : f32 to vector<16x1xf32>
    %318 = arith.addf %314, %317 : vector<16x1xf32>
    %319 = math.rsqrt %318 : vector<16x1xf32>
    %320 = vector.broadcast %319 : vector<16x1xf32> to vector<16x128xf32>
    %321 = arith.mulf %316, %320 : vector<16x128xf32>
    %322 = vector.broadcast %302 : vector<1x128xf32> to vector<16x128xf32>
    %323 = arith.mulf %321, %322 : vector<16x128xf32>
    %324 = vector.broadcast %303 : vector<1x128xf32> to vector<16x128xf32>
    %325 = arith.addf %323, %324 : vector<16x128xf32>
    %326 = vector.shape_cast %325 : vector<16x128xf32> to vector<2x8x128xf32>
    %c0_101 = arith.constant 0 : index
    %c0_102 = arith.constant 0 : index
    %c0_103 = arith.constant 0 : index
    %327 = vector.load %arg18[%c0_101, %c0_102, %c0_103] : memref<2x8x128xf32, #tpu.memory_space<vmem>>, vector<2x8x128xf32>
    tpu.vector_store %arg18[%c0_101, %c0_102, %c0_103], %326 {strides = array<i32>} : memref<2x8x128xf32, #tpu.memory_space<vmem>>, vector<2x8x128xf32>,
    %c0_104 = arith.constant 0 : index
    %c0_105 = arith.constant 0 : index
    %c0_106 = arith.constant 0 : index
    %328 = vector.load %arg19[%c0_104, %c0_105, %c0_106] : memref<2x8x16xf32, #tpu.memory_space<vmem>>, vector<2x8x16xf32>
    tpu.vector_store %arg19[%c0_104, %c0_105, %c0_106], %255 {strides = array<i32>} : memref<2x8x16xf32, #tpu.memory_space<vmem>>, vector<2x8x16xf32>,
    return
  }
  func.func @transform_0(%arg0: i32) -> (i32, i32, i32) {
    %c0_i32 = arith.constant 0 : i32
    %c0_i32_0 = arith.constant 0 : i32
    %c0_i32_1 = arith.constant 0 : i32
    return %arg0, %c0_i32, %c0_i32_0 : i32, i32, i32
  }
  func.func @transform_1(%arg0: i32) -> (i32, i32, i32) {
    %c0_i32 = arith.constant 0 : i32
    %c0_i32_0 = arith.constant 0 : i32
    %c0_i32_1 = arith.constant 0 : i32
    return %arg0, %c0_i32, %c0_i32_0 : i32, i32, i32
  }
  func.func @transform_2(%arg0: i32) -> (i32, i32) {
    %c0_i32 = arith.constant 0 : i32
    %c0_i32_0 = arith.constant 0 : i32
    %c0_i32_1 = arith.constant 0 : i32
    return %c0_i32, %c0_i32_0 : i32, i32
  }
  func.func @transform_3(%arg0: i32) -> (i32, i32) {
    %c0_i32 = arith.constant 0 : i32
    %c0_i32_0 = arith.constant 0 : i32
    %c0_i32_1 = arith.constant 0 : i32
    return %c0_i32, %c0_i32_0 : i32, i32
  }
  func.func @transform_4(%arg0: i32) -> (i32, i32) {
    %c0_i32 = arith.constant 0 : i32
    %c0_i32_0 = arith.constant 0 : i32
    %c0_i32_1 = arith.constant 0 : i32
    return %c0_i32, %c0_i32_0 : i32, i32
  }
  func.func @transform_5(%arg0: i32) -> (i32, i32) {
    %c0_i32 = arith.constant 0 : i32
    %c0_i32_0 = arith.constant 0 : i32
    %c0_i32_1 = arith.constant 0 : i32
    return %c0_i32, %c0_i32_0 : i32, i32
  }
  func.func @transform_6(%arg0: i32) -> (i32, i32) {
    %c0_i32 = arith.constant 0 : i32
    %c0_i32_0 = arith.constant 0 : i32
    %c0_i32_1 = arith.constant 0 : i32
    return %c0_i32, %c0_i32_0 : i32, i32
  }
  func.func @transform_7(%arg0: i32) -> (i32, i32) {
    %c0_i32 = arith.constant 0 : i32
    %c0_i32_0 = arith.constant 0 : i32
    %c0_i32_1 = arith.constant 0 : i32
    return %c0_i32, %c0_i32_0 : i32, i32
  }
  func.func @transform_8(%arg0: i32) -> (i32, i32) {
    %c0_i32 = arith.constant 0 : i32
    %c0_i32_0 = arith.constant 0 : i32
    %c0_i32_1 = arith.constant 0 : i32
    return %c0_i32, %c0_i32_0 : i32, i32
  }
  func.func @transform_9(%arg0: i32) -> (i32, i32) {
    %c0_i32 = arith.constant 0 : i32
    %c0_i32_0 = arith.constant 0 : i32
    %c0_i32_1 = arith.constant 0 : i32
    return %c0_i32, %c0_i32_0 : i32, i32
  }
  func.func @transform_10(%arg0: i32) -> (i32, i32) {
    %c0_i32 = arith.constant 0 : i32
    %c0_i32_0 = arith.constant 0 : i32
    %c0_i32_1 = arith.constant 0 : i32
    return %c0_i32, %c0_i32_0 : i32, i32
  }
  func.func @transform_11(%arg0: i32) -> (i32, i32) {
    %c0_i32 = arith.constant 0 : i32
    %c0_i32_0 = arith.constant 0 : i32
    %c0_i32_1 = arith.constant 0 : i32
    return %c0_i32, %c0_i32_0 : i32, i32
  }
  func.func @transform_12(%arg0: i32) -> (i32, i32) {
    %c0_i32 = arith.constant 0 : i32
    %c0_i32_0 = arith.constant 0 : i32
    %c0_i32_1 = arith.constant 0 : i32
    return %c0_i32, %c0_i32_0 : i32, i32
  }
  func.func @transform_13(%arg0: i32) -> (i32, i32) {
    %c0_i32 = arith.constant 0 : i32
    %c0_i32_0 = arith.constant 0 : i32
    %c0_i32_1 = arith.constant 0 : i32
    return %c0_i32, %c0_i32_0 : i32, i32
  }
  func.func @transform_14(%arg0: i32) -> (i32, i32) {
    %c0_i32 = arith.constant 0 : i32
    %c0_i32_0 = arith.constant 0 : i32
    %c0_i32_1 = arith.constant 0 : i32
    return %c0_i32, %c0_i32_0 : i32, i32
  }
  func.func @transform_15(%arg0: i32) -> (i32, i32) {
    %c0_i32 = arith.constant 0 : i32
    %c0_i32_0 = arith.constant 0 : i32
    %c0_i32_1 = arith.constant 0 : i32
    return %c0_i32, %c0_i32_0 : i32, i32
  }
  func.func @transform_16(%arg0: i32) -> (i32, i32) {
    %c0_i32 = arith.constant 0 : i32
    %c0_i32_0 = arith.constant 0 : i32
    %c0_i32_1 = arith.constant 0 : i32
    return %c0_i32, %c0_i32_0 : i32, i32
  }
  func.func @transform_17(%arg0: i32) -> (i32, i32, i32) {
    %c0_i32 = arith.constant 0 : i32
    %c0_i32_0 = arith.constant 0 : i32
    %c0_i32_1 = arith.constant 0 : i32
    return %arg0, %c0_i32, %c0_i32_0 : i32, i32, i32
  }
  func.func @transform_18(%arg0: i32) -> (i32, i32, i32) {
    %c0_i32 = arith.constant 0 : i32
    %c0_i32_0 = arith.constant 0 : i32
    %c0_i32_1 = arith.constant 0 : i32
    return %arg0, %c0_i32, %c0_i32_0 : i32, i32, i32
  }
}

</mosaic_0001>

<bundles_post_ra>
// kernel: tpu_custom_call.1
= control target key start
LH: loop header
LB: loop body
LE: loop exit
PB: predicated region body
PF: predicated region fallthrough
CT: control target
= control target key end

     0   :  { %s6410_s0 = inlined_call_operand.hbm [shape: f32[4,8,128], index: 0, kind: input, shape index: {}]   ;;  %s6411_s1 = inlined_call_operand.hbm [shape: f32[4,16,128], index: 1, kind: input, shape index: {}]   ;;  %s6412_s2 = inlined_call_operand.hbm [shape: f32[8,8], index: 2, kind: input, shape index: {}]   ;;  %s6413_s3 = inlined_call_operand.hbm [shape: bf16[128,384], index: 3, kind: input, shape index: {}]   ;;  %s6414_s4 = inlined_call_operand.hbm [shape: f32[1,384], index: 4, kind: input, shape index: {}]   ;;  %s6415_s5 = inlined_call_operand.hbm [shape: bf16[128,128], index: 5, kind: input, shape index: {}]   ;;  %s6416_s6 = inlined_call_operand.vmem [shape: f32[1,128], index: 6, kind: input, shape index: {}]   ;;  %s6417_s7 = inlined_call_operand.hbm [shape: bf16[128,384], index: 7, kind: input, shape index: {}]   ;;  %s6418_s8 = inlined_call_operand.vmem [shape: f32[1,384], index: 8, kind: input, shape index: {}]   ;;  %s6419_s9 = inlined_call_operand.hbm [shape: bf16[128,128], index: 9, kind: input, shape index: {}]   ;;  %s6420_s10 = inlined_call_operand.vmem [shape: f32[1,128], index: 10, kind: input, shape index: {}]   ;;  %s6421_s11 = inlined_call_operand.vmem [shape: f32[3,128], index: 11, kind: input, shape index: {}]   ;;  %s6422_s12 = inlined_call_operand.vmem [shape: f32[3,128], index: 12, kind: input, shape index: {}]   ;;  %s6423_s13 = inlined_call_operand.hbm [shape: bf16[128,256], index: 13, kind: input, shape index: {}]   ;;  %s6424_s14 = inlined_call_operand.vmem [shape: f32[1,256], index: 14, kind: input, shape index: {}]   ;;  %s6425_s15 = inlined_call_operand.hbm [shape: bf16[256,128], index: 15, kind: input, shape index: {}]   ;;  %s6426_s16 = inlined_call_operand.vmem [shape: f32[1,128], index: 16, kind: input, shape index: {}]   ;;  %s6427_s17 = inlined_call_operand.hbm [shape: f32[4,8,128], index: 17, kind: output, shape index: {0}]   ;;  %s6428_s18 = inlined_call_operand.hbm [shape: f32[4,8,16], index: 18, kind: output, shape index: {1}]  }
   0x1   :  { %6450 = sst [smem:[#allocation36_spill]] %s6410_s0 }
   0x2   :  { %6451 = sst [smem:[#allocation37_spill]] %s6411_s1 }
   0x3   :  { %6452 = sst [smem:[#allocation38_spill]] %s6412_s2 }
   0x4   :  { %6453 = sst [smem:[#allocation39_spill]] %s6413_s3 }
   0x5   :  { %6454 = sst [smem:[#allocation40_spill]] %s6414_s4 }
   0x6   :  { %6455 = sst [smem:[#allocation41_spill]] %s6415_s5 }
   0x7   :  { %6456 = sst [smem:[#allocation42_spill]] %s6417_s7 }
   0x8   :  { %6457 = sst [smem:[#allocation43_spill]] %s6419_s9 }
   0x9   :  { %6458 = sst [smem:[#allocation44_spill]] %s6423_s13 }
   0xa   :  { %6459 = sst [smem:[#allocation45_spill]] %s6425_s15 }
   0xb   :  { %6460 = sst [smem:[#allocation46_spill]] %s6427_s17 }
   0xc   :  { %6461 = sst [smem:[#allocation47_spill]] %s6428_s18 }
   0xd   :  { %24 = vsyncpa [#allocation3], 0 }
   0xe   :  { %26 = vsyncpa [#allocation3 + $0x1], 0 }
   0xf   :  { %27 = vsyncpa [#allocation6], 0 }
  0x10   :  { %29 = vsyncpa [#allocation6 + $0x1], 0 }
  0x11   :  { %30 = vsyncpa [#allocation9], 0 }
  0x12   :  { %31 = vsyncpa [#allocation12], 0 }
  0x13   :  { %32 = vsyncpa [#allocation15], 0 }
  0x14   :  { %33 = vsyncpa [#allocation18], 0 }
  0x15   :  { %34 = vsyncpa [#allocation4], 0 }
  0x16   :  { %36 = vsyncpa [#allocation4 + $0x1], 0 }
  0x17   :  { %37 = vsyncpa [#allocation21], 0 }
  0x18   :  { %39 = vsyncpa [#allocation21 + $0x1], 0  ;;  %s5498_s27 = smov 0   ;;  %s5500_s28 = smov 0  }
  0x19   :  { %s5502_s29 = smov 0   ;;  %s5504_s30 = smov 0  }
  0x1a LB: > { %6462 = sst [smem:[#allocation31_spill]] %s5363_s27  ;;  %s5377_s0 = smov [#allocation7]   ;;  %s5375_s30 = sphi %s5504_s30, %s6511_s30   ;;  %s5371_s29 = sphi %s5502_s29, %s6513_s29   ;;  %s5367_s28 = sphi %s5500_s28, %s6515_s28   ;;  %s5363_s27 = sphi %s5498_s27, %s6514_s27  }
  0x1b   : > { %6463 = sst [smem:[#allocation32_spill]] %s5371_s29  ;;  %s482_s19 = sshll.u32 %s5377_s0, 4  ;;  %s483_s19 = int_to_ptr.vmem [resolvable:$true] %s482_s19 }
  0x1c   : > { %s5519_s1 = sadd.s32 4294967295, %s5375_s30   ;;  %p4043_p0 = scmp.ge.s32.totalorder %s5375_s30, 1 }
  0x1d   : > { %p6441_p1 = scmp.eq.s32.totalorder %s5519_s1, 0  ;;  %p469_p2 = scmp.lt.s32.totalorder %s5375_s30, 3 }
  0x1e   : > { %s5378_s21 = smov [#allocation8]   ;;  %s5379_s23 = smov [#allocation11]  }
  0x1f   : > { %p5524_p3 = pnand %p4043_p0, %p469_p2  ;;  %s492_s22 = sshll.u32 %s5378_s21, 4  ;;  %s5531_s22 = int_to_ptr.vmem [resolvable:$true] %s492_s22 }
  0x20   : > { %s516_s24 = sshll.u32 %s5379_s23, 4  ;;  %s5004_s26 = scalar_lea.vmem %s483_s19, 128  ;;  %s5539_s24 = int_to_ptr.vmem [resolvable:$true] %s516_s24 }
  0x21   : > { %p4652_p5 = pneg %p5524_p3  ;;  %p5005_p8 = scmp.ne.s32.totalorder %s483_s19, %s5004_s26 }
  0x22   : > { %p5012_p11 = scmp.lt.s32.totalorder %s483_s19, %s483_s19  ;;  %p5013_p12 = scmp.lt.s32.totalorder %s5004_s26, %s5004_s26 }
  0x23   : > { %p5535_p6 = pnand %p4652_p5, %p6441_p1 }
  0x24   : > { %p5014_p13 = por %p5013_p12, %p5012_p11 }
  0x25   : > { %p5543_p7 = pneg %p5535_p6 }
  0x27   : > { %p5007_p9 = pnand %p5005_p8, %p5543_p7 }
  0x29   : > { %p5008_p10 = pneg %p5007_p9 }
  0x2b   : > { %p5015_p0 = pnand %p5014_p13, %p5008_p10 }
  0x2d   : > { %5018 = shalt.err (!%p5015_p0)
}
  0x2e   : > { %s6467_s23 = sld [smem:[#allocation38_spill]]  ;;  %s5030_s17 = scalar_lea.vmem %s5531_s22, 3072 }
  0x2f   : > { %p5031_p2 = scmp.ne.s32.totalorder %s5531_s22, %s5030_s17  ;;  %p5038_p9 = scmp.lt.s32.totalorder %s5531_s22, %s5531_s22 }
  0x30   : > { %p5039_p11 = scmp.lt.s32.totalorder %s5030_s17, %s5030_s17 }
  0x31   : > { %p5033_p5 = pnand %p5031_p2, %p5543_p7 }
  0x32   : > { %p5040_p10 = por %p5039_p11, %p5038_p9 }
  0x33   : > { %p5034_p8 = pneg %p5033_p5 }
  0x34   : > { %4655 = dma.hbm_to_vmem [thread:$0]  (!%p5535_p6), %s6467_s23, 128, %s483_s19, [#allocation6]  }
  0x35   : > { %p5041_p12 = pnand %p5040_p10, %p5034_p8 }
  0x37   : > { %5044 = shalt.err (!%p5041_p12)
}
  0x38   : > { %s6433_s26 = smov 192   ;;  %s6434_s0 = smov 12  }
  0x39   : > { %s6468_s3 = sld [smem:[#allocation39_spill]]  ;;  %s5056_s17 = scalar_lea.vmem %s5539_s24, 1024 }
  0x3a   : > { %p5057_p13 = scmp.ne.s32.totalorder %s5539_s24, %s5056_s17  ;;  %p5064_p5 = scmp.lt.s32.totalorder %s5539_s24, %s5539_s24 }
  0x3b   : > { %p5065_p8 = scmp.lt.s32.totalorder %s5056_s17, %s5056_s17 }
  0x3c   : > { %p5059_p0 = pnand %p5057_p13, %p5543_p7 }
  0x3d   : > { %p5066_p9 = por %p5065_p8, %p5064_p5 }
  0x3e   : > { %p5060_p2 = pneg %p5059_p0 }
  0x3f   : > { %4658 = dma.hbm_to_vmem [thread:$0]  (!%p5535_p6), %s6468_s3, 3072, %s5531_s22, [#allocation9], %s6433_s26, %s6433_s26, %s6434_s0  }
  0x40   : > { %p5067_p11 = pnand %p5066_p9, %p5060_p2 }
  0x42   : > { %5070 = shalt.err (!%p5067_p11)
}
  0x43   : > { %s6435_s23 = smov 64   ;;  %s6436_s18 = smov 4  }
  0x44   : > { %s6469_s5 = sld [smem:[#allocation41_spill]]  ;;  %s5384_s21 = smov [#allocation14]  }
  0x45   : > { %s548_s26 = sshll.u32 %s5384_s21, 4  ;;  %s5385_s17 = smov [#allocation10]   ;;  %s549_s26 = int_to_ptr.vmem [resolvable:$true] %s548_s26 }
  0x46   : > { %s506_s0 = sshll.u32 %s5385_s17, 4  ;;  %s5082_s3 = scalar_lea.vmem %s549_s26, 1024  ;;  %s507_s0 = int_to_ptr.vmem [resolvable:$true] %s506_s0 }
  0x47   : > { %p5083_p10 = scmp.ne.s32.totalorder %s549_s26, %s5082_s3  ;;  %p5090_p0 = scmp.lt.s32.totalorder %s549_s26, %s549_s26 }
  0x48   : > { %p5091_p2 = scmp.lt.s32.totalorder %s5082_s3, %s5082_s3 }
  0x49   : > { %p5085_p12 = pnand %p5083_p10, %p5543_p7 }
  0x4a   : > { %4664 = dma.hbm_to_vmem [thread:$0]  (!%p5535_p6), %s6469_s5, 1024, %s5539_s24, [#allocation12], %s6435_s23, %s6435_s23, %s6436_s18  }
  0x4b   : > { %p5086_p13 = pneg %p5085_p12  ;;  %p5092_p5 = por %p5091_p2, %p5090_p0 }
  0x4d   : > { %p5093_p8 = pnand %p5092_p5, %p5086_p13 }
  0x4f   : > { %5096 = shalt.err (!%p5093_p8)
}
  0x50   : > { %s6470_s9 = sld [smem:[#allocation43_spill]]  ;;  %s5108_s19 = scalar_lea.vmem %s507_s0, 48 }
  0x51   : > { %p5109_p9 = scmp.ne.s32.totalorder %s507_s0, %s5108_s19  ;;  %s5115_s3 = scalar_lea.vmem %s507_s0, 64 }
  0x52   : > { %p5116_p12 = scmp.lt.s32.totalorder %s507_s0, %s507_s0  ;;  %p5117_p13 = scmp.lt.s32.totalorder %s5115_s3, %s5108_s19 }
  0x53   : > { %p5111_p11 = pnand %p5109_p9, %p5543_p7 }
  0x54   : > { %p5118_p0 = por %p5117_p13, %p5116_p12 }
  0x55   : > { %p5112_p10 = pneg %p5111_p11 }
  0x56   : > { %4670 = dma.hbm_to_vmem [thread:$0]  (!%p5535_p6), %s6470_s9, 1024, %s549_s26, [#allocation15], %s6435_s23, %s6435_s23, %s6436_s18  }
  0x57   : > { %p5119_p2 = pnand %p5118_p0, %p5112_p10 }
  0x59   : > { %5122 = shalt.err (!%p5119_p2)
}
  0x5a   : > { %s6471_s4 = sld [smem:[#allocation40_spill]]  ;;  %s5386_s26 = smov [#allocation13]  }
  0x5b   : > { %s532_s24 = sshll.u32 %s5386_s26, 4  ;;  %s5387_s22 = smov [#allocation16]   ;;  %s533_s24 = int_to_ptr.vmem [resolvable:$true] %s532_s24 }
  0x5c   : > { %s570_s23 = sshll.u32 %s5387_s22, 4  ;;  %s5134_s18 = scalar_lea.vmem %s533_s24, 3072  ;;  %s571_s23 = int_to_ptr.vmem [resolvable:$true] %s570_s23 }
  0x5d   : > { %p5135_p5 = scmp.ne.s32.totalorder %s533_s24, %s5134_s18  ;;  %p5142_p11 = scmp.lt.s32.totalorder %s533_s24, %s533_s24 }
  0x5e   : > { %p5143_p10 = scmp.lt.s32.totalorder %s5134_s18, %s5134_s18 }
  0x5f   : > { %p5137_p8 = pnand %p5135_p5, %p5543_p7 }
  0x60   : > { %4661 = dma.hbm_to_vmem [thread:$0]  (!%p5535_p6), %s6471_s4, 48, %s507_s0, [#allocation9]  }
  0x61   : > { %p5138_p9 = pneg %p5137_p8  ;;  %p5144_p12 = por %p5143_p10, %p5142_p11 }
  0x63   : > { %p5145_p13 = pnand %p5144_p12, %p5138_p9 }
  0x65   : > { %5148 = shalt.err (!%p5145_p13)
}
  0x66   : > { %s6472_s19 = smov 12   ;;  %s6473_s3 = smov 192  }
  0x67   : > { %s6474_s7 = sld [smem:[#allocation42_spill]]  ;;  %s5160_s17 = scalar_lea.vmem %s571_s23, 2048 }
  0x68   : > { %p5161_p0 = scmp.ne.s32.totalorder %s571_s23, %s5160_s17  ;;  %p5168_p8 = scmp.lt.s32.totalorder %s571_s23, %s571_s23 }
  0x69   : > { %p5169_p11 = scmp.lt.s32.totalorder %s5160_s17, %s5160_s17 }
  0x6a   : > { %p5163_p2 = pnand %p5161_p0, %p5543_p7 }
  0x6b   : > { %p5170_p9 = por %p5169_p11, %p5168_p8 }
  0x6c   : > { %p5164_p5 = pneg %p5163_p2 }
  0x6d   : > { %4667 = dma.hbm_to_vmem [thread:$0]  (!%p5535_p6), %s6474_s7, 3072, %s533_s24, [#allocation12], %s6473_s3, %s6473_s3, %s6472_s19  }
  0x6e   : > { %p5171_p10 = pnand %p5170_p9, %p5164_p5 }
  0x70   : > { %5174 = shalt.err (!%p5171_p10)
}
  0x71   : > { %s6437_s18 = smov 128   ;;  %s6439_s26 = smov 8  }
  0x72   : > { %s6475_s13 = sld [smem:[#allocation44_spill]]  ;;  %s5390_s19 = smov [#allocation17]  }
  0x73   : > { %s586_s3 = sshll.u32 %s5390_s19, 4  ;;  %s587_s3 = int_to_ptr.vmem [resolvable:$true] %s586_s3 }
  0x74   : > { %s5186_s0 = scalar_lea.vmem %s587_s3, 2048  ;;  %p5194_p2 = scmp.lt.s32.totalorder %s587_s3, %s587_s3 }
  0x75   : > { %p5187_p12 = scmp.ne.s32.totalorder %s587_s3, %s5186_s0  ;;  %p5195_p5 = scmp.lt.s32.totalorder %s5186_s0, %s5186_s0 }
  0x77   : > { %p5189_p13 = pnand %p5187_p12, %p5543_p7  ;;  %p5196_p8 = por %p5195_p5, %p5194_p2 }
  0x78   : > { %4673 = dma.hbm_to_vmem [thread:$0]  (!%p5535_p6), %s6475_s13, 2048, %s571_s23, [#allocation15], %s6437_s18, %s6437_s18, %s6439_s26  }
  0x79   : > { %p5190_p0 = pneg %p5189_p13 }
  0x7b   : > { %p5197_p11 = pnand %p5196_p8, %p5190_p0 }
  0x7d   : > { %5200 = shalt.err (!%p5197_p11)
}
  0x7e   : > { %s6476_s21 = smov 4   ;;  %s6477_s17 = smov 64  }
  0x7f   : > { %s6478_s15 = sld [smem:[#allocation45_spill]]  ;;  %s4042_s2 = sadd.s32 4294967294, %s5375_s30  }
  0x80   : > { %s5633_s25 = sadd.s32 1, %s5375_s30   ;;  %s52_s19 = sadd.s32 1, %s5371_s29 }
  0x81   : > { %6479 = sst [smem:[#allocation33_spill]] %s5633_s25  ;;  %s49_s22 = ssub.s32 %s5375_s30, %s5633_s25 }
  0x82   : > { %p50_p7 = scmp.eq.s32.totalorder %s49_s22, 0  ;;  %p59_p9 = scmp.ne.s32.totalorder %s5371_s29, %s5367_s28 }
  0x83   : > { %p60_p10 = scmp.eq.s32.totalorder %s5375_s30, 0  ;;  %p65_p12 = scmp.ne.s32.totalorder %s5367_s28, %s5363_s27 }
  0x84   : > { %s5644_s0 = scalar_select %p50_p7, %s5371_s29, %s52_s19  }
  0x85   : > { %4676 = dma.hbm_to_vmem [thread:$0]  (!%p5535_p6), %s6478_s15, 2048, %s587_s3, [#allocation18], %s6477_s17, %s6477_s17, %s6476_s21  }
  0x86   : > { %6480 = sst [smem:[#allocation34_spill]] %s5644_s0  ;;  %p5646_p13 = por %p60_p10, %p59_p9 }
  0x87   : > { %p5652_p6 = por %p6441_p1, %p65_p12  ;;  %p430_p0 = scmp.eq.s32.totalorder %s5519_s1, 1 }
  0x88   : > { %p436_p2 = scmp.eq.s32.totalorder %s4042_s2, 1  ;;  %p4699_p5 = scmp.lt.s32.totalorder %s5375_s30, 2 }
  0x89   : > { %s6482_s3 = scalar_select %p5652_p6, 1, 0 }
  0x8a   : > { %s5659_s21 = sand.u32 1, %s5371_s29   ;;  %p5661_p8 = por %p430_p0, %p59_p9 }
  0x8b   : > { %p5665_p11 = por %p436_p2, %p65_p12  ;;  %s4053_s22 = sshll.u32 %s5659_s21, 4 }
  0x8c   : > { %s6483_s17 = scalar_select %p5661_p8, 1, 0 }
  0x8d   : > { %s6484_s23 = scalar_select %p5665_p11, 1, 0 }
  0x8e   : > { %s4213_s19 = sshll.u32 %s5375_s30, 8  ;;  %s6486_s4 = sld [smem:[#allocation36_spill]] }
  0x8f   : > { %6485 = sst [smem:[#allocation35_spill]] %s6484_s23  ;;  %s607_s5 = scalar_lea.vmem [#allocation2], %s4053_s22 }
  0x90   : > { %s614_s7 = sshll.u32 %s607_s5, 4  ;;  %p5680_p7 = pnand %p4699_p5, %p5646_p13  ;;  %s5676_s7 = int_to_ptr.vmem [resolvable:$true] %s614_s7 }
  0x91   : > { %s604_s0 = scalar_lea.sflag [#allocation3], %s5659_s21 }
  0x92   : > { %p5203_p10 = pneg %p5680_p7 }
  0x94   : > { %s5674_s2 = scalar_lea.hbm %s6486_s4, %s4213_s19  ;;  %s5206_s24 = scalar_lea.hbm %s6486_s4, 512 }
  0x95   : > { %s5201_s18 = scalar_lea.hbm %s5674_s2, 256  ;;  %p5207_p13 = scmp.lt.s32.totalorder %s5674_s2, %s6486_s4 }
  0x96   : > { %p5202_p9 = scmp.ne.s32.totalorder %s5674_s2, %s5201_s18  ;;  %p5208_p2 = scmp.lt.s32.totalorder %s5206_s24, %s5201_s18 }
  0x98   : > { %p5204_p12 = pnand %p5203_p10, %p5202_p9  ;;  %p5209_p5 = por %p5208_p2, %p5207_p13 }
  0x9a   : > { %p5205_p0 = pneg %p5204_p12 }
  0x9c   : > { %p5210_p4 = pnand %p5209_p5, %p5205_p0 }
  0x9e   : > { %5213 = shalt.err (!%p5210_p4)
}
  0x9f   : > { %s5214_s13 = scalar_lea.vmem %s5676_s7, 256  ;;  %s5391_s5 = smov [#allocation2]  }
  0xa0   : > { %p5215_p1 = scmp.ne.s32.totalorder %s5676_s7, %s5214_s13  ;;  %s5219_s26 = sshll.u32 %s5391_s5, 4  ;;  %s5220_s26 = int_to_ptr.vmem [resolvable:$false] %s5219_s26 }
  0xa1   : > { %s5221_s15 = scalar_lea.vmem %s5220_s26, 512  ;;  %p5222_p11 = scmp.lt.s32.totalorder %s5676_s7, %s5220_s26 }
  0xa2   : > { %p5217_p9 = pnand %p5215_p1, %p5203_p10  ;;  %p5223_p8 = scmp.lt.s32.totalorder %s5221_s15, %s5214_s13 }
  0xa4   : > { %p5218_p12 = pneg %p5217_p9  ;;  %p5224_p6 = por %p5223_p8, %p5222_p11 }
  0xa6   : > { %p5225_p13 = pnand %p5224_p6, %p5218_p12 }
  0xa8   : > { %5228 = shalt.err (!%p5225_p13)
}
  0xa9   : > { %s6488_s18 = smov 8   ;;  %s6489_s24 = smov 128  }
  0xaa   : > { %4680 = dma.hbm_to_vmem [thread:$0]  (!%p5680_p7), %s5674_s2, 256, %s5676_s7, %s604_s0, %s6489_s24, %s6489_s24, %s6488_s18  }
  0xab   : > { %s4215_s22 = sshll.u32 %s5375_s30, 9  ;;  %s6490_s15 = sld [smem:[#allocation37_spill]] }
  0xac   : > { %s6491_s26 = sshll.u32 %s5659_s21, 5  ;;  %s6492_s25 = sand.u32 1, %s5375_s30  }
  0xad   : > { %s628_s4 = scalar_lea.vmem [#allocation5], %s6491_s26  ;;  %s625_s23 = scalar_lea.sflag [#allocation6], %s6492_s25 }
  0xae   : > { %s636_s29 = sshll.u32 %s628_s4, 4  ;;  %s5724_s29 = int_to_ptr.vmem [resolvable:$true] %s636_s29 }
  0xb1   : > { %s5720_s5 = scalar_lea.hbm %s6490_s15, %s4215_s22  ;;  %s5234_s2 = scalar_lea.hbm %s6490_s15, 1024 }
  0xb2   : > { %s5229_s27 = scalar_lea.hbm %s5720_s5, 512  ;;  %p5235_p8 = scmp.lt.s32.totalorder %s5720_s5, %s6490_s15 }
  0xb3   : > { %p5230_p1 = scmp.ne.s32.totalorder %s5720_s5, %s5229_s27  ;;  %p5236_p11 = scmp.lt.s32.totalorder %s5234_s2, %s5229_s27 }
  0xb5   : > { %p5232_p4 = pnand %p5230_p1, %p5203_p10  ;;  %p5237_p0 = por %p5236_p11, %p5235_p8 }
  0xb7   : > { %p5233_p6 = pneg %p5232_p4 }
  0xb9   : > { %p5238_p2 = pnand %p5237_p0, %p5233_p6 }
  0xbb   : > { %5241 = shalt.err (!%p5238_p2)
}
  0xbc   : > { %s5242_s4 = scalar_lea.vmem %s5724_s29, 512  ;;  %s5392_s25 = smov [#allocation5]  }
  0xbd   : > { %p5243_p5 = scmp.ne.s32.totalorder %s5724_s29, %s5242_s4  ;;  %s5247_s19 = sshll.u32 %s5392_s25, 4  ;;  %s5248_s19 = int_to_ptr.vmem [resolvable:$false] %s5247_s19 }
  0xbe   : > { %s5249_s13 = scalar_lea.vmem %s5248_s19, 1024  ;;  %p5250_p13 = scmp.lt.s32.totalorder %s5724_s29, %s5248_s19 }
  0xbf   : > { %p5245_p9 = pnand %p5243_p5, %p5203_p10  ;;  %p5251_p1 = scmp.lt.s32.totalorder %s5249_s13, %s5242_s4 }
  0xc1   : > { %p5246_p12 = pneg %p5245_p9  ;;  %p5252_p4 = por %p5251_p1, %p5250_p13 }
  0xc3   : > { %p5253_p8 = pnand %p5252_p4, %p5246_p12 }
  0xc5   : > { %5256 = shalt.err (!%p5253_p8)
}
  0xc6   : > { %4683 = dma.hbm_to_vmem [thread:$0]  (!%p5680_p7), %s5720_s5, 512, %s5724_s29, %s625_s23, %s6489_s24, %s6489_s24, %s6488_s18  }
  0xc7   : > { %648 = sbr.rel (%p5524_p3) target bundleno = 7168 (0x1c00), region = 88  ;;  %s5756_s27 = sand.u32 (!%p5524_p3), 1, %s5367_s28  }
  0xc8   : > { %s5759_s26 = sshll.u32 (!%p5524_p3), %s5756_s27, 4  ;;  %s651_s7 = scalar_lea.sflag (!%p5524_p3), [#allocation3], %s5756_s27 }
  0xc9   : > { %s5763_s9 = scalar_lea.vmem (!%p5524_p3), [#allocation2], %s5759_s26  ;;  %p6493_p10 = scmp.ne.s32.totalorder (!%p5524_p3), %s6482_s3, 0 }
  0xcc   : > { %5326 = dma.done.wait (%p6493_p10), %s651_s7, 256  }
  0xcd   : > { %5328 = vsyncadd (%p6493_p10), %s651_s7, 4294967040  ;;  %s659_s29 = sand.u32 1, %s5519_s1   ;;  %s4062_s20 = sshll.u32 %s5756_s27, 5 }
  0xce   : > { %s660_s23 = scalar_lea.sflag [#allocation6], %s659_s29  ;;  %s5771_s18 = scalar_lea.vmem [#allocation5], %s4062_s20 }
  0xcf   : > { %5330 = dma.done.wait (%p6493_p10), %s660_s23, 512  }
  0xd0   : > { %5332 = vsyncadd (%p6493_p10), %s660_s23, 4294966784  ;;  %p6494_p3 = scmp.eq.s32.totalorder %s5519_s1, 0 }
  0xd2   : > { %5334 = dma.done.wait (%p6494_p3), [#allocation6], 128   ;;  %p6495_p7 = pmov %p6494_p3 }
  0xd3   : > { %p6496_p6 = pmov %p6494_p3 }
  0xd4   : > { %5336 = vsyncadd (%p6495_p7), [#allocation6], 4294967168 }
  0xd5   : > { %5338 = dma.done.wait (%p6496_p6), [#allocation9], 3120   ;;  %p6497_p11 = pmov %p6494_p3 }
  0xd6   : > { %p6498_p0 = pmov %p6494_p3 }
  0xd7   : > { %5340 = vsyncadd (%p6497_p11), [#allocation9], 4294964176 }
  0xd8   : > { %5342 = dma.done.wait (%p6498_p0), [#allocation12], 4096   ;;  %p6499_p2 = pmov %p6498_p0 }
  0xd9   : > { %p6500_p5 = pmov %p6498_p0 }
  0xda   : > { %5344 = vsyncadd (%p6499_p2), [#allocation12], 4294963200 }
  0xdb   : > { %5346 = dma.done.wait (%p6500_p5), [#allocation15], 3072   ;;  %p6501_p9 = pmov %p6498_p0 }
  0xdc   : > { %p6502_p12 = pmov %p6498_p0 }
  0xdd   : > { %5348 = vsyncadd (%p6501_p9), [#allocation15], 4294964224 }
  0xde   : > { %5350 = dma.done.wait (%p6502_p12), [#allocation18], 2048   ;;  %p6503_p13 = pmov %p6498_p0 }
  0xdf   : > { %v5393_v0 = vmov 0   ;;  %v4793_v1 = vld [vmem:[#allocation8 + $0xac] ss:$12 sps:$4 sm:$0xff]   ;;  %v4795_v2 = vld [vmem:[#allocation8 + $0xa8] ss:$12 sps:$4 sm:$0xff]   ;;  %v5394_v20 = vmov 0.0   ;;  %v807_v21 = vlaneseq }
  0xe0   : > { %5352 = vsyncadd (%p6503_p13), [#allocation18], 4294965248  ;;  %982 = vmatprep.mubr.bf16.mxu0 %v5393_v0  ;;  %950 = vmatprep.subr.bf16.mxu0 %v4793_v1  ;;  %v4796_v3 = vld [vmem:[#allocation8 + $0x94] ss:$12 sps:$4 sm:$0xff]   ;;  %v4798_v4 = vld [vmem:[#allocation8 + $0x90] ss:$12 sps:$4 sm:$0xff]  }
  0xe1   : > { %951 = vmatpush1.bf16.msra.mxu0 %v4795_v2  ;;  %v4799_v5 = vld [vmem:[#allocation8 + $0x7c] ss:$12 sps:$4 sm:$0xff]   ;;  %v4801_v6 = vld [vmem:[#allocation8 + $0x78] ss:$12 sps:$4 sm:$0xff]   ;;  %v4804_v8 = vld [vmem:[#allocation8 + $0x60] ss:$12 sps:$4 sm:$0xff]   ;;  %4340 = vmatprep.subr.bf16.mxu1 %v5394_v20 }
  0xe2   : > { %952 = vmatprep.subr.bf16.mxu0 %v4796_v3  ;;  %v4802_v7 = vld [vmem:[#allocation8 + $0x64] ss:$12 sps:$4 sm:$0xff]   ;;  %v4805_v9 = vld [vmem:[#allocation8 + $0x4c] ss:$12 sps:$4 sm:$0xff]   ;;  %v4807_v10 = vld [vmem:[#allocation8 + $0x48] ss:$12 sps:$4 sm:$0xff]  }
  0xe3   : > { %v4808_v11 = vld [vmem:[#allocation8 + $0x34] ss:$12 sps:$4 sm:$0xff]   ;;  %v4810_v12 = vld [vmem:[#allocation8 + $0x30] ss:$12 sps:$4 sm:$0xff]   ;;  %v4813_v14 = vld [vmem:[#allocation8 + $0x18] ss:$12 sps:$4 sm:$0xff]  }
  0xe4   : > { %v4811_v13 = vld [vmem:[#allocation8 + $0x1c] ss:$12 sps:$4 sm:$0xff]   ;;  %v4814_v15 = vld [vmem:[#allocation8 + $0x4] ss:$12 sps:$4 sm:$0xff]   ;;  %v4816_v16 = vld [vmem:[#allocation8] ss:$12 sps:$4 sm:$0xff]  }
  0xe5   : > { %953 = vmatpush1.bf16.msra.mxu0 %v4798_v4  ;;  %v763_v17 = vld [vmem:[%s5763_s9] sm:$0xff]  ;;  %v764_v18 = vld [vmem:[%s5763_s9 + $0x8] sm:$0xff]  ;;  %vm5395_vm0 = vmmov 0   ;;  %v5809_v22 = vshrl.u32 %v807_v21, 7  ;;  %vm1042_vm1 = vcmask 261120   ;;  %s5396_s3 = smov 96  }
  0xe6   : > { %954 = vmatprep.subr.bf16.mxu0 %v4799_v5  ;;  %v5800_v19 = vpack.c.bf16 %v764_v18, %v763_v17  ;;  %4356 = vmatprep.mubr.msk.bf16.mxu1 %vm5395_vm0, %v5394_v20  ;;  %v5817_v25 = vld [vmem:[#allocation10] sm:$0x7]  ;;  %v4817_v44 = vld [vmem:[#allocation8 + $0xb0] ss:$12 sps:$4 sm:$0xff]   ;;  %v4818_v45 = vld [vmem:[#allocation8 + $0x98] ss:$12 sps:$4 sm:$0xff]  }
  0xe7   : > { %v5812_v23 = vsub.s32 1, %v5809_v22  ;;  %v5815_v24 = vsub.s32 0, %v5809_v22  ;;  %4341 = vmatpush3.bf16.msra.mxu1 %v4817_v44  ;;  %v4819_v46 = vld [vmem:[#allocation8 + $0x80] ss:$12 sps:$4 sm:$0xff]   ;;  %v4820_v47 = vld [vmem:[#allocation8 + $0x68] ss:$12 sps:$4 sm:$0xff]  }
  0xe8   : > { %4342 = vmatprep.subr.bf16.mxu1 %v5394_v20  ;;  %v4821_v48 = vld [vmem:[#allocation8 + $0x50] ss:$12 sps:$4 sm:$0xff]   ;;  %v4822_v49 = vld [vmem:[#allocation8 + $0x38] ss:$12 sps:$4 sm:$0xff]   ;;  %v4823_v50 = vld [vmem:[#allocation8 + $0x20] ss:$12 sps:$4 sm:$0xff]  }
  0xe9   : > { %955 = vmatpush1.bf16.msra.mxu0 %v4801_v6  ;;  %v814_v26 = vrot.slane %v5817_v25, %v5812_v23  ;;  %v810_v28 = vrot.slane %v5817_v25, %v5815_v24  ;;  %v4824_v51 = vld [vmem:[#allocation8 + $0x8] ss:$12 sps:$4 sm:$0xff]   ;;  %v5858_v52 = vld [vmem:[#allocation7] sm:$0xff]  ;;  %vm1135_vm2 = vcmask 64512   ;;  %vm1163_vm3 = vcmask 1043456   ;;  %s5397_s24 = smov 64  }
  0xea   : > { %956 = vmatprep.subr.bf16.mxu0 %v4802_v7  ;;  %s5398_s5 = smov 32   ;;  %vm1945_vm4 = vcmask 523264   ;;  %vm1948_vm5 = vcmask 785408   ;;  %vm2477_vm6 = vcmask 130048   ;;  %s6260_s29 = scalar_lea.vmem [#allocation20], %s5759_s26 }
  0xeb   : > { %4343 = vmatpush3.bf16.msra.mxu1 %v4818_v45  ;;  %s4216_s0 = sshll.u32 %s5519_s1, 8  ;;  %s6504_s22 = sld [smem:[#allocation47_spill]] }
  0xec   : > { %4344 = vmatprep.subr.bf16.mxu1 %v5394_v20  ;;  %s3838_s25 = sshll.u32 %s6260_s29, 4  ;;  %s3809_s19 = scalar_lea.sflag [#allocation21], %s5756_s27  ;;  %s6322_s25 = int_to_ptr.vmem [resolvable:$true] %s3838_s25 }
  0xed   : > { %957 = vmatpush1.bf16.msra.mxu0 %v4804_v8  ;;  %s5257_s13 = scalar_lea.vmem %s6322_s25, 256  ;;  %p6505_p4 = scmp.ne.s32.totalorder %s6483_s17, 0 }
  0xee   : > { %958 = vmatprep.subr.bf16.mxu0 %v4805_v9  ;;  %p5258_p1 = scmp.ne.s32.totalorder %s6322_s25, %s5257_s13  ;;  %s5399_s7 = smov [#allocation20]  }
  0xef   : > { %4345 = vmatpush3.bf16.msra.mxu1 %v4819_v46 }
  0xf0   : > { %4346 = vmatprep.subr.bf16.mxu1 %v5394_v20  ;;  %p5259_p8 = pnand %p5258_p1, %p6505_p4 }
  0xf1   : > { %959 = vmatpush1.bf16.msra.mxu0 %v4807_v10  ;;  %s6319_s4 = scalar_lea.hbm %s6504_s22, %s4216_s0 }
  0xf2   : > { %960 = vmatprep.subr.bf16.mxu0 %v4808_v11  ;;  %p5260_p10 = pneg %p5259_p8 }
  0xf3   : > { %4347 = vmatpush3.bf16.msra.mxu1 %v4820_v47 }
  0xf4   : > { %4348 = vmatprep.subr.bf16.mxu1 %v5394_v20 }
  0xf5   : > { %961 = vmatpush1.bf16.msra.mxu0 %v4810_v12  ;;  %v5869_v12 = vsub.s32 2, %v5809_v22 }
  0xf6   : > { %962 = vmatprep.subr.bf16.mxu0 %v4811_v13 }
  0xf7   : > { %4349 = vmatpush3.bf16.msra.mxu1 %v4821_v48 }
  0xf8   : > { %4350 = vmatprep.subr.bf16.mxu1 %v5394_v20 }
  0xf9   : > { %963 = vmatpush1.bf16.msra.mxu0 %v4813_v14  ;;  %v818_v14 = vrot.slane %v5817_v25, %v5869_v12 }
  0xfa   : > { %964 = vmatprep.subr.bf16.mxu0 %v4814_v15 }
  0xfb   : > { %4351 = vmatpush3.bf16.msra.mxu1 %v4822_v49 }
  0xfc   : > { %4352 = vmatprep.subr.bf16.mxu1 %v5394_v20 }
  0xfd   : > { %965 = vmatpush1.bf16.msra.mxu0 %v4816_v16 }
  0xfe   : > { %4360 = vmatprep.subr.bf16.mxu0 %v5394_v20 }
  0xff   : > { %4353 = vmatpush3.bf16.msra.mxu1 %v4823_v50 }
 0x100   : > { %983 = vmatmul.mubr.bf16.vlgmr.msra.gmra.mxu0 %v5800_v19  ;;  %4354 = vmatprep.subr.bf16.mxu1 %v5394_v20 }
 0x101   : > { %4362 = vmatprep.mubr.msk.bf16.mxu0 %vm5395_vm0, %v5394_v20 }
 0x103   : > { %4355 = vmatpush3.bf16.msra.mxu1 %v4824_v51 }
 0x104   : > { %4378 = vmatprep.subr.bf16.mxu1 %v5394_v20 }
 0x106   : > { %4357 = vmatmul.mubr.bf16.vlgmr.msra.gmra.mxu1 %v5800_v19 }
 0x107   : > { %4380 = vmatprep.mubr.msk.bf16.mxu1 %vm5395_vm0, %v5394_v20 }
 0x1c0   : > { %v984_v27 = vpop.f32.mrf.mxu0 }
 0x1c1   : > { %v985_v32 = vadd.f32 %v984_v27, %v810_v28 }
 0x1c2   : > { %v986_v29 = vpop.f32.mrf.mxu0 }
 0x1c3   : > { %v987_v30 = vadd.f32 %v986_v29, %v814_v26  ;;  %v1034_v37 = vmul.f32 0.17677669, %v985_v32 }
 0x1c4   : > { %v988_v31 = vpop.f32.mrf.mxu0 }
 0x1c5   : > { %v5823_v33 = vpack.c.bf16 %v987_v30, %v987_v30  ;;  %v5832_v39 = vpack.c.bf16 %v1034_v37, %v1034_v37  ;;  %v989_v40 = vadd.f32 %v988_v31, %v810_v28 }
 0x1c6   : > { %v990_v34 = vpop.f32.mrf.mxu0  ;;  %v1027_v13 = vpop.f32.mrf.mxu1 }
 0x1c7   : > { %v991_v35 = vadd.f32 %v990_v34, %v814_v26  ;;  %v1047_v36 = vsel %vm1042_vm1, %v5823_v33, 0  ;;  %v1035_v42 = vmul.f32 0.17677669, %v989_v40  ;;  %v1028_v16 = vadd.f32 %v1027_v13, %v818_v14 }
 0x1c8   : > { %4361 = vmatpush3.bf16.xpose.msra.mxu0 %v1047_v36  ;;  %v4358_v15 = vpop.f32.mrf.mxu1 }
 0x1c9   : > { %v5827_v38 = vpack.c.bf16 %v991_v35, %v991_v35  ;;  %4366 = vmatprep.subr.bf16.mxu0 %v5394_v20  ;;  %v5841_v43 = vpack.c.bf16 %v1035_v42, %v1035_v42  ;;  %v5873_v21 = vpack.c.bf16 %v1028_v16, %v1028_v16 }
 0x1ca   : > { %v1030_v17 = vpop.f32.mrf.mxu1 }
 0x1cb   : > { %1309 = vrot.lane.b32.xlu1 %v5827_v38, %s5396_s3  ;;  %v1093_v41 = vsel %vm1042_vm1, %v5827_v38, 0  ;;  %v1031_v18 = vadd.f32 %v1030_v17, %v818_v14  ;;  %v1165_v27 = vsel %vm1163_vm3, %v5873_v21, 0 }
 0x1cc   : > { %v4359_v19 = vpop.f32.mrf.mxu1 }
 0x1cd   : > { %v5875_v26 = vpack.c.bf16 %v1031_v18, %v1031_v18 }
 0x1cf   : > { %4363 = vmatmul.mubr.msk.bf16.vlgmr.msra.gmra.mxu0 %vm1042_vm1, %v5832_v39  ;;  %v1211_v22 = vsel %vm1163_vm3, %v5875_v26, 0 }
 0x1d0   : > { %4367 = vmatpush3.bf16.xpose.msra.mxu0 %v1093_v41  ;;  %4368 = vmatprep.mubr.msk.bf16.mxu0 %vm5395_vm0, %v5394_v20 }
 0x1d1   : > { %4372 = vmatprep.subr.bf16.mxu0 %v5394_v20  ;;  %4379 = vmatpush3.bf16.msra.mxu1 %v1211_v22 }
 0x1d2   : > { %4390 = vmatprep.subr.bf16.mxu1 %v5394_v20 }
 0x1d7   : > { %4369 = vmatmul.mubr.msk.bf16.vlgmr.msra.gmra.mxu0 %vm1042_vm1, %v5841_v43 }
 0x1d8   : > { %4374 = vmatprep.mubr.msk.bf16.mxu0 %vm5395_vm0, %v5394_v20  ;;  %4373 = vmatpush3.bf16.msra.mxu0 %v1165_v27 }
 0x1d9   : > { %4384 = vmatprep.subr.bf16.mxu0 %v5394_v20 }
 0x23d   : > { %v1310_v25 = vpop.permute.xlu1 %1309 }
 0x23e   : > { %v1315_v42 = vsel %vm1042_vm1, %v1310_v25, 0 }
 0x28f   : > { %v1083_v53 = vpop.f32.mrf.mxu0 }
 0x290   : > { %v1084_v54 = vadd.f32 %v1083_v53, %v5858_v52 }
 0x291   : > { %v4364_v55 = vpop.f32.mrf.mxu0 }
 0x292   : > { %v1136_v56 = vsel %vm1135_vm2, %v1084_v54, -inf }
 0x293   : > { %1137 = vmax.xlane.f32.xlu0 %v1136_v56  ;;  %v1086_v57 = vpop.f32.mrf.mxu0 }
 0x295   : > { %v4365_v58 = vpop.f32.mrf.mxu0 }
 0x297   : > { %v1129_v59 = vpop.f32.mrf.mxu0 }
 0x298   : > { %v1130_v60 = vadd.f32 %v1129_v59, %v5858_v52 }
 0x299   : > { %v4370_v61 = vpop.f32.mrf.mxu0 }
 0x29a   : > { %v1139_v62 = vsel %vm1135_vm2, %v1130_v60, -inf }
 0x29b   : > { %1140 = vmax.xlane.f32.xlu0 %v1139_v62  ;;  %v1132_v63 = vpop.f32.mrf.mxu0 }
 0x29d   : > { %v4371_v1 = vpop.f32.mrf.mxu0 }
 0x2b1   : > { %1257 = vrot.lane.b32.xlu0 %v5823_v33, %s5396_s3 }
 0x31c   : > { %v1138_v2 = vpop.xlane.xlu0 %1137 }
 0x31d   : > { %v1142_v3 = vsub.f32 %v1084_v54, %v1138_v2 }
 0x31f   : > { %v1144_v4 = vmul.f32 1.442695, %v1142_v3 }
 0x321   : > { %4913 = vpow2.f32 %v1144_v4 }
 0x324   : > { %v1141_v5 = vpop.xlane.xlu0 %1140 }
 0x325   : > { %v1143_v6 = vsub.f32 %v1130_v60, %v1141_v5 }
 0x327   : > { %v1146_v7 = vmul.f32 1.442695, %v1143_v6 }
 0x328   : > { %v1258_v32 = vpop.permute.xlu0 %1257 }
 0x329   : > { %4915 = vpow2.f32 %v1146_v7  ;;  %v1263_v35 = vsel %vm1042_vm1, %v1258_v32, 0 }
 0x32e   : > { %v4914_v8 = vpop.eup %4913 }
 0x32f   : > { %v1148_v9 = vsel %vm1135_vm2, %v4914_v8, 0.0 }
 0x330   : > { %1149 = vadd.xlane.f32.xlu1 %v1148_v9 }
 0x336   : > { %v4916_v10 = vpop.eup %4915 }
 0x337   : > { %v1151_v11 = vsel %vm1135_vm2, %v4916_v10, 0.0 }
 0x338   : > { %1152 = vadd.xlane.f32.xlu1 %v1151_v11 }
 0x349   : > { %1254 = vrot.lane.b32.xlu1 %v5832_v39, %s5396_s3 }
 0x34d   : > { %1306 = vrot.lane.b32.xlu1 %v5841_v43, %s5396_s3 }
 0x3b9   : > { %v1150_v28 = vpop.xlane.xlu1 %1149 }
 0x3ba   : > { %4917 = vrcp.f32 %v1150_v28 }
 0x3c1   : > { %v1153_v29 = vpop.xlane.xlu1 %1152 }
 0x3c2   : > { %4919 = vrcp.f32 %v1153_v29 }
 0x3c5   : > { %v1255_v41 = vpop.permute.xlu1 %1254 }
 0x3c7   : > { %v4918_v30 = vpop.eup %4917 }
 0x3c8   : > { %v1156_v31 = vmul.f32 %v4918_v30, %v4914_v8 }
 0x3c9   : > { %v1307_v44 = vpop.permute.xlu1 %1306 }
 0x3ca   : > { %v1158_v34 = vpack.c.bf16 %v1156_v31, %v1156_v31 }
 0x3cc   : > { %4375 = vmatmul.mubr.msk.bf16.vlgmr.msra.gmra.mxu0 %vm1135_vm2, %v1158_v34 }
 0x3cd   : > { %4385 = vmatpush3.bf16.xpose.msra.mxu0 %v1263_v35  ;;  %4386 = vmatprep.mubr.msk.bf16.mxu0 %vm5395_vm0, %v5394_v20 }
 0x3ce   : > { %4396 = vmatprep.subr.bf16.mxu0 %v5394_v20 }
 0x3cf   : > { %v4920_v36 = vpop.eup %4919 }
 0x3d0   : > { %v1157_v37 = vmul.f32 %v4920_v36, %v4916_v10 }
 0x3d2   : > { %v1159_v40 = vpack.c.bf16 %v1157_v37, %v1157_v37 }
 0x3d4   : > { %4381 = vmatmul.mubr.msk.bf16.vlgmr.msra.gmra.mxu1 %vm1135_vm2, %v1159_v40  ;;  %4387 = vmatmul.mubr.msk.bf16.vlgmr.msra.gmra.mxu0 %vm1042_vm1, %v1255_v41 }
 0x3d5   : > { %4391 = vmatpush3.bf16.xpose.msra.mxu1 %v1315_v42  ;;  %4392 = vmatprep.mubr.msk.bf16.mxu1 %vm5395_vm0, %v5394_v20 }
 0x3d6   : > { %4402 = vmatprep.subr.bf16.mxu1 %v5394_v20  ;;  %4398 = vmatprep.mubr.msk.bf16.mxu0 %vm5395_vm0, %v5394_v20 }
 0x3dc   : > { %4393 = vmatmul.mubr.msk.bf16.vlgmr.msra.gmra.mxu1 %vm1042_vm1, %v1307_v44 }
 0x3dd   : > { %4404 = vmatprep.mubr.msk.bf16.mxu1 %vm5395_vm0, %v5394_v20 }
 0x48c   : > { %v5903_v45 = vpop.f32.mrf.mxu0 }
 0x48e   : > { %v4376_v46 = vpop.f32.mrf.mxu0 }
 0x490   : > { %v1204_v47 = vpop.f32.mrf.mxu0 }
 0x492   : > { %v4377_v48 = vpop.f32.mrf.mxu0 }
 0x494   : > { %v5905_v49 = vpop.f32.mrf.mxu1  ;;  %v1299_v50 = vpop.f32.mrf.mxu0 }
 0x495   : > { %v1300_v51 = vadd.f32 %v1299_v50, %v5858_v52 }
 0x496   : > { %v4382_v53 = vpop.f32.mrf.mxu1  ;;  %v4388_v54 = vpop.f32.mrf.mxu0 }
 0x497   : > { %v1357_v55 = vsel %vm1135_vm2, %v1300_v51, -inf }
 0x498   : > { %v1250_v56 = vpop.f32.mrf.mxu1  ;;  %1358 = vmax.xlane.f32.xlu0 %v1357_v55  ;;  %v1302_v57 = vpop.f32.mrf.mxu0 }
 0x49a   : > { %v4383_v58 = vpop.f32.mrf.mxu1  ;;  %v4389_v59 = vpop.f32.mrf.mxu0 }
 0x49c   : > { %v1351_v60 = vpop.f32.mrf.mxu1 }
 0x49d   : > { %v1352_v61 = vadd.f32 %v1351_v60, %v5858_v52 }
 0x49e   : > { %v4394_v62 = vpop.f32.mrf.mxu1 }
 0x49f   : > { %v1360_v63 = vsel %vm1135_vm2, %v1352_v61, -inf }
 0x4a0   : > { %1361 = vmax.xlane.f32.xlu1 %v1360_v63  ;;  %v1354_v1 = vpop.f32.mrf.mxu1 }
 0x4a2   : > { %v4395_v2 = vpop.f32.mrf.mxu1 }
 0x4b1   : > { %1431 = vrot.lane.b32.xlu1 %v5875_v26, %s5396_s3 }
 0x4b5   : > { %1481 = vrot.lane.b32.xlu1 %v5823_v33, %s5397_s24 }
 0x4b9   : > { %1531 = vrot.lane.b32.xlu1 %v5827_v38, %s5397_s24 }
 0x4bd   : > { %1529 = vrot.lane.b32.xlu1 %v5841_v43, %s5397_s24 }
 0x521   : > { %v1359_v3 = vpop.xlane.xlu0 %1358 }
 0x522   : > { %v1363_v4 = vsub.f32 %v1300_v51, %v1359_v3 }
 0x524   : > { %v1365_v5 = vmul.f32 1.442695, %v1363_v4 }
 0x526   : > { %4921 = vpow2.f32 %v1365_v5 }
 0x529   : > { %v1362_v6 = vpop.xlane.xlu1 %1361 }
 0x52a   : > { %v1364_v7 = vsub.f32 %v1352_v61, %v1362_v6 }
 0x52c   : > { %v1367_v8 = vmul.f32 1.442695, %v1364_v7 }
 0x52d   : > { %v1432_v9 = vpop.permute.xlu1 %1431 }
 0x52e   : > { %4923 = vpow2.f32 %v1367_v8  ;;  %v1437_v10 = vsel %vm1163_vm3, %v1432_v9, 0 }
 0x52f   : > { %4403 = vmatpush3.bf16.msra.mxu1 %v1437_v10 }
 0x530   : > { %4414 = vmatprep.subr.bf16.mxu1 %v5394_v20 }
 0x531   : > { %v1482_v25 = vpop.permute.xlu1 %1481 }
 0x532   : > { %v1487_v29 = vsel %vm1042_vm1, %v1482_v25, 0 }
 0x533   : > { %v4922_v11 = vpop.eup %4921 }
 0x534   : > { %v1369_v13 = vsel %vm1135_vm2, %v4922_v11, 0.0 }
 0x535   : > { %1370 = vadd.xlane.f32.xlu0 %v1369_v13  ;;  %v1532_v32 = vpop.permute.xlu1 %1531 }
 0x536   : > { %v1537_v36 = vsel %vm1042_vm1, %v1532_v32, 0 }
 0x539   : > { %v1530_v37 = vpop.permute.xlu1 %1529 }
 0x53b   : > { %v4924_v14 = vpop.eup %4923 }
 0x53c   : > { %v1372_v15 = vsel %vm1135_vm2, %v4924_v14, 0.0 }
 0x53d   : > { %1373 = vadd.xlane.f32.xlu0 %v1372_v15 }
 0x553   : > { %1382 = vrot.lane.b32.xlu0 %v5873_v21, %s5396_s3 }
 0x557   : > { %1479 = vrot.lane.b32.xlu0 %v5832_v39, %s5397_s24 }
 0x5be   : > { %v1371_v16 = vpop.xlane.xlu0 %1370 }
 0x5bf   : > { %4925 = vrcp.f32 %v1371_v16 }
 0x5c6   : > { %v1374_v17 = vpop.xlane.xlu0 %1373 }
 0x5c7   : > { %4927 = vrcp.f32 %v1374_v17 }
 0x5ca   : > { %v1383_v18 = vpop.permute.xlu0 %1382 }
 0x5cb   : > { %v1388_v19 = vsel %vm1163_vm3, %v1383_v18, 0 }
 0x5cc   : > { %v4926_v27 = vpop.eup %4925  ;;  %4397 = vmatpush3.bf16.msra.mxu0 %v1388_v19 }
 0x5cd   : > { %4408 = vmatprep.subr.bf16.mxu0 %v5394_v20  ;;  %v1377_v22 = vmul.f32 %v4926_v27, %v4922_v11 }
 0x5ce   : > { %v1480_v35 = vpop.permute.xlu0 %1479 }
 0x5cf   : > { %v1379_v28 = vpack.c.bf16 %v1377_v22, %v1377_v22 }
 0x5d1   : > { %4399 = vmatmul.mubr.msk.bf16.vlgmr.msra.gmra.mxu0 %vm1135_vm2, %v1379_v28 }
 0x5d2   : > { %4409 = vmatpush3.bf16.xpose.msra.mxu0 %v1487_v29  ;;  %4410 = vmatprep.mubr.msk.bf16.mxu0 %vm5395_vm0, %v5394_v20 }
 0x5d3   : > { %4420 = vmatprep.subr.bf16.mxu0 %v5394_v20 }
 0x5d4   : > { %v4928_v30 = vpop.eup %4927 }
 0x5d5   : > { %v1378_v31 = vmul.f32 %v4928_v30, %v4924_v14 }
 0x5d7   : > { %v1380_v34 = vpack.c.bf16 %v1378_v31, %v1378_v31 }
 0x5d9   : > { %4405 = vmatmul.mubr.msk.bf16.vlgmr.msra.gmra.mxu1 %vm1135_vm2, %v1380_v34  ;;  %4411 = vmatmul.mubr.msk.bf16.vlgmr.msra.gmra.mxu0 %vm1042_vm1, %v1480_v35 }
 0x5da   : > { %4415 = vmatpush3.bf16.xpose.msra.mxu1 %v1537_v36  ;;  %4416 = vmatprep.mubr.msk.bf16.mxu1 %vm5395_vm0, %v5394_v20 }
 0x5db   : > { %4426 = vmatprep.subr.bf16.mxu1 %v5394_v20  ;;  %4422 = vmatprep.mubr.msk.bf16.mxu0 %vm5395_vm0, %v5394_v20 }
 0x5e1   : > { %4417 = vmatmul.mubr.msk.bf16.vlgmr.msra.gmra.mxu1 %vm1042_vm1, %v1530_v37 }
 0x5e2   : > { %4428 = vmatprep.mubr.msk.bf16.mxu1 %vm5395_vm0, %v5394_v20 }
 0x691   : > { %v5945_v40 = vpop.f32.mrf.mxu0 }
 0x693   : > { %v4400_v41 = vpop.f32.mrf.mxu0 }
 0x695   : > { %v1427_v42 = vpop.f32.mrf.mxu0 }
 0x697   : > { %v4401_v44 = vpop.f32.mrf.mxu0 }
 0x699   : > { %v5947_v46 = vpop.f32.mrf.mxu1  ;;  %v1523_v47 = vpop.f32.mrf.mxu0 }
 0x69a   : > { %v4763_v48 = vpack.i.bf16 %v5947_v46, %v5945_v40  ;;  %v1524_v50 = vadd.f32 %v1523_v47, %v5858_v52 }
 0x69b   : > { %v4406_v51 = vpop.f32.mrf.mxu1  ;;  %v4412_v53 = vpop.f32.mrf.mxu0 }
 0x69c   : > { %v1579_v54 = vsel %vm1135_vm2, %v1524_v50, -inf }
 0x69d   : > { %v1476_v55 = vpop.f32.mrf.mxu1  ;;  %1580 = vmax.xlane.f32.xlu0 %v1579_v54  ;;  %v1526_v56 = vpop.f32.mrf.mxu0 }
 0x69f   : > { %v4407_v57 = vpop.f32.mrf.mxu1  ;;  %v4413_v58 = vpop.f32.mrf.mxu0 }
 0x6a1   : > { %v1573_v59 = vpop.f32.mrf.mxu1 }
 0x6a2   : > { %v1574_v60 = vadd.f32 %v1573_v59, %v5858_v52 }
 0x6a3   : > { %v4418_v61 = vpop.f32.mrf.mxu1 }
 0x6a4   : > { %v1582_v62 = vsel %vm1135_vm2, %v1574_v60, -inf }
 0x6a5   : > { %1583 = vmax.xlane.f32.xlu1 %v1582_v62  ;;  %v1576_v63 = vpop.f32.mrf.mxu1 }
 0x6a7   : > { %v4419_v1 = vpop.f32.mrf.mxu1 }
 0x6b6   : > { %1651 = vrot.lane.b32.xlu1 %v5875_v26, %s5397_s24 }
 0x6ba   : > { %1701 = vrot.lane.b32.xlu1 %v5823_v33, %s5398_s5 }
 0x6be   : > { %1751 = vrot.lane.b32.xlu1 %v5827_v38, %s5398_s5 }
 0x6c2   : > { %1749 = vrot.lane.b32.xlu1 %v5841_v43, %s5398_s5 }
 0x726   : > { %v1581_v2 = vpop.xlane.xlu0 %1580 }
 0x727   : > { %v1585_v3 = vsub.f32 %v1524_v50, %v1581_v2 }
 0x729   : > { %v1587_v4 = vmul.f32 1.442695, %v1585_v3 }
 0x72b   : > { %4929 = vpow2.f32 %v1587_v4 }
 0x72e   : > { %v1584_v5 = vpop.xlane.xlu1 %1583 }
 0x72f   : > { %v1586_v6 = vsub.f32 %v1574_v60, %v1584_v5 }
 0x731   : > { %v1589_v7 = vmul.f32 1.442695, %v1586_v6 }
 0x732   : > { %v1652_v8 = vpop.permute.xlu1 %1651 }
 0x733   : > { %4931 = vpow2.f32 %v1589_v7  ;;  %v1657_v9 = vsel %vm1163_vm3, %v1652_v8, 0 }
 0x734   : > { %4427 = vmatpush3.bf16.msra.mxu1 %v1657_v9 }
 0x735   : > { %4438 = vmatprep.subr.bf16.mxu1 %v5394_v20 }
 0x736   : > { %v1702_v18 = vpop.permute.xlu1 %1701 }
 0x737   : > { %v1707_v27 = vsel %vm1042_vm1, %v1702_v18, 0  ;;  %v4829_v18 = vld [vmem:[#allocation11 + $0x18] sm:$0xff]  }
 0x738   : > { %v4930_v33 = vpop.eup %4929 }
 0x739   : > { %v1591_v38 = vsel %vm1135_vm2, %v4930_v33, 0.0 }
 0x73a   : > { %1592 = vadd.xlane.f32.xlu0 %v1591_v38  ;;  %v1752_v25 = vpop.permute.xlu1 %1751 }
 0x73b   : > { %v1757_v30 = vsel %vm1042_vm1, %v1752_v25, 0 }
 0x73e   : > { %v1750_v31 = vpop.permute.xlu1 %1749 }
 0x740   : > { %v4932_v10 = vpop.eup %4931 }
 0x741   : > { %v1594_v43 = vsel %vm1135_vm2, %v4932_v10, 0.0 }
 0x742   : > { %1595 = vadd.xlane.f32.xlu0 %v1594_v43 }
 0x758   : > { %1603 = vrot.lane.b32.xlu0 %v5873_v21, %s5397_s24 }
 0x75c   : > { %1699 = vrot.lane.b32.xlu0 %v5832_v39, %s5398_s5 }
 0x7c3   : > { %v1593_v11 = vpop.xlane.xlu0 %1592 }
 0x7c4   : > { %4933 = vrcp.f32 %v1593_v11 }
 0x7cb   : > { %v1596_v13 = vpop.xlane.xlu0 %1595 }
 0x7cc   : > { %4935 = vrcp.f32 %v1596_v13 }
 0x7cf   : > { %v1604_v14 = vpop.permute.xlu0 %1603 }
 0x7d0   : > { %v1609_v15 = vsel %vm1163_vm3, %v1604_v14, 0  ;;  %v4825_v14 = vld [vmem:[#allocation11 + $0x38] sm:$0xff]  }
 0x7d1   : > { %v4934_v16 = vpop.eup %4933  ;;  %4421 = vmatpush3.bf16.msra.mxu0 %v1609_v15  ;;  %v4826_v15 = vld [vmem:[#allocation11 + $0x30] sm:$0xff]  }
 0x7d2   : > { %4432 = vmatprep.subr.bf16.mxu0 %v5394_v20  ;;  %v1599_v17 = vmul.f32 %v4934_v16, %v4930_v33  ;;  %v4827_v16 = vld [vmem:[#allocation11 + $0x28] sm:$0xff]  }
 0x7d3   : > { %v1700_v29 = vpop.permute.xlu0 %1699 }
 0x7d4   : > { %v1601_v19 = vpack.c.bf16 %v1599_v17, %v1599_v17  ;;  %v4828_v17 = vld [vmem:[#allocation11 + $0x20] sm:$0xff]  }
 0x7d6   : > { %4423 = vmatmul.mubr.msk.bf16.vlgmr.msra.gmra.mxu0 %vm1135_vm2, %v1601_v19  ;;  %v4830_v19 = vld [vmem:[#allocation11 + $0x10] sm:$0xff]  }
 0x7d7   : > { %4433 = vmatpush3.bf16.xpose.msra.mxu0 %v1707_v27  ;;  %4434 = vmatprep.mubr.msk.bf16.mxu0 %vm5395_vm0, %v5394_v20  ;;  %v4831_v27 = vld [vmem:[#allocation11 + $0x8] sm:$0xff]  }
 0x7d8   : > { %4444 = vmatprep.subr.bf16.mxu0 %v5394_v20 }
 0x7d9   : > { %v4936_v39 = vpop.eup %4935 }
 0x7da   : > { %v1600_v22 = vmul.f32 %v4936_v39, %v4932_v10  ;;  %v4832_v39 = vld [vmem:[#allocation11] sm:$0xff]  }
 0x7dc   : > { %v1602_v28 = vpack.c.bf16 %v1600_v22, %v1600_v22 }
 0x7de   : > { %4429 = vmatmul.mubr.msk.bf16.vlgmr.msra.gmra.mxu1 %vm1135_vm2, %v1602_v28  ;;  %4435 = vmatmul.mubr.msk.bf16.vlgmr.msra.gmra.mxu0 %vm1042_vm1, %v1700_v29 }
 0x7df   : > { %4439 = vmatpush3.bf16.xpose.msra.mxu1 %v1757_v30  ;;  %4440 = vmatprep.mubr.msk.bf16.mxu1 %vm5395_vm0, %v5394_v20 }
 0x7e0   : > { %4450 = vmatprep.subr.bf16.mxu1 %v5394_v20  ;;  %4446 = vmatprep.mubr.msk.bf16.mxu0 %vm5395_vm0, %v5394_v20 }
 0x7e6   : > { %4441 = vmatmul.mubr.msk.bf16.vlgmr.msra.gmra.mxu1 %vm1042_vm1, %v1750_v31 }
 0x7e7   : > { %4452 = vmatprep.mubr.msk.bf16.mxu1 %vm5395_vm0, %v5394_v20 }
 0x896   : > { %v1645_v32 = vpop.f32.mrf.mxu0 }
 0x898   : > { %v4424_v34 = vpop.f32.mrf.mxu0 }
 0x89a   : > { %v1648_v35 = vpop.f32.mrf.mxu0 }
 0x89c   : > { %v4425_v36 = vpop.f32.mrf.mxu0 }
 0x89e   : > { %v1693_v37 = vpop.f32.mrf.mxu1  ;;  %v1743_v41 = vpop.f32.mrf.mxu0 }
 0x89f   : > { %v1744_v42 = vadd.f32 %v1743_v41, %v5858_v52  ;;  %v4768_v62 = vpack.i.bf16 %v1693_v37, %v1645_v32 }
 0x8a0   : > { %v4430_v44 = vpop.f32.mrf.mxu1  ;;  %v4436_v47 = vpop.f32.mrf.mxu0 }
 0x8a1   : > { %v1799_v50 = vsel %vm1135_vm2, %v1744_v42, -inf }
 0x8a2   : > { %v1696_v51 = vpop.f32.mrf.mxu1  ;;  %1800 = vmax.xlane.f32.xlu0 %v1799_v50  ;;  %v1746_v53 = vpop.f32.mrf.mxu0 }
 0x8a4   : > { %v4431_v54 = vpop.f32.mrf.mxu1  ;;  %v4437_v55 = vpop.f32.mrf.mxu0 }
 0x8a6   : > { %v1793_v56 = vpop.f32.mrf.mxu1 }
 0x8a7   : > { %v1794_v57 = vadd.f32 %v1793_v56, %v5858_v52 }
 0x8a8   : > { %v4442_v58 = vpop.f32.mrf.mxu1 }
 0x8a9   : > { %v1802_v59 = vsel %vm1135_vm2, %v1794_v57, -inf }
 0x8aa   : > { %1803 = vmax.xlane.f32.xlu1 %v1802_v59  ;;  %v1796_v60 = vpop.f32.mrf.mxu1 }
 0x8ac   : > { %v4443_v61 = vpop.f32.mrf.mxu1 }
 0x8bb   : > { %1871 = vrot.lane.b32.xlu1 %v5875_v26, %s5398_s5 }
 0x8bf   : > { %4764 = vrot.lane.b32.xlu1 %v4763_v48, %s5398_s5 }
 0x8c3   : > { %4769 = vrot.lane.b32.xlu1 %v4768_v62, %s5397_s24 }
 0x92b   : > { %v1801_v63 = vpop.xlane.xlu0 %1800 }
 0x92c   : > { %v1805_v1 = vsub.f32 %v1744_v42, %v1801_v63  ;;  %v4989_v63 = vld [vmem:[%s5763_s9] sm:$0xff] }
 0x92e   : > { %v1807_v52 = vmul.f32 1.442695, %v1805_v1 }
 0x930   : > { %4937 = vpow2.f32 %v1807_v52 }
 0x933   : > { %v1804_v2 = vpop.xlane.xlu1 %1803 }
 0x934   : > { %v1806_v3 = vsub.f32 %v1794_v57, %v1804_v2 }
 0x936   : > { %v1809_v4 = vmul.f32 1.442695, %v1806_v3 }
 0x937   : > { %v1872_v5 = vpop.permute.xlu1 %1871 }
 0x938   : > { %4939 = vpow2.f32 %v1809_v4  ;;  %v1877_v6 = vsel %vm1163_vm3, %v1872_v5, 0  ;;  %v4990_v4 = vld [vmem:[%s5763_s9 + $0x8] sm:$0xff]  ;;  %s5261_s9 = sshll.u32 %s5399_s7, 4  ;;  %s5262_s9 = int_to_ptr.vmem [resolvable:$false] %s5261_s9 }
 0x939   : > { %4451 = vmatpush3.bf16.msra.mxu1 %v1877_v6  ;;  %v4833_v6 = vld [vmem:[#allocation13 + $0xac] ss:$12 sps:$4 sm:$0xff]   ;;  %s5263_s20 = scalar_lea.vmem %s5262_s9, 512  ;;  %p5264_p3 = scmp.lt.s32.totalorder %s6322_s25, %s5262_s9 }
 0x93a   : > { %4476 = vmatprep.subr.bf16.mxu1 %v5394_v20  ;;  %p5265_p7 = scmp.lt.s32.totalorder %s5263_s20, %s5257_s13 }
 0x93b   : > { %v4765_v36 = vpop.permute.xlu1 %4764 }
 0x93c   : > { %v4767_v41 = vunpack.i.h.bf16 %v4765_v36  ;;  %v4766_v42 = vunpack.i.l.bf16 %v4765_v36  ;;  %v4862_v36 = vld [vmem:[#allocation13 + $0x30] ss:$12 sps:$4 sm:$0xff]   ;;  %p5266_p6 = por %p5265_p7, %p5264_p3 }
 0x93d   : > { %v4938_v26 = vpop.eup %4937 }
 0x93e   : > { %v1811_v40 = vsel %vm1135_vm2, %v4938_v26, 0.0  ;;  %v1944_v51 = vsel %vm1042_vm1, %v5905_v49, %v4767_v41  ;;  %v1943_v53 = vsel %vm1042_vm1, %v5903_v45, %v4766_v42  ;;  %v4113_v49 = vld [vmem:[%s6416_s6] ss:$0 sm:$0xff]  ;;  %v768_v41 = vld [vmem:[%s5771_s18 + $0x18] sm:$0xff]  ;;  %p5267_p11 = pnand %p5266_p6, %p5260_p10 }
 0x93f   : > { %1812 = vadd.xlane.f32.xlu0 %v1811_v40  ;;  %v4770_v37 = vpop.permute.xlu1 %4769  ;;  %v4838_v40 = vld [vmem:[#allocation13 + $0x98] ss:$12 sps:$4 sm:$0xff]  }
 0x940   : > { %v4772_v44 = vunpack.i.h.bf16 %v4770_v37  ;;  %v4771_v47 = vunpack.i.l.bf16 %v4770_v37  ;;  %v767_v37 = vld [vmem:[%s5771_s18 + $0x10] sm:$0xff] }
 0x941   : > { %v2103_v42 = vpack.c.bf16 %v768_v41, %v767_v37 }
 0x942   : > { %v1947_v56 = vsel %vm1945_vm4, %v1944_v51, %v4772_v44  ;;  %v1946_v57 = vsel %vm1945_vm4, %v1943_v53, %v4771_v47  ;;  %v4863_v44 = vld [vmem:[#allocation13 + $0x18] ss:$12 sps:$4 sm:$0xff]   ;;  %v4864_v47 = vld [vmem:[#allocation13] ss:$12 sps:$4 sm:$0xff]  }
 0x945   : > { %v4940_v46 = vpop.eup %4939 }
 0x946   : > { %v1814_v48 = vsel %vm1135_vm2, %v4940_v46, 0.0 }
 0x947   : > { %1815 = vadd.xlane.f32.xlu0 %v1814_v48  ;;  %v4848_v48 = vld [vmem:[#allocation13 + $0xa8] ss:$12 sps:$4 sm:$0xff]  }
 0x95d   : > { %1823 = vrot.lane.b32.xlu0 %v5873_v21, %s5398_s5 }
 0x9c8   : > { %v1813_v7 = vpop.xlane.xlu0 %1812 }
 0x9c9   : > { %4941 = vrcp.f32 %v1813_v7  ;;  %v4841_v7 = vld [vmem:[#allocation13 + $0x80] ss:$12 sps:$4 sm:$0xff]  }
 0x9d0   : > { %v1816_v8 = vpop.xlane.xlu0 %1815 }
 0x9d1   : > { %4943 = vrcp.f32 %v1816_v8  ;;  %v4839_v8 = vld [vmem:[#allocation13 + $0x7c] ss:$12 sps:$4 sm:$0xff]  }
 0x9d4   : > { %v1824_v9 = vpop.permute.xlu0 %1823 }
 0x9d5   : > { %v1829_v33 = vsel %vm1163_vm3, %v1824_v9, 0  ;;  %v4844_v9 = vld [vmem:[#allocation13 + $0x68] ss:$12 sps:$4 sm:$0xff]  }
 0x9d6   : > { %v4942_v38 = vpop.eup %4941  ;;  %4445 = vmatpush3.bf16.msra.mxu0 %v1829_v33  ;;  %v4842_v33 = vld [vmem:[#allocation13 + $0x64] ss:$12 sps:$4 sm:$0xff]  }
 0x9d7   : > { %v1819_v10 = vmul.f32 %v4942_v38, %v4938_v26  ;;  %4456 = vmatprep.subr.bf16.mxu0 %v5394_v20  ;;  %v4835_v26 = vld [vmem:[#allocation13 + $0xb0] ss:$12 sps:$4 sm:$0xff]  }
 0x9d8   : > { %v4847_v38 = vld [vmem:[#allocation13 + $0x50] ss:$12 sps:$4 sm:$0xff]  }
 0x9d9   : > { %v1821_v43 = vpack.c.bf16 %v1819_v10, %v1819_v10  ;;  %v4845_v10 = vld [vmem:[#allocation13 + $0x4c] ss:$12 sps:$4 sm:$0xff]  }
 0x9db   : > { %4447 = vmatmul.mubr.msk.bf16.vlgmr.msra.gmra.mxu0 %vm1135_vm2, %v1821_v43 }
 0x9dc   : > { %4472 = vmatprep.mubr.msk.bf16.mxu0 %vm5395_vm0, %v5394_v20  ;;  %4457 = vmatpush3.bf16.msra.mxu0 %v4825_v14 }
 0x9dd   : > { %4458 = vmatprep.subr.bf16.mxu0 %v5394_v20 }
 0x9de   : > { %v4944_v11 = vpop.eup %4943 }
 0x9df   : > { %v1820_v21 = vmul.f32 %v4944_v11, %v4940_v46  ;;  %v4836_v46 = vld [vmem:[#allocation13 + $0x94] ss:$12 sps:$4 sm:$0xff]  }
 0x9e0   : > { %4459 = vmatpush3.bf16.msra.mxu0 %v4826_v15 }
 0x9e1   : > { %v1822_v13 = vpack.c.bf16 %v1820_v21, %v1820_v21  ;;  %4460 = vmatprep.subr.bf16.mxu0 %v5394_v20 }
 0x9e3   : > { %4453 = vmatmul.mubr.msk.bf16.vlgmr.msra.gmra.mxu1 %vm1135_vm2, %v1822_v13 }
 0x9e4   : > { %4492 = vmatprep.mubr.msk.bf16.mxu1 %vm5395_vm0, %v5394_v20  ;;  %4461 = vmatpush3.bf16.msra.mxu0 %v4827_v16 }
 0x9e5   : > { %4462 = vmatprep.subr.bf16.mxu0 %v5394_v20  ;;  %4477 = vmatpush3.bf16.msra.mxu1 %v4848_v48 }
 0x9e6   : > { %4478 = vmatprep.subr.bf16.mxu1 %v5394_v20 }
 0x9e8   : > { %4463 = vmatpush3.bf16.msra.mxu0 %v4828_v17 }
 0x9e9   : > { %4464 = vmatprep.subr.bf16.mxu0 %v5394_v20 }
 0x9ec   : > { %4465 = vmatpush3.bf16.msra.mxu0 %v4829_v18  ;;  %v4851_v18 = vld [vmem:[#allocation13 + $0x38] ss:$12 sps:$4 sm:$0xff]  }
 0x9ed   : > { %4466 = vmatprep.subr.bf16.mxu0 %v5394_v20 }
 0x9f0   : > { %4467 = vmatpush3.bf16.msra.mxu0 %v4830_v19  ;;  %v4849_v19 = vld [vmem:[#allocation13 + $0x34] ss:$12 sps:$4 sm:$0xff]  }
 0x9f1   : > { %4468 = vmatprep.subr.bf16.mxu0 %v5394_v20 }
 0x9f4   : > { %4469 = vmatpush3.bf16.msra.mxu0 %v4831_v27  ;;  %v4852_v27 = vld [vmem:[#allocation13 + $0x90] ss:$12 sps:$4 sm:$0xff]  }
 0x9f5   : > { %4470 = vmatprep.subr.bf16.mxu0 %v5394_v20  ;;  %4479 = vmatpush3.bf16.msra.mxu1 %v4852_v27 }
 0x9f6   : > { %4480 = vmatprep.subr.bf16.mxu1 %v5394_v20 }
 0x9f8   : > { %4471 = vmatpush3.bf16.msra.mxu0 %v4832_v39  ;;  %v4855_v39 = vld [vmem:[#allocation13 + $0x20] ss:$12 sps:$4 sm:$0xff]  }
 0x9f9   : > { %2324 = vmatprep.subr.bf16.mxu0 %v4835_v26 }
 0xa9b   : > { %v1865_v22 = vpop.f32.mrf.mxu0 }
 0xa9d   : > { %v4448_v25 = vpop.f32.mrf.mxu0 }
 0xa9e   : > { %v4856_v25 = vld [vmem:[#allocation13 + $0x78] ss:$12 sps:$4 sm:$0xff]  }
 0xa9f   : > { %v1868_v28 = vpop.f32.mrf.mxu0  ;;  %4481 = vmatpush3.bf16.msra.mxu1 %v4856_v25 }
 0xaa0   : > { %v4857_v28 = vld [vmem:[#allocation13 + $0x4] ss:$12 sps:$4 sm:$0xff]   ;;  %4482 = vmatprep.subr.bf16.mxu1 %v5394_v20 }
 0xaa1   : > { %v4449_v29 = vpop.f32.mrf.mxu0 }
 0xaa2   : > { %v4859_v29 = vld [vmem:[#allocation13 + $0x8] ss:$12 sps:$4 sm:$0xff]  }
 0xaa3   : > { %v1913_v30 = vpop.f32.mrf.mxu1 }
 0xaa4   : > { %v4773_v31 = vpack.i.bf16 %v1913_v30, %v1865_v22  ;;  %v4853_v22 = vld [vmem:[#allocation13 + $0x1c] ss:$12 sps:$4 sm:$0xff]   ;;  %v4860_v30 = vld [vmem:[#allocation13 + $0x60] ss:$12 sps:$4 sm:$0xff]  }
 0xaa5   : > { %v4454_v32 = vpop.f32.mrf.mxu1  ;;  %4483 = vmatpush3.bf16.msra.mxu1 %v4860_v30 }
 0xaa6   : > { %4774 = vrot.lane.b32.xlu0 %v4773_v31, %s5396_s3  ;;  %v765_v31 = vld [vmem:[%s5771_s18] sm:$0xff]  ;;  %v766_v32 = vld [vmem:[%s5771_s18 + $0x8] sm:$0xff]  ;;  %4484 = vmatprep.subr.bf16.mxu1 %v5394_v20 }
 0xaa7   : > { %v1916_v34 = vpop.f32.mrf.mxu1 }
 0xaa8   : > { %v2102_v34 = vpack.c.bf16 %v766_v32, %v765_v31 }
 0xaa9   : > { %v4455_v35 = vpop.f32.mrf.mxu1 }
 0xaaa   : > { %v4861_v35 = vld [vmem:[#allocation13 + $0x48] ss:$12 sps:$4 sm:$0xff]  }
 0xaab   : > { %4485 = vmatpush3.bf16.msra.mxu1 %v4861_v35 }
 0xaac   : > { %4486 = vmatprep.subr.bf16.mxu1 %v5394_v20 }
 0xaaf   : > { %4487 = vmatpush3.bf16.msra.mxu1 %v4862_v36 }
 0xab0   : > { %4488 = vmatprep.subr.bf16.mxu1 %v5394_v20 }
 0xab3   : > { %4489 = vmatpush3.bf16.msra.mxu1 %v4863_v44 }
 0xab4   : > { %4490 = vmatprep.subr.bf16.mxu1 %v5394_v20 }
 0xab7   : > { %4491 = vmatpush3.bf16.msra.mxu1 %v4864_v47 }
 0xab8   : > { %4496 = vmatprep.subr.bf16.mxu1 %v5394_v20 }
 0xb18   : > { %v4775_v50 = vpop.permute.xlu0 %4774 }
 0xb19   : > { %v4777_v54 = vunpack.i.h.bf16 %v4775_v50  ;;  %v4776_v55 = vunpack.i.l.bf16 %v4775_v50 }
 0xb1b   : > { %v1950_v58 = vsel %vm1948_vm5, %v1947_v56, %v4777_v54  ;;  %v1949_v59 = vsel %vm1948_vm5, %v1946_v57, %v4776_v55  ;;  %v6055_v57 = vld [vmem:[%s6421_s11] sm:$0x7] }
 0xb1c   : > { %v1951_v60 = vpack.c.bf16 %v1950_v58, %v1949_v59 }
 0xb1e   : > { %4473 = vmatmul.mubr.bf16.vlgmr.msra.gmra.mxu0 %v1951_v60  ;;  %v2092_v60 = vrot.slane %v6055_v57, %v5815_v24 }
 0xb1f   : > { %2356 = vmatprep.mubr.bf16.mxu0 %v5393_v0  ;;  %2325 = vmatpush1.bf16.msra.mxu0 %v4833_v6 }
 0xb20   : > { %2326 = vmatprep.subr.bf16.mxu0 %v4838_v40 }
 0xb23   : > { %2327 = vmatpush1.bf16.msra.mxu0 %v4836_v46 }
 0xb24   : > { %2328 = vmatprep.subr.bf16.mxu0 %v4841_v7 }
 0xb27   : > { %2329 = vmatpush1.bf16.msra.mxu0 %v4839_v8 }
 0xb28   : > { %2330 = vmatprep.subr.bf16.mxu0 %v4844_v9 }
 0xb2b   : > { %2331 = vmatpush1.bf16.msra.mxu0 %v4842_v33 }
 0xb2c   : > { %2332 = vmatprep.subr.bf16.mxu0 %v4847_v38 }
 0xb2f   : > { %2333 = vmatpush1.bf16.msra.mxu0 %v4845_v10 }
 0xb30   : > { %2334 = vmatprep.subr.bf16.mxu0 %v4851_v18  ;;  %v4122_v18 = vld [vmem:[%s6418_s8] ss:$0 sm:$0xff] }
 0xb33   : > { %2335 = vmatpush1.bf16.msra.mxu0 %v4849_v19 }
 0xb34   : > { %2336 = vmatprep.subr.bf16.mxu0 %v4855_v39 }
 0xb37   : > { %2337 = vmatpush1.bf16.msra.mxu0 %v4853_v22 }
 0xb38   : > { %2338 = vmatprep.subr.bf16.mxu0 %v4859_v29 }
 0xb3b   : > { %2339 = vmatpush1.bf16.msra.mxu0 %v4857_v28 }
 0xb3c   : > { %4526 = vmatprep.subr.bf16.mxu0 %v5394_v20 }
 0xb3e   : > { %2357 = vmatmul.mubr.bf16.vlgmr.msra.gmra.mxu0 %v2102_v34 }
 0xb3f   : > { %2366 = vmatprep.mubr.bf16.mxu0 %v5393_v0 }
 0xb46   : > { %2367 = vmatmul.mubr.bf16.gmra.mxu0 %v2103_v42 }
 0xb47   : > { %4528 = vmatprep.mubr.msk.bf16.mxu0 %vm5395_vm0, %v5394_v20 }
 0xbde   : > { %v2057_v45 = vpop.f32.mrf.mxu0 }
 0xbdf   : > { %v2058_v61 = vadd.f32 %v4113_v49, %v2057_v45 }
 0xbe0   : > { %v4474_v62 = vpop.f32.mrf.mxu0 }
 0xbe1   : > { %v2064_v1 = vadd.f32 %v4989_v63, %v2058_v61 }
 0xbe2   : > { %v2060_v52 = vpop.f32.mrf.mxu0 }
 0xbe3   : > { %v2061_v2 = vadd.f32 %v4113_v49, %v2060_v52  ;;  %2066 = vadd.xlane.f32.xlu1 %v2064_v1  ;;  %v6062_v49 = vld [vmem:[%s6422_s12] sm:$0x7] }
 0xbe4   : > { %v4475_v3 = vpop.f32.mrf.mxu0  ;;  %v2098_v63 = vrot.slane %v6062_v49, %v5815_v24 }
 0xbe5   : > { %v2065_v5 = vadd.f32 %v4990_v4, %v2061_v2  ;;  %v2232_v4 = vld [vmem:[%s6418_s8 + $0x1] sm:$0x3] }
 0xbe6   : > { %v2241_v6 = vrot.slane %v2232_v4, %v5812_v23 }
 0xbe7   : > { %2068 = vadd.xlane.f32.xlu0 %v2065_v5 }
 0xbfe   : > { %v2358_v26 = vpop.f32.mrf.mxu0 }
 0xc00   : > { %v2360_v40 = vpop.f32.mrf.mxu0 }
 0xc01   : > { %v2361_v48 = vadd.f32 %v2360_v40, %v2241_v6 }
 0xc02   : > { %v2362_v7 = vpop.f32.mrf.mxu0 }
 0xc04   : > { %v2364_v9 = vpop.f32.mrf.mxu0 }
 0xc05   : > { %v2365_v38 = vadd.f32 %v2364_v9, %v2241_v6 }
 0xc06   : > { %v2368_v10 = vpop.f32.mrf.mxu0 }
 0xc6c   : > { %v2067_v43 = vpop.xlane.xlu1 %2066 }
 0xc6d   : > { %v2071_v11 = vmul.f32 0.0078125, %v2067_v43  ;;  %v6081_v43 = vpack.c.bf16 %v2365_v38, %v2361_v48 }
 0xc6f   : > { %v2073_v21 = vsub.f32 %v2064_v1, %v2071_v11 }
 0xc70   : > { %v2069_v13 = vpop.xlane.xlu0 %2068 }
 0xc71   : > { %v2072_v14 = vmul.f32 0.0078125, %v2069_v13  ;;  %v2075_v15 = vmul.f32 %v2073_v21, %v2073_v21 }
 0xc73   : > { %v2074_v16 = vsub.f32 %v2065_v5, %v2072_v14  ;;  %2077 = vadd.xlane.f32.xlu0 %v2075_v15  ;;  %v2237_v5 = vrot.slane %v2232_v4, %v5815_v24 }
 0xc75   : > { %v2076_v17 = vmul.f32 %v2074_v16, %v2074_v16  ;;  %v2359_v46 = vadd.f32 %v2358_v26, %v2237_v5  ;;  %v2363_v8 = vadd.f32 %v2362_v7, %v2237_v5  ;;  %v2369_v19 = vadd.f32 %v2368_v10, %v2237_v5 }
 0xc77   : > { %2079 = vadd.xlane.f32.xlu0 %v2076_v17  ;;  %v6079_v33 = vpack.c.bf16 %v2363_v8, %v2359_v46 }
 0xc79   : > { %v2389_v11 = vsel %vm1042_vm1, %v6079_v33, 0 }
 0xcfc   : > { %v2078_v50 = vpop.xlane.xlu0 %2077 }
 0xcfd   : > { %v2081_v51 = vmul.f32 0.0078125, %v2078_v50 }
 0xcff   : > { %v2083_v53 = vadd.f32 1e-05, %v2081_v51 }
 0xd00   : > { %v2080_v54 = vpop.xlane.xlu0 %2079 }
 0xd01   : > { %4945 = vrsqrt.f32 %v2083_v53  ;;  %v2082_v55 = vmul.f32 0.0078125, %v2080_v54 }
 0xd03   : > { %v2084_v56 = vadd.f32 1e-05, %v2082_v55 }
 0xd05   : > { %4947 = vrsqrt.f32 %v2084_v56 }
 0xd0e   : > { %v4946_v58 = vpop.eup %4945 }
 0xd0f   : > { %v2087_v59 = vmul.f32 %v4946_v58, %v2073_v21  ;;  %v2370_v21 = vpop.f32.mrf.mxu0 }
 0xd10   : > { %v2371_v13 = vadd.f32 %v2370_v21, %v2241_v6 }
 0xd11   : > { %v2093_v62 = vmul.f32 %v2092_v60, %v2087_v59  ;;  %v2372_v14 = vpop.f32.mrf.mxu0 }
 0xd12   : > { %v4948_v45 = vpop.eup %4947  ;;  %v2373_v27 = vadd.f32 %v2372_v14, %v2237_v5 }
 0xd13   : > { %v2088_v61 = vmul.f32 %v4948_v45, %v2074_v16  ;;  %v6066_v52 = vadd.f32 %v2098_v63, %v2093_v62  ;;  %v2374_v15 = vpop.f32.mrf.mxu0 }
 0xd14   : > { %v2375_v16 = vadd.f32 %v2374_v15, %v2241_v6  ;;  %v6091_v28 = vpack.c.bf16 %v2373_v27, %v2369_v19 }
 0xd15   : > { %v2094_v1 = vmul.f32 %v2092_v60, %v2088_v61 }
 0xd16   : > { %v6086_v17 = vpack.c.bf16 %v2375_v16, %v2371_v13  ;;  %v2435_v35 = vsel %vm1042_vm1, %v6091_v28, 0 }
 0xd17   : > { %v6068_v2 = vadd.f32 %v2098_v63, %v2094_v1 }
 0xd19   : > { %v2101_v3 = vpack.c.bf16 %v6068_v2, %v6066_v52 }
 0xd1b   : > { %4493 = vmatmul.mubr.bf16.vlgmr.msra.gmra.mxu1 %v2101_v3 }
 0xd1c   : > { %4498 = vmatprep.mubr.msk.bf16.mxu1 %vm5395_vm0, %v5394_v20  ;;  %4497 = vmatpush3.bf16.xpose.msra.mxu1 %v2389_v11 }
 0xd1d   : > { %4502 = vmatprep.subr.bf16.mxu1 %v5394_v20 }
 0xddb   : > { %v2209_v39 = vpop.f32.mrf.mxu1 }
 0xddc   : > { %v2210_v22 = vadd.f32 %v4122_v18, %v2209_v39 }
 0xddd   : > { %v4494_v25 = vpop.f32.mrf.mxu1 }
 0xdde   : > { %v2377_v29 = vmul.f32 0.17677669, %v2210_v22 }
 0xddf   : > { %v2212_v30 = vpop.f32.mrf.mxu1 }
 0xde0   : > { %v6093_v31 = vpack.c.bf16 %v2377_v29, %v2377_v29  ;;  %v2213_v32 = vadd.f32 %v4122_v18, %v2212_v30 }
 0xde1   : > { %v4495_v34 = vpop.f32.mrf.mxu1 }
 0xde2   : > { %4499 = vmatmul.mubr.msk.bf16.vlgmr.msra.gmra.mxu1 %vm1042_vm1, %v6093_v31  ;;  %v2378_v36 = vmul.f32 0.17677669, %v2213_v32 }
 0xde3   : > { %4503 = vmatpush3.bf16.xpose.msra.mxu1 %v2435_v35  ;;  %4504 = vmatprep.mubr.msk.bf16.mxu1 %vm5395_vm0, %v5394_v20 }
 0xde4   : > { %4508 = vmatprep.subr.bf16.mxu1 %v5394_v20  ;;  %v6102_v37 = vpack.c.bf16 %v2378_v36, %v2378_v36 }
 0xdea   : > { %4505 = vmatmul.mubr.msk.bf16.vlgmr.msra.gmra.mxu1 %vm1042_vm1, %v6102_v37 }
 0xdeb   : > { %4509 = vmatpush3.bf16.msra.mxu1 %v6081_v43  ;;  %4510 = vmatprep.mubr.msk.bf16.mxu1 %vm5395_vm0, %v5394_v20 }
 0xdec   : > { %4514 = vmatprep.subr.bf16.mxu1 %v5394_v20 }
 0xea2   : > { %v2425_v41 = vpop.f32.mrf.mxu1 }
 0xea3   : > { %v2478_v42 = vsel %vm2477_vm6, %v2425_v41, -inf }
 0xea4   : > { %2479 = vmax.xlane.f32.xlu1 %v2478_v42  ;;  %v4500_v44 = vpop.f32.mrf.mxu1 }
 0xea6   : > { %v2428_v47 = vpop.f32.mrf.mxu1 }
 0xea8   : > { %v4501_v50 = vpop.f32.mrf.mxu1 }
 0xeaa   : > { %v2471_v51 = vpop.f32.mrf.mxu1 }
 0xeab   : > { %v2481_v53 = vsel %vm2477_vm6, %v2471_v51, -inf }
 0xeac   : > { %2482 = vmax.xlane.f32.xlu0 %v2481_v53  ;;  %v4506_v54 = vpop.f32.mrf.mxu1 }
 0xeae   : > { %v2474_v55 = vpop.f32.mrf.mxu1 }
 0xeb0   : > { %v4507_v56 = vpop.f32.mrf.mxu1 }
 0xf2d   : > { %v2480_v58 = vpop.xlane.xlu1 %2479 }
 0xf2e   : > { %v2484_v59 = vsub.f32 %v2425_v41, %v2480_v58 }
 0xf30   : > { %v2486_v60 = vmul.f32 1.442695, %v2484_v59 }
 0xf32   : > { %4949 = vpow2.f32 %v2486_v60 }
 0xf35   : > { %v2483_v45 = vpop.xlane.xlu0 %2482 }
 0xf36   : > { %v2485_v61 = vsub.f32 %v2471_v51, %v2483_v45 }
 0xf38   : > { %v2488_v62 = vmul.f32 1.442695, %v2485_v61 }
 0xf3a   : > { %4951 = vpow2.f32 %v2488_v62 }
 0xf3f   : > { %v4950_v63 = vpop.eup %4949 }
 0xf40   : > { %v2490_v1 = vsel %vm2477_vm6, %v4950_v63, 0.0 }
 0xf41   : > { %2491 = vadd.xlane.f32.xlu1 %v2490_v1 }
 0xf47   : > { %v4952_v3 = vpop.eup %4951 }
 0xf48   : > { %v2493_v4 = vsel %vm2477_vm6, %v4952_v3, 0.0 }
 0xf49   : > { %2494 = vadd.xlane.f32.xlu0 %v2493_v4 }
 0xf52   : > { %2592 = vrot.lane.b32.xlu1 %v6079_v33, %s5396_s3 }
 0xf56   : > { %2589 = vrot.lane.b32.xlu1 %v6093_v31, %s5396_s3 }
 0xf5a   : > { %2641 = vrot.lane.b32.xlu1 %v6102_v37, %s5396_s3 }
 0xf5f   : > { %2644 = vrot.lane.b32.xlu0 %v6091_v28, %s5396_s3 }
 0xfca   : > { %v2492_v5 = vpop.xlane.xlu1 %2491 }
 0xfcb   : > { %4953 = vrcp.f32 %v2492_v5 }
 0xfce   : > { %v2593_v6 = vpop.permute.xlu1 %2592 }
 0xfcf   : > { %v2598_v13 = vsel %vm1042_vm1, %v2593_v6, 0 }
 0xfd2   : > { %v2495_v26 = vpop.xlane.xlu0 %2494  ;;  %v2590_v7 = vpop.permute.xlu1 %2589 }
 0xfd3   : > { %4955 = vrcp.f32 %v2495_v26 }
 0xfd6   : > { %v2645_v40 = vpop.permute.xlu0 %2644  ;;  %v2642_v38 = vpop.permute.xlu1 %2641 }
 0xfd7   : > { %v2650_v46 = vsel %vm1042_vm1, %v2645_v40, 0 }
 0xfd8   : > { %v4954_v48 = vpop.eup %4953  ;;  %4527 = vmatpush3.bf16.xpose.msra.mxu0 %v2650_v46 }
 0xfd9   : > { %v6123_v8 = vmul.f32 %v4954_v48, %v4950_v63  ;;  %4538 = vmatprep.subr.bf16.mxu0 %v5394_v20 }
 0xfdb   : > { %v2500_v9 = vpack.c.bf16 %v6123_v8, %v6123_v8 }
 0xfdd   : > { %4511 = vmatmul.mubr.msk.bf16.vlgmr.msra.gmra.mxu1 %vm2477_vm6, %v2500_v9 }
 0xfde   : > { %4515 = vmatpush3.bf16.msra.mxu1 %v6086_v17  ;;  %4516 = vmatprep.mubr.msk.bf16.mxu1 %vm5395_vm0, %v5394_v20 }
 0xfdf   : > { %4529 = vmatmul.mubr.msk.bf16.vlgmr.msra.gmra.mxu0 %vm1042_vm1, %v2642_v38  ;;  %4520 = vmatprep.subr.bf16.mxu1 %v5394_v20 }
 0xfe0   : > { %v4956_v10 = vpop.eup %4955  ;;  %4540 = vmatprep.mubr.msk.bf16.mxu0 %vm5395_vm0, %v5394_v20 }
 0xfe1   : > { %v6136_v11 = vmul.f32 %v4956_v10, %v4952_v3 }
 0xfe3   : > { %v2501_v21 = vpack.c.bf16 %v6136_v11, %v6136_v11 }
 0xfe5   : > { %4517 = vmatmul.mubr.msk.bf16.vlgmr.msra.gmra.mxu1 %vm2477_vm6, %v2501_v21 }
 0xfe6   : > { %4521 = vmatpush3.bf16.xpose.msra.mxu1 %v2598_v13  ;;  %4522 = vmatprep.mubr.msk.bf16.mxu1 %vm5395_vm0, %v5394_v20 }
 0xfe7   : > { %4532 = vmatprep.subr.bf16.mxu1 %v5394_v20 }
 0xfed   : > { %4523 = vmatmul.mubr.msk.bf16.vlgmr.msra.gmra.mxu1 %vm1042_vm1, %v2590_v7 }
 0xfee   : > { %4534 = vmatprep.mubr.msk.bf16.mxu1 %vm5395_vm0, %v5394_v20 }
0x109d   : > { %v6148_v14 = vpop.f32.mrf.mxu1 }
0x109f   : > { %v4512_v15 = vpop.f32.mrf.mxu1  ;;  %v2686_v16 = vpop.f32.mrf.mxu0 }
0x10a0   : > { %v2695_v18 = vsel %vm2477_vm6, %v2686_v16, -inf }
0x10a1   : > { %2696 = vmax.xlane.f32.xlu0 %v2695_v18  ;;  %v2542_v19 = vpop.f32.mrf.mxu1  ;;  %v4530_v27 = vpop.f32.mrf.mxu0 }
0x10a3   : > { %v4513_v39 = vpop.f32.mrf.mxu1  ;;  %v2689_v22 = vpop.f32.mrf.mxu0 }
0x10a5   : > { %v6151_v25 = vpop.f32.mrf.mxu1  ;;  %v4531_v29 = vpop.f32.mrf.mxu0 }
0x10a7   : > { %v4518_v30 = vpop.f32.mrf.mxu1 }
0x10a9   : > { %v2585_v32 = vpop.f32.mrf.mxu1 }
0x10ab   : > { %v4519_v34 = vpop.f32.mrf.mxu1 }
0x10ad   : > { %v2634_v35 = vpop.f32.mrf.mxu1 }
0x10ae   : > { %v2692_v36 = vsel %vm2477_vm6, %v2634_v35, -inf }
0x10af   : > { %2693 = vmax.xlane.f32.xlu1 %v2692_v36  ;;  %v4524_v41 = vpop.f32.mrf.mxu1 }
0x10b1   : > { %v2637_v42 = vpop.f32.mrf.mxu1 }
0x10b3   : > { %v4525_v44 = vpop.f32.mrf.mxu1 }
0x10c0   : > { %2717 = vrot.lane.b32.xlu1 %v6081_v43, %s5396_s3 }
0x10c4   : > { %2814 = vrot.lane.b32.xlu1 %v6079_v33, %s5397_s24 }
0x10c8   : > { %2864 = vrot.lane.b32.xlu1 %v6091_v28, %s5397_s24 }
0x10cc   : > { %2812 = vrot.lane.b32.xlu1 %v6093_v31, %s5397_s24 }
0x112a   : > { %v2697_v47 = vpop.xlane.xlu0 %2696 }
0x112b   : > { %v2699_v50 = vsub.f32 %v2686_v16, %v2697_v47 }
0x112d   : > { %v2702_v51 = vmul.f32 1.442695, %v2699_v50 }
0x112f   : > { %4957 = vpow2.f32 %v2702_v51 }
0x1138   : > { %v2694_v53 = vpop.xlane.xlu1 %2693 }
0x1139   : > { %v2698_v54 = vsub.f32 %v2634_v35, %v2694_v53 }
0x113b   : > { %v2700_v55 = vmul.f32 1.442695, %v2698_v54 }
0x113c   : > { %v4958_v56 = vpop.eup %4957  ;;  %v2718_v58 = vpop.permute.xlu1 %2717 }
0x113d   : > { %4959 = vpow2.f32 %v2700_v55  ;;  %4533 = vmatpush3.bf16.msra.mxu1 %v2718_v58  ;;  %v2707_v59 = vsel %vm2477_vm6, %v4958_v56, 0.0 }
0x113e   : > { %2708 = vadd.xlane.f32.xlu0 %v2707_v59  ;;  %4544 = vmatprep.subr.bf16.mxu1 %v5394_v20 }
0x1140   : > { %v2815_v62 = vpop.permute.xlu1 %2814 }
0x1141   : > { %v2820_v9 = vsel %vm1042_vm1, %v2815_v62, 0 }
0x1144   : > { %v2865_v5 = vpop.permute.xlu1 %2864 }
0x1145   : > { %v2870_v26 = vsel %vm1042_vm1, %v2865_v5, 0 }
0x1148   : > { %v2813_v38 = vpop.permute.xlu1 %2812 }
0x114a   : > { %v4960_v60 = vpop.eup %4959 }
0x114b   : > { %v2704_v45 = vsel %vm2477_vm6, %v4960_v60, 0.0 }
0x114c   : > { %2705 = vadd.xlane.f32.xlu0 %v2704_v45 }
0x1162   : > { %2764 = vrot.lane.b32.xlu0 %v6086_v17, %s5396_s3 }
0x1166   : > { %2862 = vrot.lane.b32.xlu0 %v6102_v37, %s5397_s24 }
0x11c7   : > { %v2709_v61 = vpop.xlane.xlu0 %2708 }
0x11c8   : > { %4961 = vrcp.f32 %v2709_v61 }
0x11d5   : > { %v4962_v63 = vpop.eup %4961  ;;  %v2706_v1 = vpop.xlane.xlu0 %2705 }
0x11d6   : > { %4963 = vrcp.f32 %v2706_v1  ;;  %v6169_v3 = vmul.f32 %v4962_v63, %v4958_v56 }
0x11d8   : > { %v2715_v6 = vpack.c.bf16 %v6169_v3, %v6169_v3  ;;  %v2811_v62 = vadd.f32 %v6169_v3, %v6136_v11 }
0x11d9   : > { %v2765_v4 = vpop.permute.xlu0 %2764 }
0x11da   : > { %4539 = vmatpush3.bf16.msra.mxu0 %v2765_v4 }
0x11db   : > { %4550 = vmatprep.subr.bf16.mxu0 %v5394_v20 }
0x11dd   : > { %4541 = vmatmul.mubr.msk.bf16.vlgmr.msra.gmra.mxu0 %vm2477_vm6, %v2715_v6  ;;  %v2863_v46 = vpop.permute.xlu0 %2862 }
0x11de   : > { %4551 = vmatpush3.bf16.xpose.msra.mxu0 %v2870_v26  ;;  %4552 = vmatprep.mubr.msk.bf16.mxu0 %vm5395_vm0, %v5394_v20 }
0x11df   : > { %4562 = vmatprep.subr.bf16.mxu0 %v5394_v20 }
0x11e3   : > { %v4964_v40 = vpop.eup %4963 }
0x11e4   : > { %v6179_v48 = vmul.f32 %v4964_v40, %v4960_v60 }
0x11e5   : > { %4553 = vmatmul.mubr.msk.bf16.vlgmr.msra.gmra.mxu0 %vm1042_vm1, %v2863_v46 }
0x11e6   : > { %v2714_v7 = vpack.c.bf16 %v6179_v48, %v6179_v48  ;;  %4564 = vmatprep.mubr.msk.bf16.mxu0 %vm5395_vm0, %v5394_v20  ;;  %v2810_v3 = vadd.f32 %v6179_v48, %v6123_v8 }
0x11e8   : > { %4535 = vmatmul.mubr.msk.bf16.vlgmr.msra.gmra.mxu1 %vm2477_vm6, %v2714_v7 }
0x11e9   : > { %4545 = vmatpush3.bf16.xpose.msra.mxu1 %v2820_v9  ;;  %4546 = vmatprep.mubr.msk.bf16.mxu1 %vm5395_vm0, %v5394_v20 }
0x11ea   : > { %4556 = vmatprep.subr.bf16.mxu1 %v5394_v20 }
0x11f0   : > { %4547 = vmatmul.mubr.msk.bf16.vlgmr.msra.gmra.mxu1 %vm1042_vm1, %v2813_v38 }
0x11f1   : > { %4558 = vmatprep.mubr.msk.bf16.mxu1 %vm5395_vm0, %v5394_v20 }
0x129d   : > { %v6194_v10 = vpop.f32.mrf.mxu0 }
0x129f   : > { %v4542_v21 = vpop.f32.mrf.mxu0 }
0x12a1   : > { %v2807_v13 = vpop.f32.mrf.mxu0 }
0x12a3   : > { %v4543_v15 = vpop.f32.mrf.mxu0 }
0x12a5   : > { %v2906_v16 = vpop.f32.mrf.mxu0 }
0x12a6   : > { %v2915_v18 = vsel %vm2477_vm6, %v2906_v16, -inf }
0x12a7   : > { %2916 = vmax.xlane.f32.xlu0 %v2915_v18  ;;  %v4554_v19 = vpop.f32.mrf.mxu0 }
0x12a8   : > { %v6197_v27 = vpop.f32.mrf.mxu1 }
0x12a9   : > { %v4778_v39 = vpack.i.bf16 %v6194_v10, %v6197_v27  ;;  %v2909_v22 = vpop.f32.mrf.mxu0 }
0x12aa   : > { %v4536_v29 = vpop.f32.mrf.mxu1 }
0x12ab   : > { %v4555_v30 = vpop.f32.mrf.mxu0 }
0x12ac   : > { %v2760_v32 = vpop.f32.mrf.mxu1 }
0x12ae   : > { %v4537_v34 = vpop.f32.mrf.mxu1 }
0x12b0   : > { %v2856_v35 = vpop.f32.mrf.mxu1 }
0x12b1   : > { %v2912_v36 = vsel %vm2477_vm6, %v2856_v35, -inf }
0x12b2   : > { %2913 = vmax.xlane.f32.xlu1 %v2912_v36  ;;  %v4548_v41 = vpop.f32.mrf.mxu1 }
0x12b4   : > { %v2859_v42 = vpop.f32.mrf.mxu1 }
0x12b6   : > { %v4549_v44 = vpop.f32.mrf.mxu1 }
0x12c3   : > { %2936 = vrot.lane.b32.xlu1 %v6081_v43, %s5397_s24 }
0x12c7   : > { %3032 = vrot.lane.b32.xlu1 %v6079_v33, %s5398_s5 }
0x12cb   : > { %3082 = vrot.lane.b32.xlu1 %v6091_v28, %s5398_s5 }
0x12cf   : > { %3030 = vrot.lane.b32.xlu1 %v6093_v31, %s5398_s5 }
0x1330   : > { %v2917_v47 = vpop.xlane.xlu0 %2916 }
0x1331   : > { %v2919_v50 = vsub.f32 %v2906_v16, %v2917_v47 }
0x1333   : > { %v2922_v51 = vmul.f32 1.442695, %v2919_v50 }
0x1335   : > { %4965 = vpow2.f32 %v2922_v51 }
0x133b   : > { %v2914_v53 = vpop.xlane.xlu1 %2913 }
0x133c   : > { %v2918_v54 = vsub.f32 %v2856_v35, %v2914_v53 }
0x133e   : > { %v2920_v55 = vmul.f32 1.442695, %v2918_v54 }
0x133f   : > { %v2937_v56 = vpop.permute.xlu1 %2936 }
0x1340   : > { %4967 = vpow2.f32 %v2920_v55  ;;  %4557 = vmatpush3.bf16.msra.mxu1 %v2937_v56 }
0x1341   : > { %4568 = vmatprep.subr.bf16.mxu1 %v5394_v20 }
0x1342   : > { %v4966_v58 = vpop.eup %4965 }
0x1343   : > { %v2927_v33 = vsel %vm2477_vm6, %v4966_v58, 0.0  ;;  %v3033_v60 = vpop.permute.xlu1 %3032 }
0x1344   : > { %2928 = vadd.xlane.f32.xlu0 %v2927_v33  ;;  %v3038_v9 = vsel %vm1042_vm1, %v3033_v60, 0 }
0x1347   : > { %v3083_v4 = vpop.permute.xlu1 %3082 }
0x134b   : > { %v3031_v8 = vpop.permute.xlu1 %3030 }
0x134d   : > { %v4968_v28 = vpop.eup %4967 }
0x134e   : > { %v2924_v59 = vsel %vm2477_vm6, %v4968_v28, 0.0 }
0x134f   : > { %2925 = vadd.xlane.f32.xlu0 %v2924_v59 }
0x1365   : > { %2982 = vrot.lane.b32.xlu0 %v6086_v17, %s5397_s24 }
0x1369   : > { %3080 = vrot.lane.b32.xlu0 %v6102_v37, %s5398_s5  ;;  %v3088_v37 = vsel %vm1042_vm1, %v3083_v4, 0 }
0x13cd   : > { %v2929_v31 = vpop.xlane.xlu0 %2928 }
0x13ce   : > { %4969 = vrcp.f32 %v2929_v31 }
0x13d8   : > { %v2926_v45 = vpop.xlane.xlu0 %2925 }
0x13d9   : > { %4971 = vrcp.f32 %v2926_v45 }
0x13db   : > { %v4970_v61 = vpop.eup %4969 }
0x13dc   : > { %v2983_v63 = vpop.permute.xlu0 %2982  ;;  %v2933_v1 = vmul.f32 %v4970_v61, %v4966_v58 }
0x13dd   : > { %4563 = vmatpush3.bf16.msra.mxu0 %v2983_v63 }
0x13de   : > { %v2935_v5 = vpack.c.bf16 %v2933_v1, %v2933_v1  ;;  %v6219_v6 = vadd.f32 %v2933_v1, %v2811_v62  ;;  %4574 = vmatprep.subr.bf16.mxu0 %v5394_v20 }
0x13e0   : > { %4565 = vmatmul.mubr.msk.bf16.vlgmr.msra.gmra.mxu0 %vm2477_vm6, %v2935_v5  ;;  %v3081_v26 = vpop.permute.xlu0 %3080 }
0x13e1   : > { %4575 = vmatpush3.bf16.xpose.msra.mxu0 %v3088_v37  ;;  %4576 = vmatprep.mubr.msk.bf16.mxu0 %vm5395_vm0, %v5394_v20  ;;  %v4867_v37 = vld [vmem:[#allocation14 + $0x28] sm:$0xff]  }
0x13e2   : > { %4586 = vmatprep.subr.bf16.mxu0 %v5394_v20 }
0x13e6   : > { %v4972_v11 = vpop.eup %4971 }
0x13e7   : > { %v2932_v40 = vmul.f32 %v4972_v11, %v4968_v28  ;;  %v4868_v11 = vld [vmem:[#allocation14 + $0x20] sm:$0xff]  }
0x13e8   : > { %4577 = vmatmul.mubr.msk.bf16.vlgmr.msra.gmra.mxu0 %vm1042_vm1, %v3081_v26  ;;  %v4870_v26 = vld [vmem:[#allocation14 + $0x10] sm:$0xff]  }
0x13e9   : > { %v2934_v46 = vpack.c.bf16 %v2932_v40, %v2932_v40  ;;  %v6230_v7 = vadd.f32 %v2932_v40, %v2810_v3  ;;  %4588 = vmatprep.mubr.msk.bf16.mxu0 %vm5395_vm0, %v5394_v20  ;;  %v4869_v3 = vld [vmem:[#allocation14 + $0x18] sm:$0xff]   ;;  %v4871_v40 = vld [vmem:[#allocation14 + $0x8] sm:$0xff]  }
0x13eb   : > { %4559 = vmatmul.mubr.msk.bf16.vlgmr.msra.gmra.mxu1 %vm2477_vm6, %v2934_v46 }
0x13ec   : > { %4569 = vmatpush3.bf16.xpose.msra.mxu1 %v3038_v9  ;;  %4570 = vmatprep.mubr.msk.bf16.mxu1 %vm5395_vm0, %v5394_v20  ;;  %v4872_v9 = vld [vmem:[#allocation14] sm:$0xff]  }
0x13ed   : > { %4580 = vmatprep.subr.bf16.mxu1 %v5394_v20 }
0x13f3   : > { %4571 = vmatmul.mubr.msk.bf16.vlgmr.msra.gmra.mxu1 %vm1042_vm1, %v3031_v8 }
0x13f4   : > { %4582 = vmatprep.mubr.msk.bf16.mxu1 %vm5395_vm0, %v5394_v20 }
0x14a0   : > { %v3022_v48 = vpop.f32.mrf.mxu0 }
0x14a2   : > { %v4566_v38 = vpop.f32.mrf.mxu0 }
0x14a4   : > { %v3025_v21 = vpop.f32.mrf.mxu0 }
0x14a6   : > { %v4567_v13 = vpop.f32.mrf.mxu0 }
0x14a8   : > { %v3124_v15 = vpop.f32.mrf.mxu0 }
0x14a9   : > { %v3133_v16 = vsel %vm2477_vm6, %v3124_v15, -inf }
0x14aa   : > { %3134 = vmax.xlane.f32.xlu0 %v3133_v16  ;;  %v4578_v18 = vpop.f32.mrf.mxu0 }
0x14ab   : > { %v2976_v19 = vpop.f32.mrf.mxu1 }
0x14ac   : > { %v3127_v22 = vpop.f32.mrf.mxu0  ;;  %v4783_v47 = vpack.i.bf16 %v3022_v48, %v2976_v19 }
0x14ad   : > { %v4560_v29 = vpop.f32.mrf.mxu1 }
0x14ae   : > { %v4579_v30 = vpop.f32.mrf.mxu0 }
0x14af   : > { %v2979_v32 = vpop.f32.mrf.mxu1 }
0x14b1   : > { %v4561_v34 = vpop.f32.mrf.mxu1 }
0x14b3   : > { %v3074_v35 = vpop.f32.mrf.mxu1 }
0x14b4   : > { %v3130_v36 = vsel %vm2477_vm6, %v3074_v35, -inf }
0x14b5   : > { %3131 = vmax.xlane.f32.xlu1 %v3130_v36  ;;  %v4572_v41 = vpop.f32.mrf.mxu1 }
0x14b7   : > { %v3077_v42 = vpop.f32.mrf.mxu1 }
0x14b9   : > { %v4573_v44 = vpop.f32.mrf.mxu1 }
0x14c6   : > { %3154 = vrot.lane.b32.xlu1 %v6081_v43, %s5398_s5 }
0x14ca   : > { %4779 = vrot.lane.b32.xlu1 %v4778_v39, %s5398_s5 }
0x14ce   : > { %4784 = vrot.lane.b32.xlu1 %v4783_v47, %s5397_s24 }
0x1533   : > { %v3135_v50 = vpop.xlane.xlu0 %3134 }
0x1534   : > { %v3137_v51 = vsub.f32 %v3124_v15, %v3135_v50 }
0x1536   : > { %v3140_v53 = vmul.f32 1.442695, %v3137_v51 }
0x1538   : > { %4973 = vpow2.f32 %v3140_v53  ;;  %v4163_v53 = vld [vmem:[%s6420_s10] ss:$0 sm:$0xff] }
0x153e   : > { %v3132_v54 = vpop.xlane.xlu1 %3131 }
0x153f   : > { %v3136_v55 = vsub.f32 %v3074_v35, %v3132_v54 }
0x1541   : > { %v3138_v56 = vmul.f32 1.442695, %v3136_v55 }
0x1542   : > { %v3155_v58 = vpop.permute.xlu1 %3154 }
0x1543   : > { %4975 = vpow2.f32 %v3138_v56  ;;  %4581 = vmatpush3.bf16.msra.mxu1 %v3155_v58 }
0x1544   : > { %4592 = vmatprep.subr.bf16.mxu1 %v5394_v20 }
0x1545   : > { %v4974_v43 = vpop.eup %4973 }
0x1546   : > { %v3145_v33 = vsel %vm2477_vm6, %v4974_v43, 0.0  ;;  %v4780_v18 = vpop.permute.xlu1 %4779 }
0x1547   : > { %3146 = vadd.xlane.f32.xlu0 %v3145_v33  ;;  %v4782_v22 = vunpack.i.h.bf16 %v4780_v18  ;;  %v4781_v29 = vunpack.i.l.bf16 %v4780_v18 }
0x1549   : > { %v3273_v34 = vsel %vm1042_vm1, %v6151_v25, %v4782_v22  ;;  %v3272_v35 = vsel %vm1042_vm1, %v6148_v14, %v4781_v29 }
0x154a   : > { %v4785_v19 = vpop.permute.xlu1 %4784 }
0x154b   : > { %v4787_v30 = vunpack.i.h.bf16 %v4785_v19  ;;  %v4786_v32 = vunpack.i.l.bf16 %v4785_v19 }
0x154d   : > { %v3274_v42 = vsel %vm1945_vm4, %v3272_v35, %v4786_v32  ;;  %v3275_v44 = vsel %vm1945_vm4, %v3273_v34, %v4787_v30  ;;  %v3420_v35 = vrot.slane %v6055_v57, %v5812_v23  ;;  %v4911_v57 = vld [vmem:[#allocation17 + $0x40] sm:$0xff]  }
0x1550   : > { %v4976_v10 = vpop.eup %4975 }
0x1551   : > { %v3142_v27 = vsel %vm2477_vm6, %v4976_v10, 0.0 }
0x1552   : > { %3143 = vadd.xlane.f32.xlu0 %v3142_v27  ;;  %v4875_v27 = vld [vmem:[#allocation16 + $0x74] ss:$8 sps:$4 sm:$0xff]  }
0x1568   : > { %3200 = vrot.lane.b32.xlu0 %v6086_v17, %s5398_s5 }
0x15d0   : > { %v3147_v39 = vpop.xlane.xlu0 %3146 }
0x15d1   : > { %4977 = vrcp.f32 %v3147_v39 }
0x15db   : > { %v3144_v28 = vpop.xlane.xlu0 %3143 }
0x15dc   : > { %4979 = vrcp.f32 %v3144_v28 }
0x15de   : > { %v4978_v59 = vpop.eup %4977 }
0x15df   : > { %v3201_v31 = vpop.permute.xlu0 %3200  ;;  %v3151_v60 = vmul.f32 %v4978_v59, %v4974_v43 }
0x15e0   : > { %4587 = vmatpush3.bf16.msra.mxu0 %v3201_v31 }
0x15e1   : > { %v3153_v45 = vpack.c.bf16 %v3151_v60, %v3151_v60  ;;  %v3247_v61 = vadd.f32 %v3151_v60, %v6219_v6  ;;  %v4866_v6 = vld [vmem:[#allocation14 + $0x30] sm:$0xff]   ;;  %3538 = vmatprep.subr.bf16.mxu0 %v4875_v27 }
0x15e3   : > { %4589 = vmatmul.mubr.msk.bf16.vlgmr.msra.gmra.mxu0 %vm2477_vm6, %v3153_v45  ;;  %v3279_v62 = vmul.f32 0.25, %v3247_v61  ;;  %v4878_v61 = vld [vmem:[#allocation16 + $0x64] ss:$8 sps:$4 sm:$0xff]  }
0x15e4   : > { %3570 = vmatprep.mubr.bf16.mxu0 %v5393_v0  ;;  %v4865_v0 = vld [vmem:[#allocation14 + $0x38] sm:$0xff]  }
0x15e5   : > { %3802 = vst.msk [vmem:[%s6260_s29 + $0x8] sm:$0xff] %vm2477_vm6, %v3279_v62  ;;  %v4876_v62 = vld [vmem:[#allocation16 + $0x60] ss:$8 sps:$4 sm:$0xff]  }
0x15e9   : > { %v4980_v17 = vpop.eup %4979 }
0x15ea   : > { %v3150_v63 = vmul.f32 %v4980_v17, %v4976_v10  ;;  %v4873_v10 = vld [vmem:[#allocation16 + $0x70] ss:$8 sps:$4 sm:$0xff]   ;;  %v4881_v17 = vld [vmem:[#allocation16 + $0x54] ss:$8 sps:$4 sm:$0xff]  }
0x15eb   : > { %3539 = vmatpush1.bf16.msra.mxu0 %v4873_v10 }
0x15ec   : > { %v3152_v1 = vpack.c.bf16 %v3150_v63, %v3150_v63  ;;  %v3246_v4 = vadd.f32 %v3150_v63, %v6230_v7  ;;  %3540 = vmatprep.subr.bf16.mxu0 %v4878_v61  ;;  %v4879_v63 = vld [vmem:[#allocation16 + $0x50] ss:$8 sps:$4 sm:$0xff]  }
0x15ee   : > { %4583 = vmatmul.mubr.msk.bf16.vlgmr.msra.gmra.mxu1 %vm2477_vm6, %v3152_v1  ;;  %v3278_v5 = vmul.f32 0.25, %v3246_v4  ;;  %v4882_v1 = vld [vmem:[#allocation16 + $0x40] ss:$8 sps:$4 sm:$0xff]   ;;  %v4884_v4 = vld [vmem:[#allocation16 + $0x44] ss:$8 sps:$4 sm:$0xff]  }
0x15ef   : > { %4608 = vmatprep.mubr.msk.bf16.mxu1 %vm5395_vm0, %v5394_v20  ;;  %4593 = vmatpush3.bf16.msra.mxu1 %v4865_v0  ;;  %v4885_v0 = vld [vmem:[#allocation16 + $0x30] ss:$8 sps:$4 sm:$0xff]  }
0x15f0   : > { %3801 = vst.msk [vmem:[%s6260_s29] sm:$0xff] %vm2477_vm6, %v3278_v5  ;;  %4594 = vmatprep.subr.bf16.mxu1 %v5394_v20  ;;  %3541 = vmatpush1.bf16.msra.mxu0 %v4876_v62  ;;  %v4887_v5 = vld [vmem:[#allocation16 + $0x34] ss:$8 sps:$4 sm:$0xff]  }
0x15f1   : > { %3542 = vmatprep.subr.bf16.mxu0 %v4881_v17 }
0x15f3   : > { %4595 = vmatpush3.bf16.msra.mxu1 %v4866_v6  ;;  %v4890_v6 = vld [vmem:[#allocation16 + $0x24] ss:$8 sps:$4 sm:$0xff]  }
0x15f4   : > { %4596 = vmatprep.subr.bf16.mxu1 %v5394_v20  ;;  %3543 = vmatpush1.bf16.msra.mxu0 %v4879_v63 }
0x15f5   : > { %3544 = vmatprep.subr.bf16.mxu0 %v4884_v4 }
0x15f7   : > { %4597 = vmatpush3.bf16.msra.mxu1 %v4867_v37  ;;  %v4888_v37 = vld [vmem:[#allocation16 + $0x20] ss:$8 sps:$4 sm:$0xff]  }
0x15f8   : > { %4598 = vmatprep.subr.bf16.mxu1 %v5394_v20  ;;  %3545 = vmatpush1.bf16.msra.mxu0 %v4882_v1 }
0x15f9   : > { %3546 = vmatprep.subr.bf16.mxu0 %v4887_v5 }
0x15fb   : > { %4599 = vmatpush3.bf16.msra.mxu1 %v4868_v11  ;;  %v4893_v11 = vld [vmem:[#allocation16 + $0x14] ss:$8 sps:$4 sm:$0xff]  }
0x15fc   : > { %4600 = vmatprep.subr.bf16.mxu1 %v5394_v20  ;;  %3547 = vmatpush1.bf16.msra.mxu0 %v4885_v0 }
0x15fd   : > { %3548 = vmatprep.subr.bf16.mxu0 %v4890_v6 }
0x15ff   : > { %4601 = vmatpush3.bf16.msra.mxu1 %v4869_v3  ;;  %v4891_v3 = vld [vmem:[#allocation16 + $0x10] ss:$8 sps:$4 sm:$0xff]  }
0x1600   : > { %4602 = vmatprep.subr.bf16.mxu1 %v5394_v20  ;;  %3549 = vmatpush1.bf16.msra.mxu0 %v4888_v37 }
0x1601   : > { %3550 = vmatprep.subr.bf16.mxu0 %v4893_v11 }
0x1603   : > { %4603 = vmatpush3.bf16.msra.mxu1 %v4870_v26  ;;  %v4896_v26 = vld [vmem:[#allocation16 + $0x4] ss:$8 sps:$4 sm:$0xff]  }
0x1604   : > { %4604 = vmatprep.subr.bf16.mxu1 %v5394_v20  ;;  %3551 = vmatpush1.bf16.msra.mxu0 %v4891_v3 }
0x1605   : > { %3552 = vmatprep.subr.bf16.mxu0 %v4896_v26 }
0x1607   : > { %4605 = vmatpush3.bf16.msra.mxu1 %v4871_v40  ;;  %v4894_v40 = vld [vmem:[#allocation16] ss:$8 sps:$4 sm:$0xff]  }
0x1608   : > { %4606 = vmatprep.subr.bf16.mxu1 %v5394_v20  ;;  %3553 = vmatpush1.bf16.msra.mxu0 %v4894_v40 }
0x160b   : > { %4607 = vmatpush3.bf16.msra.mxu1 %v4872_v9  ;;  %v4899_v9 = vld [vmem:[#allocation17 + $0x70] sm:$0xff]  }
0x16a3   : > { %v3240_v46 = vpop.f32.mrf.mxu0 }
0x16a5   : > { %v4590_v7 = vpop.f32.mrf.mxu0 }
0x16a6   : > { %v4898_v7 = vld [vmem:[#allocation17 + $0x38] sm:$0xff]  }
0x16a7   : > { %v3243_v8 = vpop.f32.mrf.mxu0 }
0x16a8   : > { %v4900_v8 = vld [vmem:[#allocation17 + $0x30] sm:$0xff]  }
0x16a9   : > { %v4591_v48 = vpop.f32.mrf.mxu0 }
0x16aa   : > { %v4901_v48 = vld [vmem:[#allocation17 + $0x68] sm:$0xff]  }
0x16ae   : > { %v3194_v38 = vpop.f32.mrf.mxu1 }
0x16af   : > { %v4788_v21 = vpack.i.bf16 %v3240_v46, %v3194_v38  ;;  %v4897_v46 = vld [vmem:[#allocation17 + $0x78] sm:$0xff]   ;;  %v4902_v38 = vld [vmem:[#allocation17 + $0x28] sm:$0xff]  }
0x16b0   : > { %v4584_v13 = vpop.f32.mrf.mxu1  ;;  %4318 = vmatprep.subr.bf16.mxu1 %v4897_v46 }
0x16b1   : > { %4789 = vrot.lane.b32.xlu1 %v4788_v21, %s5396_s3  ;;  %v4903_v21 = vld [vmem:[#allocation17 + $0x60] sm:$0xff]  }
0x16b2   : > { %v3197_v15 = vpop.f32.mrf.mxu1  ;;  %v4904_v13 = vld [vmem:[#allocation17 + $0x20] sm:$0xff]  }
0x16b3   : > { %v4905_v15 = vld [vmem:[#allocation17 + $0x58] sm:$0xff]  }
0x16b4   : > { %v4585_v16 = vpop.f32.mrf.mxu1 }
0x16b5   : > { %v4906_v16 = vld [vmem:[#allocation17 + $0x18] sm:$0xff]  }
0x1723   : > { %v4790_v20 = vpop.permute.xlu1 %4789 }
0x1724   : > { %v4792_v36 = vunpack.i.h.bf16 %v4790_v20  ;;  %v4791_v41 = vunpack.i.l.bf16 %v4790_v20 }
0x1726   : > { %v3277_v47 = vsel %vm1948_vm5, %v3275_v44, %v4792_v36  ;;  %v3276_v50 = vsel %vm1948_vm5, %v3274_v42, %v4791_v41  ;;  %v3426_v44 = vrot.slane %v6062_v49, %v5812_v23  ;;  %v3446_v49 = vld [vmem:[%s6424_s14] sm:$0x3] }
0x1727   : > { %v3280_v51 = vpack.c.bf16 %v3277_v47, %v3276_v50 }
0x1729   : > { %4609 = vmatmul.mubr.bf16.vlgmr.msra.gmra.mxu1 %v3280_v51 }
0x172a   : > { %4319 = vmatpush3.bf16.msra.mxu1 %v4898_v7 }
0x172b   : > { %4320 = vmatprep.subr.bf16.mxu1 %v4899_v9 }
0x172e   : > { %4321 = vmatpush3.bf16.msra.mxu1 %v4900_v8 }
0x172f   : > { %4322 = vmatprep.subr.bf16.mxu1 %v4901_v48 }
0x1732   : > { %4323 = vmatpush3.bf16.msra.mxu1 %v4902_v38 }
0x1733   : > { %4324 = vmatprep.subr.bf16.mxu1 %v4903_v21 }
0x1736   : > { %4325 = vmatpush3.bf16.msra.mxu1 %v4904_v13 }
0x1737   : > { %4326 = vmatprep.subr.bf16.mxu1 %v4905_v15 }
0x173a   : > { %4327 = vmatpush3.bf16.msra.mxu1 %v4906_v16 }
0x17e9   : > { %v3386_v25 = vpop.f32.mrf.mxu1 }
0x17ea   : > { %v3387_v54 = vadd.f32 %v4163_v53, %v3386_v25  ;;  %v4907_v25 = vld [vmem:[#allocation17 + $0x50] sm:$0xff]  }
0x17eb   : > { %v4610_v55 = vpop.f32.mrf.mxu1  ;;  %4328 = vmatprep.subr.bf16.mxu1 %v4907_v25 }
0x17ec   : > { %v3393_v14 = vadd.f32 %v3387_v54, %v6066_v52  ;;  %v4908_v54 = vld [vmem:[#allocation17 + $0x10] sm:$0xff]   ;;  %v4909_v55 = vld [vmem:[#allocation17 + $0x48] sm:$0xff]  }
0x17ed   : > { %v3389_v56 = vpop.f32.mrf.mxu1  ;;  %4329 = vmatpush3.bf16.msra.mxu1 %v4908_v54 }
0x17ee   : > { %v3390_v58 = vadd.f32 %v4163_v53, %v3389_v56  ;;  %3395 = vadd.xlane.f32.xlu0 %v3393_v14  ;;  %4330 = vmatprep.subr.bf16.mxu1 %v4909_v55  ;;  %v4912_v56 = vld [vmem:[#allocation17] sm:$0xff]  }
0x17ef   : > { %v4611_v43 = vpop.f32.mrf.mxu1 }
0x17f0   : > { %v3394_v33 = vadd.f32 %v3390_v58, %v6068_v2  ;;  %v3455_v43 = vrot.slane %v3446_v49, %v5812_v23  ;;  %v4188_v23 = vld [vmem:[%s6426_s16] ss:$0 sm:$0xff] }
0x17f2   : > { %3397 = vadd.xlane.f32.xlu1 %v3394_v33 }
0x1877   : > { %v3396_v39 = vpop.xlane.xlu0 %3395 }
0x1878   : > { %v3399_v28 = vmul.f32 0.0078125, %v3396_v39 }
0x187a   : > { %v6291_v59 = vsub.f32 %v3393_v14, %v3399_v28  ;;  %v4910_v14 = vld [vmem:[#allocation17 + $0x8] sm:$0xff]  }
0x187b   : > { %v3398_v31 = vpop.xlane.xlu1 %3397  ;;  %4331 = vmatpush3.bf16.msra.mxu1 %v4910_v14 }
0x187c   : > { %v3400_v60 = vmul.f32 0.0078125, %v3398_v31  ;;  %v3403_v52 = vmul.f32 %v6291_v59, %v6291_v59  ;;  %4332 = vmatprep.subr.bf16.mxu1 %v4911_v57 }
0x187e   : > { %v6295_v45 = vsub.f32 %v3394_v33, %v3400_v60  ;;  %3405 = vadd.xlane.f32.xlu0 %v3403_v52  ;;  %v3451_v33 = vrot.slane %v3446_v49, %v5815_v24 }
0x187f   : > { %4333 = vmatpush3.bf16.msra.mxu1 %v4912_v56 }
0x1880   : > { %v3404_v2 = vmul.f32 %v6295_v45, %v6295_v45 }
0x1882   : > { %3407 = vadd.xlane.f32.xlu0 %v3404_v2 }
0x1907   : > { %v3406_v18 = vpop.xlane.xlu0 %3405 }
0x1908   : > { %v3409_v19 = vmul.f32 0.0078125, %v3406_v18 }
0x190a   : > { %v3411_v22 = vadd.f32 1e-05, %v3409_v19 }
0x190b   : > { %v3408_v29 = vpop.xlane.xlu0 %3407 }
0x190c   : > { %4981 = vrsqrt.f32 %v3411_v22  ;;  %v3410_v30 = vmul.f32 0.0078125, %v3408_v29 }
0x190e   : > { %v3412_v32 = vadd.f32 1e-05, %v3410_v30 }
0x1910   : > { %4983 = vrsqrt.f32 %v3412_v32 }
0x1919   : > { %v4982_v20 = vpop.eup %4981 }
0x191a   : > { %v3415_v34 = vmul.f32 %v4982_v20, %v6291_v59 }
0x191c   : > { %v3421_v42 = vmul.f32 %v3420_v35, %v3415_v34 }
0x191d   : > { %v4984_v36 = vpop.eup %4983 }
0x191e   : > { %v3416_v41 = vmul.f32 %v4984_v36, %v6295_v45  ;;  %v3427_v50 = vadd.f32 %v3426_v44, %v3421_v42 }
0x1920   : > { %v3422_v47 = vmul.f32 %v3420_v35, %v3416_v41 }
0x1922   : > { %v3428_v51 = vadd.f32 %v3426_v44, %v3422_v47 }
0x1924   : > { %v3429_v53 = vpack.c.bf16 %v3428_v51, %v3427_v50 }
0x1926   : > { %3571 = vmatmul.mubr.bf16.vlgmr.msra.gmra.mxu0 %v3429_v53 }
0x19e6   : > { %v3572_v58 = vpop.f32.mrf.mxu0 }
0x19e7   : > { %v3573_v59 = vadd.f32 %v3572_v58, %v3451_v33 }
0x19e8   : > { %v3574_v10 = vpop.f32.mrf.mxu0 }
0x19e9   : > { %v3575_v39 = vadd.f32 %v3574_v10, %v3455_v43  ;;  %v3581_v61 = vmax.f32 %v3573_v59, 0.0 }
0x19ea   : > { %v3576_v27 = vpop.f32.mrf.mxu0 }
0x19eb   : > { %v3577_v28 = vadd.f32 %v3576_v27, %v3451_v33  ;;  %v3582_v45 = vmax.f32 %v3575_v39, 0.0 }
0x19ec   : > { %v3578_v31 = vpop.f32.mrf.mxu0 }
0x19ed   : > { %v3579_v60 = vadd.f32 %v3578_v31, %v3455_v43  ;;  %v3583_v52 = vmax.f32 %v3577_v28, 0.0 }
0x19ef   : > { %v3584_v2 = vmax.f32 %v3579_v60, 0.0  ;;  %v3585_v17 = vpack.c.bf16 %v3583_v52, %v3581_v61 }
0x19f1   : > { %v3586_v62 = vpack.c.bf16 %v3584_v2, %v3582_v45 }
0x19f3   : > { %3754 = vmatprep.mubr.bf16.mxu1 %v3586_v62 }
0x19f4   : > { %3755 = vmatmul.mubr.bf16.vlgmr.msra.gmra.mxu1 %v3585_v17 }
0x1ab4   : > { %v4334_v63 = vpop.f32.mrf.mxu1 }
0x1ab6   : > { %v4335_v24 = vpop.f32.mrf.mxu1 }
0x1ab7   : > { %v4336_v1 = vadd.f32 %v4335_v24, %v4334_v63 }
0x1ab8   : > { %v4337_v4 = vpop.f32.mrf.mxu1 }
0x1ab9   : > { %v3757_v5 = vadd.f32 %v4336_v1, %v4188_v23 }
0x1aba   : > { %v4338_v0 = vpop.f32.mrf.mxu1 }
0x1abb   : > { %v4339_v6 = vadd.f32 %v4338_v0, %v4337_v4  ;;  %v3763_v37 = vadd.f32 %v3757_v5, %v3427_v50 }
0x1abd   : > { %v3760_v11 = vadd.f32 %v4339_v6, %v4188_v23  ;;  %3765 = vadd.xlane.f32.xlu0 %v3763_v37 }
0x1abf   : > { %v3764_v3 = vadd.f32 %v3760_v11, %v3428_v51 }
0x1ac1   : > { %3767 = vadd.xlane.f32.xlu1 %v3764_v3 }
0x1b46   : > { %v3766_v26 = vpop.xlane.xlu0 %3765 }
0x1b47   : > { %v3769_v40 = vmul.f32 0.0078125, %v3766_v26 }
0x1b49   : > { %v3771_v46 = vsub.f32 %v3763_v37, %v3769_v40 }
0x1b4a   : > { %v3768_v7 = vpop.xlane.xlu1 %3767 }
0x1b4b   : > { %v3770_v9 = vmul.f32 0.0078125, %v3768_v7  ;;  %v3773_v8 = vmul.f32 %v3771_v46, %v3771_v46 }
0x1b4d   : > { %v3772_v48 = vsub.f32 %v3764_v3, %v3770_v9  ;;  %3775 = vadd.xlane.f32.xlu0 %v3773_v8 }
0x1b4f   : > { %v3774_v38 = vmul.f32 %v3772_v48, %v3772_v48 }
0x1b51   : > { %3777 = vadd.xlane.f32.xlu1 %v3774_v38 }
0x1b52   : > { %5270 = shalt.err (!%p5267_p11)
}
0x1b53   : > { %s5271_s29 = scalar_lea.hbm %s6319_s4, 256  ;;  %s5275_s3 = scalar_lea.hbm %s6504_s22, 512 }
0x1b54   : > { %p5272_p0 = scmp.ne.s32.totalorder %s6319_s4, %s5271_s29  ;;  %p5276_p9 = scmp.lt.s32.totalorder %s6319_s4, %s6504_s22 }
0x1b55   : > { %p5277_p12 = scmp.lt.s32.totalorder %s5275_s3, %s5271_s29 }
0x1b56   : > { %p5273_p2 = pnand %p5272_p0, %p6505_p4 }
0x1b57   : > { %p5278_p13 = por %p5277_p12, %p5276_p9 }
0x1b58   : > { %p5274_p5 = pneg %p5273_p2 }
0x1b5a   : > { %p5279_p1 = pnand %p5278_p13, %p5274_p5 }
0x1b5c   : > { %5282 = shalt.err (!%p5279_p1)
}
0x1b5d   : > { %s5400_s2 = smov 128   ;;  %s5401_s21 = smov 8   ;;  %v4991_v22 = vld [vmem:[%s6421_s11] sm:$0x7] }
0x1b5e   : > { %4649 = dma.vmem_to_hbm [thread:$0]  (%p6505_p4), %s6322_s25, 256, %s6319_s4, %s3809_s19, %s5400_s2, %s5400_s2, %s5401_s21   ;;  %v3790_v29 = vrot.slane %v4991_v22, %v5869_v12 }
0x1b5f   : > { %v4992_v32 = vld [vmem:[%s6422_s12] sm:$0x7]  ;;  %s750_s4 = scalar_lea.vmem [#allocation19], %s5759_s26  ;;  %s6506_s23 = sld [smem:[#allocation46_spill]] }
0x1b60   : > { %v3796_v20 = vrot.slane %v4992_v32, %v5869_v12  ;;  %s3822_s25 = sshll.u32 %s750_s4, 4  ;;  %s3804_s3 = scalar_lea.sflag [#allocation4], %s5756_s27  ;;  %s6366_s25 = int_to_ptr.vmem [resolvable:$true] %s3822_s25 }
0x1b61   : > { %s5283_s24 = scalar_lea.vmem %s6366_s25, 256  ;;  %s5402_s26 = smov [#allocation19]  }
0x1b62   : > { %p5284_p8 = scmp.ne.s32.totalorder %s6366_s25, %s5283_s24  ;;  %s5287_s5 = sshll.u32 %s5402_s26, 4  ;;  %s5288_s5 = int_to_ptr.vmem [resolvable:$false] %s5287_s5 }
0x1b63   : > { %s5289_s1 = scalar_lea.vmem %s5288_s5, 512  ;;  %p5290_p7 = scmp.lt.s32.totalorder %s6366_s25, %s5288_s5 }
0x1b64   : > { %p5285_p10 = pnand %p5284_p8, %p6505_p4  ;;  %p5291_p6 = scmp.lt.s32.totalorder %s5289_s1, %s5283_s24 }
0x1b65   : > { %s6364_s18 = scalar_lea.hbm %s6506_s23, %s4216_s0 }
0x1b66   : > { %p5286_p3 = pneg %p5285_p10  ;;  %p5292_p11 = por %p5291_p6, %p5290_p7 }
0x1b68   : > { %p5293_p0 = pnand %p5292_p11, %p5286_p3 }
0x1bd6   : > { %v3776_v21 = vpop.xlane.xlu0 %3775 }
0x1bd7   : > { %v3779_v13 = vmul.f32 0.0078125, %v3776_v21 }
0x1bd9   : > { %v3781_v15 = vadd.f32 1e-05, %v3779_v13 }
0x1bda   : > { %v3778_v16 = vpop.xlane.xlu1 %3777 }
0x1bdb   : > { %4985 = vrsqrt.f32 %v3781_v15  ;;  %v3780_v18 = vmul.f32 0.0078125, %v3778_v16 }
0x1bdd   : > { %v3782_v19 = vadd.f32 1e-05, %v3780_v18 }
0x1bdf   : > { %4987 = vrsqrt.f32 %v3782_v19 }
0x1be8   : > { %v4986_v30 = vpop.eup %4985 }
0x1be9   : > { %v3785_v34 = vmul.f32 %v4986_v30, %v3771_v46 }
0x1beb   : > { %v3791_v35 = vmul.f32 %v3790_v29, %v3785_v34 }
0x1bec   : > { %v4988_v36 = vpop.eup %4987 }
0x1bed   : > { %v3797_v41 = vadd.f32 %v3796_v20, %v3791_v35  ;;  %v3786_v42 = vmul.f32 %v4988_v36, %v3772_v48 }
0x1bef   : > { %v3792_v44 = vmul.f32 %v3790_v29, %v3786_v42  ;;  %3799 = vst [vmem:[%s750_s4] sm:$0xff] %v3797_v41 }
0x1bf1   : > { %v3798_v47 = vadd.f32 %v3796_v20, %v3792_v44 }
0x1bf3   : > { %3800 = vst [vmem:[%s750_s4 + $0x8] sm:$0xff] %v3798_v47 }
0x1bf4   : > { %5296 = shalt.err (!%p5293_p0)
}
0x1bf5   : > { %s5297_s0 = scalar_lea.hbm %s6364_s18, 256  ;;  %s5301_s7 = scalar_lea.hbm %s6506_s23, 512 }
0x1bf6   : > { %p5298_p2 = scmp.ne.s32.totalorder %s6364_s18, %s5297_s0  ;;  %p5302_p12 = scmp.lt.s32.totalorder %s6364_s18, %s6506_s23 }
0x1bf7   : > { %p5303_p13 = scmp.lt.s32.totalorder %s5301_s7, %s5297_s0 }
0x1bf8   : > { %p5299_p5 = pnand %p5298_p2, %p6505_p4 }
0x1bf9   : > { %p5304_p1 = por %p5303_p13, %p5302_p12 }
0x1bfa   : > { %p5300_p9 = pneg %p5299_p5 }
0x1bfc   : > { %p5305_p8 = pnand %p5304_p1, %p5300_p9 }
0x1bfe   : > { %5308 = shalt.err (!%p5305_p8)
}
0x1bff   : > { %4648 = dma.vmem_to_hbm [thread:$0]  (%p6505_p4), %s6366_s25, 256, %s6364_s18, %s3804_s3, %s5400_s2, %s5400_s2, %s5401_s21  }
0x1c00 PF: > { %s6507_s4 = sld [smem:[#allocation31_spill]]  ;;  %p6510_p3 = scmp.ge.s32.totalorder %s5375_s30, 2 }
0x1c01   : > { %s6508_s19 = sld [smem:[#allocation35_spill]] }
0x1c06   : > { %s3853_s29 = sand.u32 1, %s6507_s4  }
0x1c07   : > { %p6509_p10 = scmp.ne.s32.totalorder %s6508_s19, 0  ;;  %s3854_s24 = scalar_lea.sflag [#allocation4], %s3853_s29 }
0x1c09   : > { %p4685_p7 = pnand %p6510_p3, %p6509_p10 }
0x1c0b   : > { %p4686_p6 = pneg %p4685_p7 }
0x1c0d   : > { %5354 = dma.done.wait (%p4686_p6), %s3854_s24, 256  }
0x1c0e   : > { %5356 = vsyncadd (%p4686_p6), %s3854_s24, 4294967040  ;;  %s3863_s26 = scalar_lea.sflag [#allocation21], %s3853_s29 }
0x1c0f   : > { %5358 = dma.done.wait (%p4686_p6), %s3863_s26, 256  }
0x1c10   : > { %5360 = vsyncadd (%p4686_p6), %s3863_s26, 4294967040  ;;  %s6511_s30 = sld [smem:[#allocation33_spill]]  ;;  %s6514_s27 = smov %s5367_s28 }
0x1c11   : > { %s6512_s17 = sld [smem:[#allocation32_spill]] }
0x1c12   : > { %s6513_s29 = sld [smem:[#allocation34_spill]] }
0x1c16   : > { %p42_p4 = scmp.ge.s32.totalorder %s6511_s30, 4  }
0x1c17   : > { %s6515_s28 = smov %s6512_s17 }
0x1c18   :  { %44 = sbr.rel (!%p42_p4) target bundleno = 26 (0x1a), region = 195 }
0x1c1d   :  { %3868 = vsyncpa [#allocation3], 1 }
0x1c1e   :  { %3870 = vsyncpa [#allocation3 + $0x1], 1 }
0x1c1f   :  { %3871 = vsyncpa [#allocation6], 1 }
0x1c20   :  { %3873 = vsyncpa [#allocation6 + $0x1], 1 }
0x1c21   :  { %3874 = vsyncpa [#allocation9], 1 }
0x1c22   :  { %3875 = vsyncpa [#allocation12], 1 }
0x1c23   :  { %3876 = vsyncpa [#allocation15], 1 }
0x1c24   :  { %3877 = vsyncpa [#allocation18], 1 }
0x1c25   :  { %3878 = vsyncpa [#allocation4], 1 }
0x1c26   :  { %3880 = vsyncpa [#allocation4 + $0x1], 1 }
0x1c27   :  { %3881 = vsyncpa [#allocation21], 1 }
0x1c28   :  { %3883 = vsyncpa [#allocation21 + $0x1], 1 }

</bundles_post_ra>
